<compile_context>
chip_gen: v7x
topology: tpu7x:2x2x1
jax: 0.10.0
libtpu: 0.0.40
codegen_flags: <defaults>
</compile_context>

<pallas_src>
import math
import functools

import numpy as np
import jax
import jax.numpy as jnp
from jax import lax
from jax.experimental import pallas as pl
from jax.experimental.pallas import tpu as pltpu


# ----------------------------------------------------------------------------
# chip-aware tiling helpers
# ----------------------------------------------------------------------------
def _num_parallel_tiles():
    """Force >=2 grid tiles only on chips with 2 TensorCores (v4/v5p/v7x)."""
    try:
        kind = jax.devices()[0].device_kind.lower()
    except Exception:
        return 1
    return 2 if any(t in kind for t in ("v4", "v5p", "v7")) else 1


def _fit_divisor(batch, cap):
    bb = max(1, min(batch, cap))
    while batch % bb:
        bb -= 1
    return bb


def _pick_encoder_bblk(batch, n_nodes, hidden_node, hidden_edge, n_layers,
                       vmem_budget=24 << 20):
    # ~5 live (N, N, Hn) f32 temporaries + the hoisted (N*N, L*Hn) edge proj
    per_graph = (5 + n_layers) * n_nodes * n_nodes * hidden_node * 4
    per_graph += 8 * n_nodes * n_nodes * hidden_edge          # bf16 edge tile x2 buf
    cap = max(1, vmem_budget // max(per_graph, 1))
    nt = _num_parallel_tiles()
    if nt > 1 and batch >= nt:
        cap = min(cap, batch // nt)
    return _fit_divisor(batch, cap)


def _pick_decoder_bblk(batch, n_nodes, hidden, vmem_budget=24 << 20):
    # ctx + K + V + K2 + a few (Bblk, N, H) f32 per-step temporaries
    per_graph = 12 * n_nodes * hidden * 4
    cap = max(1, vmem_budget // max(per_graph, 1))
    nt = _num_parallel_tiles()
    if nt > 1 and batch >= nt:
        cap = min(cap, batch // nt)
    return _fit_divisor(batch, cap)


# ----------------------------------------------------------------------------
# Pallas kernel 1: fused multi-layer residual edge-GAT encoder
# ----------------------------------------------------------------------------
def gat_encoder_kernel(x_ref, e_ref, wfc_ref, bfc_ref, wij_ref, we_ref, ba_ref,
                       o_ref, *, n_layers, n_nodes, bblk, neg_slope):
    N = n_nodes
    Hn = x_ref.shape[-1]
    f32, bf16 = jnp.float32, jnp.bfloat16

    x = x_ref[...].reshape(bblk * N, Hn)                         # residual stream, f32
    e2 = e_ref[...].reshape(bblk * N * N, e_ref.shape[-1])       # bf16

    # layer-invariant edge projection, hoisted: one (R*N, He) x (He, L*Hn) matmul
    ae_all = jnp.dot(e2, we_ref[...], preferred_element_type=f32)   # (R*N, L*Hn)

    for l in range(n_layers):
        xf = jnp.dot(x.astype(bf16), wfc_ref[l],
                     preferred_element_type=f32) + bfc_ref[l]       # fc(x)
        aij = jnp.dot(xf.astype(bf16), wij_ref[l],
                      preferred_element_type=f32)                   # (R, 2Hn) fused Wi|Wj
        ai = aij[:, :Hn]                                            # target (i) term
        aj = aij[:, Hn:]                                            # source (j) term
        ae = ae_all[:, l * Hn:(l + 1) * Hn]                         # edge term, layer l
        pre = (ae.reshape(bblk, N, N, Hn)
               + ai.reshape(bblk, N, 1, Hn)
               + aj.reshape(bblk, 1, N, Hn)
               + ba_ref[l])
        alpha = jnp.maximum(pre, neg_slope * pre)                   # leaky_relu, slope<1
        am = jnp.max(alpha, axis=2, keepdims=True)
        ex = jnp.exp(alpha - am)
        sm = ex * pl.reciprocal(jnp.sum(ex, axis=2, keepdims=True), approx=True)
        aggr = jnp.sum(sm * xf.reshape(bblk, 1, N, Hn), axis=2)     # (bblk, N, Hn)
        x = x + aggr.reshape(bblk * N, Hn)                          # residual add
    o_ref[...] = x.reshape(bblk, N, Hn)


def gat_encoder(x, e, layer_params):
    B, N, Hn = x.shape
    He = e.shape[-1]
    L = len(layer_params)
    bf16 = jnp.bfloat16

    Wfc = jnp.stack([lp['W_fc'] for lp in layer_params]).astype(bf16)     # (L, Hn, Hn)
    bfc = jnp.stack([lp['b_fc'] for lp in layer_params])                  # (L, 1, Hn)
    Wij = jnp.stack([jnp.concatenate([lp['W_i'], lp['W_j']], axis=1)
                     for lp in layer_params]).astype(bf16)                # (L, Hn, 2Hn)
    We_all = jnp.concatenate([lp['W_e'] for lp in layer_params],
                             axis=1).astype(bf16)                         # (He, L*Hn)
    ba = jnp.stack([lp['b_attn'] for lp in layer_params])                 # (L, 1, Hn)

    Bblk = _pick_encoder_bblk(B, N, Hn, He, L)
    kern = functools.partial(gat_encoder_kernel, n_layers=L, n_nodes=N,
                             bblk=Bblk, neg_slope=0.2)
    return pl.pallas_call(
        kern,
        out_shape=jax.ShapeDtypeStruct((B, N, Hn), jnp.float32),
        grid=(B // Bblk,),
        in_specs=[
            pl.BlockSpec((Bblk, N, Hn), lambda b: (b, 0, 0)),
            pl.BlockSpec((Bblk, N * N, He), lambda b: (b, 0, 0)),
            pl.BlockSpec((L, Hn, Hn), lambda b: (0, 0, 0)),
            pl.BlockSpec((L, 1, Hn), lambda b: (0, 0, 0)),
            pl.BlockSpec((L, Hn, 2 * Hn), lambda b: (0, 0, 0)),
            pl.BlockSpec((He, L * Hn), lambda b: (0, 0)),
            pl.BlockSpec((L, 1, Hn), lambda b: (0, 0, 0)),
        ],
        out_specs=pl.BlockSpec((Bblk, N, Hn), lambda b: (b, 0, 0)),
        compiler_params=pltpu.CompilerParams(
            dimension_semantics=("parallel",),
            vmem_limit_bytes=48 * 1024 * 1024),
    )(x, e.astype(bf16), Wfc, bfc, Wij, We_all, ba)


# ----------------------------------------------------------------------------
# Pallas kernel 2: full decoder rollout (all n_steps in one fori_loop)
# ----------------------------------------------------------------------------
def decoder_rollout_kernel(*refs, n_steps, n_nodes, hidden, bblk, norm1, norm2,
                           mode):
    if mode == 'sample':
        seed_ref, refs = refs[0], refs[1:]
    if mode == 'action':
        (ctx_ref, pool_ref, dem_ref, cap_ref, act_ref, wkvk2_ref, g_ref,
         wfc_in_ref, wfc_cap_ref, wfc1_ref, ww_ref, wfca_ref,
         actions_ref, stats_ref) = refs
    else:
        (ctx_ref, pool_ref, dem_ref, cap_ref, wkvk2_ref, g_ref,
         wfc_in_ref, wfc_cap_ref, wfc1_ref, ww_ref, wfca_ref,
         actions_ref, stats_ref) = refs
        act_ref = None

    N, H = n_nodes, hidden
    f32, bf16 = jnp.float32, jnp.bfloat16

    ctx = ctx_ref[...]                                 # (bblk, N, H) f32
    pool0 = pool_ref[...][:, 0, :]                     # (bblk, H)
    demands = dem_ref[...][:, 0, :]                    # (bblk, N)  lane-dense
    cap_init = cap_ref[...][:, 0, :]                   # (bblk, 1)
    wkvk2 = wkvk2_ref[...]                             # (H, 3H) bf16
    G = g_ref[...]                                     # (H, H) bf16, block-diag S S^T
    wfc_in = wfc_in_ref[...]                           # (H, H) bf16
    wfc_cap = wfc_cap_ref[...]                         # (1, H) f32 (elementwise)
    wfc1 = wfc1_ref[...]                               # (H, H) bf16
    ww = ww_ref[...]                                   # (H, H) bf16
    wfca = wfca_ref[...]                               # (H, H) bf16

    # step-invariant K / V / K2 projections, computed once in the prologue
    kvk = jnp.dot(ctx.reshape(bblk * N, H).astype(bf16), wkvk2,
                  preferred_element_type=f32)          # (bblk*N, 3H)
    K = kvk[:, :H].reshape(bblk, N, H)
    V = kvk[:, H:2 * H].reshape(bblk, N, H)
    K2 = kvk[:, 2 * H:].reshape(bblk, N, H)

    iota_n = lax.broadcasted_iota(jnp.int32, (bblk, N), 1).astype(f32)
    col0 = iota_n == 0.0                               # depot column marker
    step_iota = lax.broadcasted_iota(jnp.int32, (bblk, n_steps), 1)

    if mode == 'sample':
        pltpu.prng_seed(seed_ref[0] + pl.program_id(0))
    if mode == 'action':
        act_old = act_ref[...][:, 0, :].astype(f32)    # (bblk, n_steps)

    def update_masks(onehot, go_depot, mask1, cap_now):
        # TODO(synk): update_mask is not defined in the provided module; standard
        # CVRP masking (visited / over-capacity / depot) is implemented here.
        mask1 = jnp.maximum(mask1, onehot)
        mask1 = jnp.where(col0, 0.0, mask1)            # depot never marked visited
        over = (demands > cap_now).astype(f32)
        mask = jnp.maximum(mask1, over)
        all_done = jnp.sum(mask1, axis=1, keepdims=True) >= (N - 1)
        depot_m = jnp.where(jnp.logical_and(go_depot, jnp.logical_not(all_done)),
                            1.0, 0.0)
        mask = jnp.where(col0, depot_m, mask)
        return mask, mask1

    # i == 0 branch of the reference (current position = depot, index 0)
    mask1_0 = jnp.zeros((bblk, N), f32)
    mask_0, mask1_0 = update_masks(col0.astype(f32),
                                   jnp.ones((bblk, 1), jnp.bool_),
                                   mask1_0, cap_init)
    carry0 = (mask_0, mask1_0, cap_init,
              ctx[:, 0, :],                            # _input
              pool0,
              jnp.zeros((bblk, 1), f32),               # sum log p
              jnp.zeros((bblk, 1), f32),               # sum entropy
              jnp.zeros((bblk, 1), f32),               # entropy count
              jnp.zeros((bblk, n_steps), f32))         # actions

    def step(i, carry):
        (mask, mask1, dyn_cap, _inp, pool,
         sum_logp, sum_ent, cnt_ent, acts) = carry

        # ---- decoder input:  fc([input, cap]) + fc1(pool)  (fc1 loop-carried) ----
        dec_in = (jnp.dot(_inp.astype(bf16), wfc_in, preferred_element_type=f32)
                  + dyn_cap * wfc_cap)                              # (bblk, H)
        pool = jnp.dot(pool.astype(bf16), wfc1, preferred_element_type=f32)
        state = dec_in + pool

        # ---- Attention1 (8 heads).  G = S S^T broadcasts each head's QK sum
        #      back onto its own lanes, so everything stays H-lane-dense. ----
        q = jnp.dot(state.astype(bf16), ww, preferred_element_type=f32)
        kq = K * q[:, None, :]                                       # (bblk, N, H)
        seg = jnp.dot(kq.reshape(bblk * N, H).astype(bf16), G,
                      preferred_element_type=f32).reshape(bblk, N, H) * norm1
        u = jnp.where(mask[:, :, None] > 0, -1e9, seg)
        um = jnp.max(u, axis=1, keepdims=True)
        ue = jnp.exp(u - um)
        scf = ue * pl.reciprocal(jnp.sum(ue, axis=1, keepdims=True), approx=True)
        att = jnp.sum(V * scf, axis=1)                               # (bblk, H)
        hid = jnp.dot(att.astype(bf16), wfca, preferred_element_type=f32)

        # ---- ProbAttention pointer logits / probs (lane-dense over nodes) ----
        compat2 = jnp.sum(K2 * hid[:, None, :], axis=2) * norm2      # (bblk, N)
        logits = jnp.tanh(compat2) * 10.0
        logits = jnp.where(mask > 0, -1e9, logits)
        lm = jnp.max(logits, axis=1, keepdims=True)
        le = jnp.exp(logits - lm)
        p = le / jnp.sum(le, axis=1, keepdims=True)    # exact divide (feeds log-prob)

        # ---- action selection ----
        if mode == 'action':
            sel = step_iota == i
            idx = jnp.sum(jnp.where(sel, act_old, 0.0), axis=1, keepdims=True)
        else:
            if mode == 'greedy':
                score = p
            else:   # categorical sampling via Gumbel-max on the on-chip PRNG
                bits = pltpu.bitcast(pltpu.prng_random_bits((bblk, N)), jnp.uint32)
                bits = pltpu.bitcast(bits >> 8, jnp.int32)
                u01 = bits.astype(f32) * (1.0 / (1 << 24))
                g = -jnp.log(-jnp.log(u01 + 1e-12) + 1e-12)
                score = jnp.log(p + 1e-30) + g
            smax = jnp.max(score, axis=1, keepdims=True)
            idx = jnp.min(jnp.where(score >= smax, iota_n, float(N)),
                          axis=1, keepdims=True)       # lowest-index argmax

        onehot = (iota_n == idx).astype(f32)                         # (bblk, N)
        psel = jnp.sum(onehot * p, axis=1, keepdims=True)
        logp = jnp.log(psel + 1e-30)                                 # eps: no -inf leak
        ent = -jnp.sum(p * jnp.log(p + 1e-30), axis=1, keepdims=True)
        done = jnp.sum(mask1, axis=1, keepdims=True) >= (N - 1)
        logp_c = jnp.where(done, 0.0, logp)
        ent_c = jnp.where(done, 0.0, ent)
        sum_logp = sum_logp + logp_c
        sum_ent = sum_ent + ent_c
        cnt_ent = cnt_ent + jnp.where(ent_c != 0.0, 1.0, 0.0)
        acts = jnp.where(step_iota == i, idx, acts)

        # ---- capacity / mask / current-node updates ----
        go_depot = idx == 0.0
        cur_d = jnp.sum(onehot * demands, axis=1, keepdims=True)
        dyn_cap = jnp.where(go_depot, cap_init, dyn_cap - cur_d)
        mask, mask1 = update_masks(onehot, go_depot, mask1, dyn_cap)
        _inp = jnp.sum(onehot[:, :, None] * ctx, axis=1)             # chosen node emb
        return (mask, mask1, dyn_cap, _inp, pool,
                sum_logp, sum_ent, cnt_ent, acts)

    carry = lax.fori_loop(0, n_steps, step, carry0)
    sum_logp, sum_ent, cnt_ent, acts = carry[5], carry[6], carry[7], carry[8]
    actions_ref[...] = acts[:, None, :].astype(jnp.int32)
    stats_ref[...] = jnp.concatenate([sum_logp, sum_ent, cnt_ent],
                                     axis=1)[:, None, :]


def decode(dp, ctx, pool, actions_old, capcity, demand, n_steps, batch_size,
           greedy=False, _action=False, rng=None):
    B, N, H = ctx.shape
    n_heads = 8
    bf16 = jnp.bfloat16
    Bblk = _pick_decoder_bblk(B, N, H)
    T = B // Bblk

    # head "segment broadcast" constant: G = S S^T (block-diagonal ones)
    hd = H // n_heads
    G_np = (np.arange(H)[:, None] // hd == np.arange(H)[None, :] // hd)
    G = jnp.asarray(G_np.astype(np.float32)).astype(bf16)

    W_kvk2 = jnp.concatenate([dp['W_k'], dp['W_v'], dp['W_k2']],
                             axis=1).astype(bf16)                    # (H, 3H)
    W_fc = dp['W_fc']                                                # (H+1, H)
    wfc_in = W_fc[:H].astype(bf16)
    wfc_cap = W_fc[H:H + 1]                                          # (1, H) f32
    wfc1 = dp['W_fc1'].astype(bf16)
    ww = dp['W_w'].astype(bf16)
    wfca = dp['W_fc_attn'].astype(bf16)

    pool3 = pool.reshape(B, 1, H)
    dem3 = demand.reshape(B, N).astype(jnp.float32)[:, None, :]      # (B, 1, N)
    cap3 = capcity.reshape(B, 1, 1).astype(jnp.float32)
    norm1 = 1.0 / math.sqrt(H / n_heads)
    norm2 = 1.0 / math.sqrt(H)

    mode = 'action' if _action else ('greedy' if greedy else 'sample')
    kern = functools.partial(decoder_rollout_kernel, n_steps=n_steps, n_nodes=N,
                             hidden=H, bblk=Bblk, norm1=norm1, norm2=norm2,
                             mode=mode)

    def bspec(shape):
        return pl.BlockSpec(shape, lambda b: (b, 0, 0))

    def cspec(shape):
        return pl.BlockSpec(shape, lambda b: (0, 0))

    in_specs = [bspec((Bblk, N, H)), bspec((Bblk, 1, H)),
                bspec((Bblk, 1, N)), bspec((Bblk, 1, 1))]
    args = [ctx, pool3, dem3, cap3]
    if mode == 'action':
        in_specs.append(bspec((Bblk, 1, n_steps)))
        args.append(actions_old.reshape(B, n_steps).astype(jnp.int32)[:, None, :])
    in_specs += [cspec((H, 3 * H)), cspec((H, H)), cspec((H, H)), cspec((1, H)),
                 cspec((H, H)), cspec((H, H)), cspec((H, H))]
    args += [W_kvk2, G, wfc_in, wfc_cap, wfc1, ww, wfca]
    if mode == 'sample':
        if rng is None:
            rng = jax.random.PRNGKey(0)
        seed = jax.random.randint(rng, (1,), 0, jnp.iinfo(jnp.int32).max,
                                  dtype=jnp.int32)
        in_specs = [pl.BlockSpec(memory_space=pltpu.MemorySpace.SMEM)] + in_specs
        args = [seed] + args

    actions, stats = pl.pallas_call(
        kern,
        out_shape=(jax.ShapeDtypeStruct((B, 1, n_steps), jnp.int32),
                   jax.ShapeDtypeStruct((B, 1, 3), jnp.float32)),
        grid=(T,),
        in_specs=in_specs,
        out_specs=(pl.BlockSpec((Bblk, 1, n_steps), lambda b: (b, 0, 0)),
                   pl.BlockSpec((Bblk, 1, 3), lambda b: (b, 0, 0))),
        compiler_params=pltpu.CompilerParams(
            dimension_semantics=("parallel",),
            vmem_limit_bytes=48 * 1024 * 1024),
    )(*args)

    actions = actions.reshape(B, n_steps)
    stats = stats.reshape(B, 3)
    log_sum = stats[:, 0]
    if _action:
        num_e = stats[:, 2]
        entropy = jnp.where(num_e > 0, stats[:, 1] / jnp.maximum(num_e, 1.0), 0.0)
        return 0, 0, entropy, log_sum
    return actions, log_sum, 0, 0


# ----------------------------------------------------------------------------
# Plain-JAX glue (one-shot ops: input projections + BatchNorm + mean pool)
# ----------------------------------------------------------------------------
def batch_norm_train(x, gamma, beta, eps=1e-5):
    mean = jnp.mean(x, axis=0, keepdims=True)
    var = jnp.mean((x - mean) ** 2, axis=0, keepdims=True)
    return (x - mean) / jnp.sqrt(var + eps) * gamma + beta


def model_forward(params, data, actions_old, n_steps, batch_size,
                  greedy=False, _action=False, rng=None):
    B = batch_size
    coords, demand = data['x'], data['demand']
    edge_attr, capcity = data['edge_attr'], data['capcity']
    # ----- Encoder -----
    xin = jnp.concatenate([coords, demand], axis=-1)                 # (B*N, in_node_dim)
    h = xin @ params['W_node'] + params['b_node']
    h = batch_norm_train(h, params['bn_g'], params['bn_b'])
    e = edge_attr @ params['W_edge'] + params['b_edge']
    e = batch_norm_train(e, params['be_g'], params['be_b'])
    N = coords.shape[0] // B
    Hn = params['W_node'].shape[1]
    h = h.reshape(B, N, Hn)
    e = e.reshape(B, N * N, -1)
    x = gat_encoder(h, e, params['gat_layers'])
    pooled = jnp.mean(x, axis=1)
    # ----- Decoder -----
    actions, log_p, entropy, dists = decode(params['dec'], x, pooled, actions_old,
                                            capcity, demand, n_steps, B,
                                            greedy=greedy, _action=_action, rng=rng)
    return actions, log_p, entropy, dists, x


# ----------------------------------------------------------------------------
# Deterministic parameter init (orthogonal weights, zero biases, like INIT=True)
# ----------------------------------------------------------------------------
def orthogonal_init(key, shape):
    n = max(shape)
    a = np.asarray(jax.random.normal(key, (n, n), dtype=jnp.float32))
    q, r = np.linalg.qr(a)
    q = q * np.sign(np.diag(r))
    return jnp.asarray(q[:shape[0], :shape[1]], dtype=jnp.float32)


def init_params(key, input_node_dim, hidden_node_dim, input_edge_dim,
                hidden_edge_dim, conv_layers):
    keys = iter(jax.random.split(key, 32))
    Hn, He = hidden_node_dim, hidden_edge_dim
    p = {
        'W_node': orthogonal_init(next(keys), (input_node_dim, Hn)),
        'b_node': jnp.zeros((Hn,), jnp.float32),
        'W_edge': orthogonal_init(next(keys), (input_edge_dim, He)),
        'b_edge': jnp.zeros((He,), jnp.float32),
        'bn_g': jnp.ones((Hn,), jnp.float32), 'bn_b': jnp.zeros((Hn,), jnp.float32),
        'be_g': jnp.ones((He,), jnp.float32), 'be_b': jnp.zeros((He,), jnp.float32),
    }
    layers = []
    for _ in range(conv_layers):
        W_attn = orthogonal_init(next(keys), (2 * Hn + He, Hn))
        layers.append(dict(
            W_fc=orthogonal_init(next(keys), (Hn, Hn)),
            b_fc=jnp.zeros((1, Hn), jnp.float32),
            W_i=W_attn[:Hn],
            W_j=W_attn[Hn:2 * Hn],
            W_e=W_attn[2 * Hn:],
            b_attn=jnp.zeros((1, Hn), jnp.float32),
        ))
    p['gat_layers'] = layers
    p['dec'] = dict(
        W_w=orthogonal_init(next(keys), (Hn, Hn)),
        W_k=orthogonal_init(next(keys), (Hn, Hn)),
        W_v=orthogonal_init(next(keys), (Hn, Hn)),
        W_fc_attn=orthogonal_init(next(keys), (Hn, Hn)),
        W_k2=orthogonal_init(next(keys), (Hn, Hn)),
        W_fc=orthogonal_init(next(keys), (Hn + 1, Hn)),
        W_fc1=orthogonal_init(next(keys), (Hn, Hn)),
    )
    return p


# ----------------------------------------------------------------------------
if __name__ == "__main__":
    B, N = 2, 8                       # small: 2 graphs, 8 nodes (node 0 = depot)
    input_node_dim, hidden_node_dim = 3, 32
    input_edge_dim, hidden_edge_dim = 1, 16
    conv_layers = 3
    n_steps = 12

    key = jax.random.PRNGKey(0)
    kp, kc, kdm = jax.random.split(key, 3)
    params = init_params(kp, input_node_dim, hidden_node_dim,
                         input_edge_dim, hidden_edge_dim, conv_layers)

    coords = jax.random.uniform(kc, (B, N, 2), dtype=jnp.float32)
    demand = jax.random.uniform(kdm, (B, N, 1), dtype=jnp.float32,
                                minval=0.05, maxval=0.3)
    demand = demand.at[:, 0, :].set(0.0)              # depot has zero demand
    # dense complete-graph edge attribute: euclidean distance, row i*N+j = edge j->i
    dist = jnp.sqrt(jnp.sum((coords[:, :, None, :] - coords[:, None, :, :]) ** 2,
                            axis=-1) + 1e-12)
    data = dict(
        x=coords.reshape(B * N, 2),
        demand=demand.reshape(B * N, 1),
        edge_attr=dist.reshape(B * N * N, 1),
        capcity=jnp.full((B, 1), 1.0, jnp.float32),
    )

    actions, log_p, entropy, dists, x = model_forward(
        params, data, actions_old=None, n_steps=n_steps, batch_size=B,
        greedy=True, _action=False)

    jax.block_until_ready((actions, log_p, x))
    assert actions.shape == (B, n_steps)
    assert bool(jnp.all(jnp.isfinite(log_p)))
    assert bool(jnp.all((actions >= 0) & (actions < N)))
    print("KERNEL_OK")
</pallas_src>

<mosaic_0001>
module attributes {stable_mosaic.version = 11 : i64} {
  func.func @gat_encoder_kernel(%arg0: i32, %arg1: memref<2x8x32xf32, #tpu.memory_space<vmem>>, %arg2: memref<2x64x16xbf16, #tpu.memory_space<vmem>>, %arg3: memref<3x32x32xbf16, #tpu.memory_space<vmem>>, %arg4: memref<3x1x32xf32, #tpu.memory_space<vmem>>, %arg5: memref<3x32x64xbf16, #tpu.memory_space<vmem>>, %arg6: memref<16x96xbf16, #tpu.memory_space<vmem>>, %arg7: memref<3x1x32xf32, #tpu.memory_space<vmem>>, %arg8: memref<2x8x32xf32, #tpu.memory_space<vmem>>) attributes {dimension_semantics = [#tpu.dimension_semantics<parallel>], iteration_bounds = array<i64: 1>, scalar_prefetch = 0 : i64, scratch_operands = 0 : i64, tpu.core_type = #tpu.core_type<tc>, window_params = [{transform_indices = @transform_0, window_bounds = array<i64: 2, 8, 32>}, {transform_indices = @transform_1, window_bounds = array<i64: 2, 64, 16>}, {pipeline_mode = #tpu.pipeline_mode<synchronous>, transform_indices = @transform_2, window_bounds = array<i64: 3, 32, 32>}, {pipeline_mode = #tpu.pipeline_mode<synchronous>, transform_indices = @transform_3, window_bounds = array<i64: 3, 1, 32>}, {pipeline_mode = #tpu.pipeline_mode<synchronous>, transform_indices = @transform_4, window_bounds = array<i64: 3, 32, 64>}, {pipeline_mode = #tpu.pipeline_mode<synchronous>, transform_indices = @transform_5, window_bounds = array<i64: 16, 96>}, {pipeline_mode = #tpu.pipeline_mode<synchronous>, transform_indices = @transform_6, window_bounds = array<i64: 3, 1, 32>}, {transform_indices = @transform_7, window_bounds = array<i64: 2, 8, 32>}]} {
    %c0 = arith.constant 0 : index
    %c0_0 = arith.constant 0 : index
    %c0_1 = arith.constant 0 : index
    %0 = vector.load %arg1[%c0, %c0_0, %c0_1] : memref<2x8x32xf32, #tpu.memory_space<vmem>>, vector<2x8x32xf32>
    %1 = vector.shape_cast %0 : vector<2x8x32xf32> to vector<16x32xf32>
    %c0_2 = arith.constant 0 : index
    %c0_3 = arith.constant 0 : index
    %c0_4 = arith.constant 0 : index
    %2 = vector.load %arg2[%c0_2, %c0_3, %c0_4] : memref<2x64x16xbf16, #tpu.memory_space<vmem>>, vector<2x64x16xbf16>
    %3 = vector.shape_cast %2 : vector<2x64x16xbf16> to vector<128x16xbf16>
    %c0_5 = arith.constant 0 : index
    %c0_6 = arith.constant 0 : index
    %4 = vector.load %arg6[%c0_5, %c0_6] : memref<16x96xbf16, #tpu.memory_space<vmem>>, vector<16x96xbf16>
    %cst = arith.constant dense<0.000000e+00> : vector<128x96xf32>
    %5 = tpu.matmul %3, %4, %cst {dimension_numbers = #tpu.dot_dimension_numbers<[1], [0], [0], [1], [0, 0, 1, 1], [], []>} : vector<128x16xbf16>, vector<16x96xbf16>, vector<128x96xf32> -> vector<128x96xf32>
    %6 = arith.truncf %1 : vector<16x32xf32> to vector<16x32xbf16>
    %c0_7 = arith.constant 0 : index
    %c0_8 = arith.constant 0 : index
    %c0_9 = arith.constant 0 : index
    %7 = vector.load %arg3[%c0_7, %c0_8, %c0_9] : memref<3x32x32xbf16, #tpu.memory_space<vmem>>, vector<1x32x32xbf16>
    %8 = vector.shape_cast %7 : vector<1x32x32xbf16> to vector<32x32xbf16>
    %cst_10 = arith.constant dense<0.000000e+00> : vector<16x32xf32>
    %9 = tpu.matmul %6, %8, %cst_10 {dimension_numbers = #tpu.dot_dimension_numbers<[1], [0], [0], [1], [0, 0, 1, 1], [], []>} : vector<16x32xbf16>, vector<32x32xbf16>, vector<16x32xf32> -> vector<16x32xf32>
    %c0_11 = arith.constant 0 : index
    %c0_12 = arith.constant 0 : index
    %c0_13 = arith.constant 0 : index
    %10 = vector.load %arg4[%c0_11, %c0_12, %c0_13] : memref<3x1x32xf32, #tpu.memory_space<vmem>>, vector<1x1x32xf32>
    %11 = vector.shape_cast %10 : vector<1x1x32xf32> to vector<1x32xf32>
    %12 = vector.broadcast %11 : vector<1x32xf32> to vector<16x32xf32>
    %13 = arith.addf %9, %12 : vector<16x32xf32>
    %14 = arith.truncf %13 : vector<16x32xf32> to vector<16x32xbf16>
    %c0_14 = arith.constant 0 : index
    %c0_15 = arith.constant 0 : index
    %c0_16 = arith.constant 0 : index
    %15 = vector.load %arg5[%c0_14, %c0_15, %c0_16] : memref<3x32x64xbf16, #tpu.memory_space<vmem>>, vector<1x32x64xbf16>
    %16 = vector.shape_cast %15 : vector<1x32x64xbf16> to vector<32x64xbf16>
    %cst_17 = arith.constant dense<0.000000e+00> : vector<16x64xf32>
    %17 = tpu.matmul %14, %16, %cst_17 {dimension_numbers = #tpu.dot_dimension_numbers<[1], [0], [0], [1], [0, 0, 1, 1], [], []>} : vector<16x32xbf16>, vector<32x64xbf16>, vector<16x64xf32> -> vector<16x64xf32>
    %18 = vector.extract_strided_slice %17 {offsets = [0, 0], sizes = [16, 32], strides = [1, 1]} : vector<16x64xf32> to vector<16x32xf32>
    %19 = vector.extract_strided_slice %17 {offsets = [0, 32], sizes = [16, 32], strides = [1, 1]} : vector<16x64xf32> to vector<16x32xf32>
    %20 = vector.extract_strided_slice %5 {offsets = [0, 0], sizes = [128, 32], strides = [1, 1]} : vector<128x96xf32> to vector<128x32xf32>
    %21 = vector.shape_cast %20 : vector<128x32xf32> to vector<2x8x8x32xf32>
    %22 = vector.shape_cast %18 : vector<16x32xf32> to vector<2x8x1x32xf32>
    %23 = vector.broadcast %22 : vector<2x8x1x32xf32> to vector<2x8x8x32xf32>
    %24 = arith.addf %21, %23 : vector<2x8x8x32xf32>
    %25 = vector.shape_cast %19 : vector<16x32xf32> to vector<2x1x8x32xf32>
    %26 = vector.broadcast %25 : vector<2x1x8x32xf32> to vector<2x8x8x32xf32>
    %27 = arith.addf %24, %26 : vector<2x8x8x32xf32>
    %c0_18 = arith.constant 0 : index
    %c0_19 = arith.constant 0 : index
    %c0_20 = arith.constant 0 : index
    %28 = vector.load %arg7[%c0_18, %c0_19, %c0_20] : memref<3x1x32xf32, #tpu.memory_space<vmem>>, vector<1x1x32xf32>
    %29 = vector.shape_cast %28 : vector<1x1x32xf32> to vector<1x32xf32>
    %30 = vector.shape_cast %29 : vector<1x32xf32> to vector<1x1x1x32xf32>
    %31 = vector.broadcast %30 : vector<1x1x1x32xf32> to vector<2x8x8x32xf32>
    %32 = arith.addf %27, %31 : vector<2x8x8x32xf32>
    %cst_21 = arith.constant 2.000000e-01 : f32
    %33 = vector.broadcast %cst_21 : f32 to vector<2x8x8x32xf32>
    %34 = arith.mulf %33, %32 : vector<2x8x8x32xf32>
    %35 = arith.maximumf %32, %34 : vector<2x8x8x32xf32>
    %cst_22 = arith.constant dense<0xFF800000> : vector<2x8x32xf32>
    %36 = vector.multi_reduction <maximumf>, %35, %cst_22 [2] : vector<2x8x8x32xf32> to vector<2x8x32xf32>
    %37 = vector.shape_cast %36 : vector<2x8x32xf32> to vector<2x8x1x32xf32>
    %38 = vector.broadcast %37 : vector<2x8x1x32xf32> to vector<2x8x8x32xf32>
    %39 = arith.subf %35, %38 : vector<2x8x8x32xf32>
    %40 = math.exp %39 : vector<2x8x8x32xf32>
    %cst_23 = arith.constant dense<0.000000e+00> : vector<2x8x32xf32>
    %41 = vector.multi_reduction <add>, %40, %cst_23 [2] : vector<2x8x8x32xf32> to vector<2x8x32xf32>
    %42 = vector.shape_cast %41 : vector<2x8x32xf32> to vector<2x8x1x32xf32>
    %43 = tpu.reciprocal %42 {approx = true} : vector<2x8x1x32xf32> -> vector<2x8x1x32xf32>
    %44 = vector.broadcast %43 : vector<2x8x1x32xf32> to vector<2x8x8x32xf32>
    %45 = arith.mulf %40, %44 : vector<2x8x8x32xf32>
    %46 = vector.shape_cast %13 : vector<16x32xf32> to vector<2x1x8x32xf32>
    %47 = vector.broadcast %46 : vector<2x1x8x32xf32> to vector<2x8x8x32xf32>
    %48 = arith.mulf %45, %47 : vector<2x8x8x32xf32>
    %cst_24 = arith.constant dense<0.000000e+00> : vector<2x8x32xf32>
    %49 = vector.multi_reduction <add>, %48, %cst_24 [2] : vector<2x8x8x32xf32> to vector<2x8x32xf32>
    %50 = vector.shape_cast %49 : vector<2x8x32xf32> to vector<16x32xf32>
    %51 = arith.addf %1, %50 : vector<16x32xf32>
    %52 = arith.truncf %51 : vector<16x32xf32> to vector<16x32xbf16>
    %c1 = arith.constant 1 : index
    %c0_25 = arith.constant 0 : index
    %c0_26 = arith.constant 0 : index
    %53 = vector.load %arg3[%c1, %c0_25, %c0_26] : memref<3x32x32xbf16, #tpu.memory_space<vmem>>, vector<1x32x32xbf16>
    %54 = vector.shape_cast %53 : vector<1x32x32xbf16> to vector<32x32xbf16>
    %cst_27 = arith.constant dense<0.000000e+00> : vector<16x32xf32>
    %55 = tpu.matmul %52, %54, %cst_27 {dimension_numbers = #tpu.dot_dimension_numbers<[1], [0], [0], [1], [0, 0, 1, 1], [], []>} : vector<16x32xbf16>, vector<32x32xbf16>, vector<16x32xf32> -> vector<16x32xf32>
    %c1_28 = arith.constant 1 : index
    %c0_29 = arith.constant 0 : index
    %c0_30 = arith.constant 0 : index
    %56 = vector.load %arg4[%c1_28, %c0_29, %c0_30] : memref<3x1x32xf32, #tpu.memory_space<vmem>>, vector<1x1x32xf32>
    %57 = vector.shape_cast %56 : vector<1x1x32xf32> to vector<1x32xf32>
    %58 = vector.broadcast %57 : vector<1x32xf32> to vector<16x32xf32>
    %59 = arith.addf %55, %58 : vector<16x32xf32>
    %60 = arith.truncf %59 : vector<16x32xf32> to vector<16x32xbf16>
    %c1_31 = arith.constant 1 : index
    %c0_32 = arith.constant 0 : index
    %c0_33 = arith.constant 0 : index
    %61 = vector.load %arg5[%c1_31, %c0_32, %c0_33] : memref<3x32x64xbf16, #tpu.memory_space<vmem>>, vector<1x32x64xbf16>
    %62 = vector.shape_cast %61 : vector<1x32x64xbf16> to vector<32x64xbf16>
    %cst_34 = arith.constant dense<0.000000e+00> : vector<16x64xf32>
    %63 = tpu.matmul %60, %62, %cst_34 {dimension_numbers = #tpu.dot_dimension_numbers<[1], [0], [0], [1], [0, 0, 1, 1], [], []>} : vector<16x32xbf16>, vector<32x64xbf16>, vector<16x64xf32> -> vector<16x64xf32>
    %64 = vector.extract_strided_slice %63 {offsets = [0, 0], sizes = [16, 32], strides = [1, 1]} : vector<16x64xf32> to vector<16x32xf32>
    %65 = vector.extract_strided_slice %63 {offsets = [0, 32], sizes = [16, 32], strides = [1, 1]} : vector<16x64xf32> to vector<16x32xf32>
    %66 = vector.extract_strided_slice %5 {offsets = [0, 32], sizes = [128, 32], strides = [1, 1]} : vector<128x96xf32> to vector<128x32xf32>
    %67 = vector.shape_cast %66 : vector<128x32xf32> to vector<2x8x8x32xf32>
    %68 = vector.shape_cast %64 : vector<16x32xf32> to vector<2x8x1x32xf32>
    %69 = vector.broadcast %68 : vector<2x8x1x32xf32> to vector<2x8x8x32xf32>
    %70 = arith.addf %67, %69 : vector<2x8x8x32xf32>
    %71 = vector.shape_cast %65 : vector<16x32xf32> to vector<2x1x8x32xf32>
    %72 = vector.broadcast %71 : vector<2x1x8x32xf32> to vector<2x8x8x32xf32>
    %73 = arith.addf %70, %72 : vector<2x8x8x32xf32>
    %c1_35 = arith.constant 1 : index
    %c0_36 = arith.constant 0 : index
    %c0_37 = arith.constant 0 : index
    %74 = vector.load %arg7[%c1_35, %c0_36, %c0_37] : memref<3x1x32xf32, #tpu.memory_space<vmem>>, vector<1x1x32xf32>
    %75 = vector.shape_cast %74 : vector<1x1x32xf32> to vector<1x32xf32>
    %76 = vector.shape_cast %75 : vector<1x32xf32> to vector<1x1x1x32xf32>
    %77 = vector.broadcast %76 : vector<1x1x1x32xf32> to vector<2x8x8x32xf32>
    %78 = arith.addf %73, %77 : vector<2x8x8x32xf32>
    %cst_38 = arith.constant 2.000000e-01 : f32
    %79 = vector.broadcast %cst_38 : f32 to vector<2x8x8x32xf32>
    %80 = arith.mulf %79, %78 : vector<2x8x8x32xf32>
    %81 = arith.maximumf %78, %80 : vector<2x8x8x32xf32>
    %cst_39 = arith.constant dense<0xFF800000> : vector<2x8x32xf32>
    %82 = vector.multi_reduction <maximumf>, %81, %cst_39 [2] : vector<2x8x8x32xf32> to vector<2x8x32xf32>
    %83 = vector.shape_cast %82 : vector<2x8x32xf32> to vector<2x8x1x32xf32>
    %84 = vector.broadcast %83 : vector<2x8x1x32xf32> to vector<2x8x8x32xf32>
    %85 = arith.subf %81, %84 : vector<2x8x8x32xf32>
    %86 = math.exp %85 : vector<2x8x8x32xf32>
    %cst_40 = arith.constant dense<0.000000e+00> : vector<2x8x32xf32>
    %87 = vector.multi_reduction <add>, %86, %cst_40 [2] : vector<2x8x8x32xf32> to vector<2x8x32xf32>
    %88 = vector.shape_cast %87 : vector<2x8x32xf32> to vector<2x8x1x32xf32>
    %89 = tpu.reciprocal %88 {approx = true} : vector<2x8x1x32xf32> -> vector<2x8x1x32xf32>
    %90 = vector.broadcast %89 : vector<2x8x1x32xf32> to vector<2x8x8x32xf32>
    %91 = arith.mulf %86, %90 : vector<2x8x8x32xf32>
    %92 = vector.shape_cast %59 : vector<16x32xf32> to vector<2x1x8x32xf32>
    %93 = vector.broadcast %92 : vector<2x1x8x32xf32> to vector<2x8x8x32xf32>
    %94 = arith.mulf %91, %93 : vector<2x8x8x32xf32>
    %cst_41 = arith.constant dense<0.000000e+00> : vector<2x8x32xf32>
    %95 = vector.multi_reduction <add>, %94, %cst_41 [2] : vector<2x8x8x32xf32> to vector<2x8x32xf32>
    %96 = vector.shape_cast %95 : vector<2x8x32xf32> to vector<16x32xf32>
    %97 = arith.addf %51, %96 : vector<16x32xf32>
    %98 = arith.truncf %97 : vector<16x32xf32> to vector<16x32xbf16>
    %c2 = arith.constant 2 : index
    %c0_42 = arith.constant 0 : index
    %c0_43 = arith.constant 0 : index
    %99 = vector.load %arg3[%c2, %c0_42, %c0_43] : memref<3x32x32xbf16, #tpu.memory_space<vmem>>, vector<1x32x32xbf16>
    %100 = vector.shape_cast %99 : vector<1x32x32xbf16> to vector<32x32xbf16>
    %cst_44 = arith.constant dense<0.000000e+00> : vector<16x32xf32>
    %101 = tpu.matmul %98, %100, %cst_44 {dimension_numbers = #tpu.dot_dimension_numbers<[1], [0], [0], [1], [0, 0, 1, 1], [], []>} : vector<16x32xbf16>, vector<32x32xbf16>, vector<16x32xf32> -> vector<16x32xf32>
    %c2_45 = arith.constant 2 : index
    %c0_46 = arith.constant 0 : index
    %c0_47 = arith.constant 0 : index
    %102 = vector.load %arg4[%c2_45, %c0_46, %c0_47] : memref<3x1x32xf32, #tpu.memory_space<vmem>>, vector<1x1x32xf32>
    %103 = vector.shape_cast %102 : vector<1x1x32xf32> to vector<1x32xf32>
    %104 = vector.broadcast %103 : vector<1x32xf32> to vector<16x32xf32>
    %105 = arith.addf %101, %104 : vector<16x32xf32>
    %106 = arith.truncf %105 : vector<16x32xf32> to vector<16x32xbf16>
    %c2_48 = arith.constant 2 : index
    %c0_49 = arith.constant 0 : index
    %c0_50 = arith.constant 0 : index
    %107 = vector.load %arg5[%c2_48, %c0_49, %c0_50] : memref<3x32x64xbf16, #tpu.memory_space<vmem>>, vector<1x32x64xbf16>
    %108 = vector.shape_cast %107 : vector<1x32x64xbf16> to vector<32x64xbf16>
    %cst_51 = arith.constant dense<0.000000e+00> : vector<16x64xf32>
    %109 = tpu.matmul %106, %108, %cst_51 {dimension_numbers = #tpu.dot_dimension_numbers<[1], [0], [0], [1], [0, 0, 1, 1], [], []>} : vector<16x32xbf16>, vector<32x64xbf16>, vector<16x64xf32> -> vector<16x64xf32>
    %110 = vector.extract_strided_slice %109 {offsets = [0, 0], sizes = [16, 32], strides = [1, 1]} : vector<16x64xf32> to vector<16x32xf32>
    %111 = vector.extract_strided_slice %109 {offsets = [0, 32], sizes = [16, 32], strides = [1, 1]} : vector<16x64xf32> to vector<16x32xf32>
    %112 = vector.extract_strided_slice %5 {offsets = [0, 64], sizes = [128, 32], strides = [1, 1]} : vector<128x96xf32> to vector<128x32xf32>
    %113 = vector.shape_cast %112 : vector<128x32xf32> to vector<2x8x8x32xf32>
    %114 = vector.shape_cast %110 : vector<16x32xf32> to vector<2x8x1x32xf32>
    %115 = vector.broadcast %114 : vector<2x8x1x32xf32> to vector<2x8x8x32xf32>
    %116 = arith.addf %113, %115 : vector<2x8x8x32xf32>
    %117 = vector.shape_cast %111 : vector<16x32xf32> to vector<2x1x8x32xf32>
    %118 = vector.broadcast %117 : vector<2x1x8x32xf32> to vector<2x8x8x32xf32>
    %119 = arith.addf %116, %118 : vector<2x8x8x32xf32>
    %c2_52 = arith.constant 2 : index
    %c0_53 = arith.constant 0 : index
    %c0_54 = arith.constant 0 : index
    %120 = vector.load %arg7[%c2_52, %c0_53, %c0_54] : memref<3x1x32xf32, #tpu.memory_space<vmem>>, vector<1x1x32xf32>
    %121 = vector.shape_cast %120 : vector<1x1x32xf32> to vector<1x32xf32>
    %122 = vector.shape_cast %121 : vector<1x32xf32> to vector<1x1x1x32xf32>
    %123 = vector.broadcast %122 : vector<1x1x1x32xf32> to vector<2x8x8x32xf32>
    %124 = arith.addf %119, %123 : vector<2x8x8x32xf32>
    %cst_55 = arith.constant 2.000000e-01 : f32
    %125 = vector.broadcast %cst_55 : f32 to vector<2x8x8x32xf32>
    %126 = arith.mulf %125, %124 : vector<2x8x8x32xf32>
    %127 = arith.maximumf %124, %126 : vector<2x8x8x32xf32>
    %cst_56 = arith.constant dense<0xFF800000> : vector<2x8x32xf32>
    %128 = vector.multi_reduction <maximumf>, %127, %cst_56 [2] : vector<2x8x8x32xf32> to vector<2x8x32xf32>
    %129 = vector.shape_cast %128 : vector<2x8x32xf32> to vector<2x8x1x32xf32>
    %130 = vector.broadcast %129 : vector<2x8x1x32xf32> to vector<2x8x8x32xf32>
    %131 = arith.subf %127, %130 : vector<2x8x8x32xf32>
    %132 = math.exp %131 : vector<2x8x8x32xf32>
    %cst_57 = arith.constant dense<0.000000e+00> : vector<2x8x32xf32>
    %133 = vector.multi_reduction <add>, %132, %cst_57 [2] : vector<2x8x8x32xf32> to vector<2x8x32xf32>
    %134 = vector.shape_cast %133 : vector<2x8x32xf32> to vector<2x8x1x32xf32>
    %135 = tpu.reciprocal %134 {approx = true} : vector<2x8x1x32xf32> -> vector<2x8x1x32xf32>
    %136 = vector.broadcast %135 : vector<2x8x1x32xf32> to vector<2x8x8x32xf32>
    %137 = arith.mulf %132, %136 : vector<2x8x8x32xf32>
    %138 = vector.shape_cast %105 : vector<16x32xf32> to vector<2x1x8x32xf32>
    %139 = vector.broadcast %138 : vector<2x1x8x32xf32> to vector<2x8x8x32xf32>
    %140 = arith.mulf %137, %139 : vector<2x8x8x32xf32>
    %cst_58 = arith.constant dense<0.000000e+00> : vector<2x8x32xf32>
    %141 = vector.multi_reduction <add>, %140, %cst_58 [2] : vector<2x8x8x32xf32> to vector<2x8x32xf32>
    %142 = vector.shape_cast %141 : vector<2x8x32xf32> to vector<16x32xf32>
    %143 = arith.addf %97, %142 : vector<16x32xf32>
    %144 = vector.shape_cast %143 : vector<16x32xf32> to vector<2x8x32xf32>
    %c0_59 = arith.constant 0 : index
    %c0_60 = arith.constant 0 : index
    %c0_61 = arith.constant 0 : index
    %145 = vector.load %arg8[%c0_59, %c0_60, %c0_61] : memref<2x8x32xf32, #tpu.memory_space<vmem>>, vector<2x8x32xf32>
    tpu.vector_store %arg8[%c0_59, %c0_60, %c0_61], %144 {strides = array<i32>} : memref<2x8x32xf32, #tpu.memory_space<vmem>>, vector<2x8x32xf32>,
    return
  }
  func.func @transform_0(%arg0: i32) -> (i32, i32, i32) {
    %c0_i32 = arith.constant 0 : i32
    %c0_i32_0 = arith.constant 0 : i32
    %c0_i32_1 = arith.constant 0 : i32
    return %arg0, %c0_i32, %c0_i32_0 : i32, i32, i32
  }
  func.func @transform_1(%arg0: i32) -> (i32, i32, i32) {
    %c0_i32 = arith.constant 0 : i32
    %c0_i32_0 = arith.constant 0 : i32
    %c0_i32_1 = arith.constant 0 : i32
    return %arg0, %c0_i32, %c0_i32_0 : i32, i32, i32
  }
  func.func @transform_2(%arg0: i32) -> (i32, i32, i32) {
    %c0_i32 = arith.constant 0 : i32
    %c0_i32_0 = arith.constant 0 : i32
    %c0_i32_1 = arith.constant 0 : i32
    %c0_i32_2 = arith.constant 0 : i32
    return %c0_i32, %c0_i32_0, %c0_i32_1 : i32, i32, i32
  }
  func.func @transform_3(%arg0: i32) -> (i32, i32, i32) {
    %c0_i32 = arith.constant 0 : i32
    %c0_i32_0 = arith.constant 0 : i32
    %c0_i32_1 = arith.constant 0 : i32
    %c0_i32_2 = arith.constant 0 : i32
    return %c0_i32, %c0_i32_0, %c0_i32_1 : i32, i32, i32
  }
  func.func @transform_4(%arg0: i32) -> (i32, i32, i32) {
    %c0_i32 = arith.constant 0 : i32
    %c0_i32_0 = arith.constant 0 : i32
    %c0_i32_1 = arith.constant 0 : i32
    %c0_i32_2 = arith.constant 0 : i32
    return %c0_i32, %c0_i32_0, %c0_i32_1 : i32, i32, i32
  }
  func.func @transform_5(%arg0: i32) -> (i32, i32) {
    %c0_i32 = arith.constant 0 : i32
    %c0_i32_0 = arith.constant 0 : i32
    %c0_i32_1 = arith.constant 0 : i32
    return %c0_i32, %c0_i32_0 : i32, i32
  }
  func.func @transform_6(%arg0: i32) -> (i32, i32, i32) {
    %c0_i32 = arith.constant 0 : i32
    %c0_i32_0 = arith.constant 0 : i32
    %c0_i32_1 = arith.constant 0 : i32
    %c0_i32_2 = arith.constant 0 : i32
    return %c0_i32, %c0_i32_0, %c0_i32_1 : i32, i32, i32
  }
  func.func @transform_7(%arg0: i32) -> (i32, i32, i32) {
    %c0_i32 = arith.constant 0 : i32
    %c0_i32_0 = arith.constant 0 : i32
    %c0_i32_1 = arith.constant 0 : i32
    return %arg0, %c0_i32, %c0_i32_0 : i32, i32, i32
  }
}

</mosaic_0001>

<bundles_post_ra>
// kernel: tpu_custom_call.1
= control target key start
LH: loop header
LB: loop body
LE: loop exit
PB: predicated region body
PF: predicated region fallthrough
CT: control target
= control target key end

     0   :  { %12 = vsyncpa [#allocation3], 0  ;;  %s4684_s0 = inlined_call_operand.vmem [shape: f32[2,8,32], index: 0, kind: input, shape index: {}]   ;;  %s4685_s1 = inlined_call_operand.vmem [shape: bf16[2,64,16], index: 1, kind: input, shape index: {}]   ;;  %s4686_s2 = inlined_call_operand.vmem [shape: bf16[3,32,32], index: 2, kind: input, shape index: {}]   ;;  %s4687_s3 = inlined_call_operand.vmem [shape: f32[3,1,32], index: 3, kind: input, shape index: {}]   ;;  %s4688_s4 = inlined_call_operand.hbm [shape: bf16[3,32,64], index: 4, kind: input, shape index: {}]   ;;  %s4689_s5 = inlined_call_operand.vmem [shape: bf16[16,96], index: 5, kind: input, shape index: {}]   ;;  %s4690_s6 = inlined_call_operand.vmem [shape: f32[3,1,32], index: 6, kind: input, shape index: {}]   ;;  %s4691_s7 = inlined_call_operand.hbm [shape: f32[2,8,32], index: 7, kind: output, shape index: {}]  }
   0x1   :  { %13 = vsyncpa [#allocation4], 0  ;;  %s3377_s24 = smov [#allocation2]   ;;  %s3329_s28 = scalar_lea.hbm %s4688_s4, 768 }
   0x2   :  { %s27_s25 = sshll.u32 %s3377_s24, 4  ;;  %p3330_p0 = scmp.ne.s32.totalorder %s4688_s4, %s3329_s28  ;;  %s28_s25 = int_to_ptr.vmem [resolvable:$true] %s27_s25 }
   0x3   :  { %p3333_p1 = scmp.lt.u32.totalorder %s3329_s28, %s4688_s4 }
   0x5   :  { %p3335_p2 = pnand %p3333_p1, %p3330_p0 }
   0x7   :  { %3338 = shalt.err (!%p3335_p2)
}
   0x8   :  { %s3339_s10 = scalar_lea.vmem %s28_s25, 768  ;;  %p3344_p4 = scmp.lt.s32.totalorder %s28_s25, %s28_s25 }
   0x9   :  { %p3340_p3 = scmp.ne.s32.totalorder %s28_s25, %s3339_s10  ;;  %p3345_p5 = scmp.lt.s32.totalorder %s3339_s10, %s3339_s10 }
   0xb   :  { %p3346_p6 = por %p3345_p5, %p3344_p4 }
   0xd   :  { %p3347_p7 = pnand %p3346_p6, %p3340_p3 }
   0xf   :  { %3350 = shalt.err (!%p3347_p7)
}
  0x10   :  { %s3378_s11 = smov 64   ;;  %s3379_s12 = smov 4  }
  0x11   :  { %33 = dma.hbm_to_vmem [thread:$0]  %s4688_s4, 768, %s28_s25, [#allocation3], %s3378_s11, %s3378_s11, %s3379_s12  }
  0x12   :  { %3373 = dma.done.wait [#allocation3], 768  }
  0x13   :  { %3374 = vsyncadd [#allocation3], 4294966528  ;;  %v4692_v0 = vmov 0.0   ;;  %vm3381_vm0 = vmmov 0   ;;  %v3114_v1 = vld [vmem:[%s4686_s2] sm:$0xff]   ;;  %v3115_v2 = vld [vmem:[%s4686_s2 + $0x8] sm:$0xff]   ;;  %v366_v43 = vlaneseq }
  0x14   :  { %3055 = vmatprep.subr.bf16.mxu1 %v4692_v0  ;;  %3059 = vmatprep.mubr.msk.bf16.mxu1 %vm3381_vm0, %v4692_v0  ;;  %v42_v3 = vld [vmem:[%s4684_s0] sm:$0xff]  ;;  %v43_v4 = vld [vmem:[%s4684_s0 + $0x8] sm:$0xff]  ;;  %vm108_vm1 = vcmask 130048   ;;  %vm254_vm2 = vcmask 261120   ;;  %v3119_v9 = vld [vmem:[%s4685_s1 + $0x10] sm:$0xff]   ;;  %vm1081_vm3 = vcmask 1041409  }
  0x15   :  { %3056 = vmatpush3.bf16.msra.mxu1 %v3114_v1  ;;  %v3116_v5 = vld [vmem:[%s4689_s5] sm:$0xff]   ;;  %v230_v7 = vpack.c.bf16 %v43_v4, %v42_v3  ;;  %v3118_v8 = vld [vmem:[%s4685_s1 + $0x8] sm:$0xff]   ;;  %v3121_v11 = vld [vmem:[%s4685_s1 + $0x18] sm:$0xff]   ;;  %v3382_v41 = vmov 1966171168   ;;  %v367_v45 = vshrl.u32 %v366_v43, 7 }
  0x16   :  { %3057 = vmatprep.subr.bf16.mxu1 %v4692_v0  ;;  %v3117_v6 = vld [vmem:[%s4685_s1] sm:$0xff]   ;;  %3037 = vmatprep.subr.bf16.mxu0 %v3116_v5  ;;  %v3122_v12 = vld [vmem:[#allocation2 + $0x8] sm:$0xff]   ;;  %v3125_v15 = vld [vmem:[%s4685_s1 + $0x30] sm:$0xff]   ;;  %v364_v42 = vunpack.c.l.s4 %v3382_v41  ;;  %vm1083_vm4 = vcmask 1042434   ;;  %vm1085_vm5 = vcmask 1043459   ;;  %vm1087_vm6 = vcmask 1044484  }
  0x17   :  { %3038 = vmatpush3.bf16.msra.mxu0 %v3116_v5  ;;  %3039 = vmatprep.mubr.msk.bf16.mxu0 %vm108_vm1, %v3117_v6  ;;  %v3120_v10 = vld [vmem:[#allocation2] sm:$0xff]   ;;  %v3124_v14 = vld [vmem:[%s4685_s1 + $0x28] sm:$0xff]   ;;  %v3126_v16 = vld [vmem:[%s4685_s1 + $0x38] sm:$0xff]   ;;  %v3550_v51 = vsub.s32 0, %v367_v45  ;;  %vm1089_vm7 = vcmask 1045509   ;;  %vm1091_vm8 = vcmask 1046534  }
  0x18   :  { %3087 = vmatprep.subr.bf16.mxu0 %v4692_v0  ;;  %v3123_v13 = vld [vmem:[%s4685_s1 + $0x20] sm:$0xff]   ;;  %v365_v44 = vunpack.c.0.s8 %v364_v42  ;;  %s3383_s1 = smov 96   ;;  %vm1093_vm9 = vcmask 1047559   ;;  %s3384_s30 = smov 32   ;;  %vm1540_vm10 = vcmask 523520   ;;  %vm2459_vm11 = vcmask 785920  }
  0x19   :  { %3058 = vmatpush3.bf16.msra.mxu1 %v3115_v2  ;;  %v2974_v17 = vld [vmem:[%s4687_s3] ss:$0 sm:$0xff] }
  0x1a   :  { %3063 = vmatprep.subr.bf16.mxu1 %v4692_v0  ;;  %3040 = vmatmul.mubr.msk.bf16.vlgmr.msra.gmra.mrb[0].mxu0 %vm108_vm1, %v3118_v8  ;;  %v3546_v46 = vsub.s32 %v365_v44, %v367_v45 }
  0x1b   :  { %3043 = vmatprep.mubr.msk.bf16.mxu0 %vm108_vm1, %v3119_v9 }
  0x1c   :  { %3060 = vmatmul.mubr.msk.bf16.vlgmr.msra.gmra.mrb[0].mxu1 %vm254_vm2, %v230_v7 }
  0x1d   :  { %3064 = vmatpush3.bf16.msra.mxu1 %v3120_v10  ;;  %3067 = vmatprep.mubr.msk.bf16.mxu1 %vm3381_vm0, %v4692_v0 }
  0x1e   :  { %3065 = vmatprep.subr.bf16.mxu1 %v4692_v0 }
  0x21   :  { %3066 = vmatpush3.bf16.msra.mxu1 %v3122_v12 }
  0x22   :  { %3044 = vmatmul.mubr.msk.bf16.gmra.mrb[4].mxu0 %vm108_vm1, %v3121_v11  ;;  %3071 = vmatprep.subr.bf16.mxu1 %v4692_v0 }
  0x23   :  { %3047 = vmatprep.mubr.msk.bf16.mxu0 %vm108_vm1, %v3123_v13 }
  0x2a   :  { %3048 = vmatmul.mubr.msk.bf16.gmra.mrb[8].mxu0 %vm108_vm1, %v3124_v14 }
  0x2b   :  { %3051 = vmatprep.mubr.msk.bf16.mxu0 %vm108_vm1, %v3125_v15 }
  0x32   :  { %3052 = vmatmul.mubr.msk.bf16.gmra.mrb[12].mxu0 %vm108_vm1, %v3126_v16 }
  0x33   :  { %3091 = vmatprep.mubr.msk.bf16.mxu0 %vm3381_vm0, %v4692_v0 }
  0xed   :  { %v3505_v19 = vpop.f32.mrb[0].mxu0 }
  0xee   :  { %v3507_v21 = vpop.f32.mrb[1].mxu0 }
  0xef   :  { %v292_v18 = vpop.f32.mrb[0].mxu1  ;;  %v3509_v23 = vpop.f32.mrb[2].mxu0 }
  0xf0   :  { %v3061_v20 = vpop.f32.mrb[1].mxu1  ;;  %v3511_v24 = vadd.f32 %v2974_v17, %v292_v18  ;;  %v3515_v27 = vpop.f32.mrb[3].mxu0 }
  0xf1   :  { %v295_v22 = vpop.f32.mrb[2].mxu1 }
  0xf2   :  { %v3513_v25 = vadd.f32 %v2974_v17, %v295_v22  ;;  %v3062_v26 = vpop.f32.mrb[3].mxu1 }
  0xf4   :  { %v299_v28 = vpack.c.bf16 %v3513_v25, %v3511_v24 }
  0xf5   :  { %v3522_v29 = vpop.f32.mrb[4].mxu0 }
  0xf6   :  { %3068 = vmatmul.mubr.msk.bf16.vlgmr.msra.gmra.mrb[4].mxu1 %vm254_vm2, %v299_v28  ;;  %4710 = vst [vmem:[#allocation8_spill] sm:$0xff] %v3522_v29  ;;  %v3524_v30 = vpop.f32.mrb[5].mxu0 }
  0xf7   :  { %3075 = vmatprep.mubr.msk.bf16.mxu1 %vm3381_vm0, %v4692_v0  ;;  %v3526_v31 = vpop.f32.mrb[6].mxu0 }
  0xf8   :  { %4711 = vst [vmem:[#allocation9_spill] sm:$0xff] %v3526_v31  ;;  %v3528_v32 = vpop.f32.mrb[7].mxu0 }
  0xf9   :  { %4712 = vst [vmem:[#allocation10_spill] sm:$0xff] %v3528_v32 }
  0xfd   :  { %v3530_v33 = vpop.f32.mrb[8].mxu0 }
  0xfe   :  { %v3532_v34 = vpop.f32.mrb[9].mxu0 }
  0xff   :  { %v3534_v35 = vpop.f32.mrb[10].mxu0 }
 0x100   :  { %4713 = vst [vmem:[#allocation11_spill] sm:$0xff] %v3534_v35  ;;  %v3536_v36 = vpop.f32.mrb[11].mxu0 }
 0x105   :  { %v3538_v37 = vpop.f32.mrb[12].mxu0 }
 0x106   :  { %4714 = vst [vmem:[#allocation12_spill] sm:$0xff] %v3538_v37  ;;  %v3540_v38 = vpop.f32.mrb[13].mxu0 }
 0x107   :  { %4715 = vst [vmem:[#allocation13_spill] sm:$0xff] %v3540_v38  ;;  %v3542_v39 = vpop.f32.mrb[14].mxu0 }
 0x108   :  { %4716 = vst [vmem:[#allocation14_spill] sm:$0xff] %v3542_v39  ;;  %v3544_v40 = vpop.f32.mrb[15].mxu0 }
 0x109   :  { %4717 = vst [vmem:[#allocation15_spill] sm:$0xff] %v3544_v40 }
 0x1c9   :  { %v353_v47 = vpop.f32.mrb[4].mxu1 }
 0x1ca   :  { %v362_v48 = vcombine.high %v353_v47, %v353_v47  ;;  %v369_v49 = vrot.slane %v353_v47, %v3546_v46  ;;  %556 = vrot.lane.b32.xlu0 %v353_v47, %s3383_s1  ;;  %v3069_v50 = vpop.f32.mrb[5].mxu1 }
 0x1cb   :  { %v356_v52 = vpop.f32.mrb[6].mxu1 }
 0x1cc   :  { %v376_v53 = vrot.slane %v362_v48, %v3546_v46  ;;  %v377_v54 = vcombine.high %v369_v49, %v369_v49  ;;  %v385_v55 = vrot.slane %v369_v49, %v3546_v46  ;;  %v411_v56 = vcombine.high %v356_v52, %v356_v52  ;;  %v3070_v57 = vpop.f32.mrb[7].mxu1 }
 0x1cd   :  { %v418_v58 = vrot.slane %v356_v52, %v3546_v46 }
 0x1ce   :  { %v378_v59 = vcombine.high %v376_v53, %v376_v53  ;;  %v392_v60 = vrot.slane %v376_v53, %v3546_v46  ;;  %v399_v61 = vrot.slane %v377_v54, %v3546_v46  ;;  %v407_v62 = vcombine.high %v385_v55, %v385_v55  ;;  %558 = vrot.lane.b32.xlu0 %v356_v52, %s3383_s1 }
 0x1cf   :  { %v463_v63 = vrot.slane %v385_v55, %v3550_v51  ;;  %v425_v1 = vrot.slane %v411_v56, %v3546_v46  ;;  %v426_v2 = vcombine.high %v418_v58, %v418_v58  ;;  %v434_v3 = vrot.slane %v418_v58, %v3546_v46 }
 0x1d0   :  { %v409_v4 = vcombine.high %v399_v61, %v399_v61  ;;  %v467_v5 = vrot.slane %v399_v61, %v3550_v51  ;;  %v471_v6 = vrot.slane %v407_v62, %v3550_v51  ;;  %v408_v7 = vcombine.high %v392_v60, %v392_v60 }
 0x1d1   :  { %v540_v8 = vadd.f32 %v463_v63, %v3507_v21  ;;  %v479_v9 = vrot.slane %v392_v60, %v3550_v51  ;;  %v427_v10 = vcombine.high %v425_v1, %v425_v1  ;;  %v441_v11 = vrot.slane %v425_v1, %v3546_v46 }
 0x1d2   :  { %v475_v12 = vrot.slane %v409_v4, %v3550_v51  ;;  %v541_v13 = vadd.f32 %v467_v5, %v3515_v27  ;;  %v542_v14 = vadd.f32 %v3505_v19, %v471_v6  ;;  %v487_v15 = vrot.slane %v408_v7, %v3550_v51  ;;  %v3127_v4 = vld [vmem:[%s4686_s2 + $0x10] sm:$0xff]   ;;  %v3128_v5 = vld [vmem:[%s4686_s2 + $0x18] sm:$0xff]   ;;  %v3619_v6 = vld [vmem:[%s4690_s6] ss:$0 sm:$0xff] }
 0x1d3   :  { %v544_v16 = vadd.f32 %v479_v9, %v3524_v30  ;;  %v448_v17 = vrot.slane %v426_v2, %v3546_v46  ;;  %v406_v18 = vrot.slane %v378_v59, %v3546_v46  ;;  %v456_v20 = vcombine.high %v434_v3, %v434_v3  ;;  %3072 = vmatpush3.bf16.msra.mxu1 %v3127_v4 }
 0x1d4   :  { %v543_v22 = vadd.f32 %v3509_v23, %v475_v12  ;;  %v546_v26 = vadd.f32 %v3522_v29, %v487_v15  ;;  %v495_v28 = vrot.slane %v434_v3, %v3550_v51  ;;  %v457_v41 = vcombine.high %v441_v11, %v441_v11  ;;  %3073 = vmatprep.subr.bf16.mxu1 %v4692_v0 }
 0x1d5   :  { %v410_v42 = vcombine.high %v406_v18, %v406_v18  ;;  %v483_v43 = vrot.slane %v406_v18, %v3550_v51  ;;  %v503_v44 = vrot.slane %v456_v20, %v3550_v51  ;;  %v458_v45 = vcombine.high %v448_v17, %v448_v17 }
 0x1d6   :  { %v548_v47 = vadd.f32 %v495_v28, %v3532_v34  ;;  %v499_v48 = vrot.slane %v448_v17, %v3550_v51  ;;  %v519_v49 = vrot.slane %v457_v41, %v3550_v51  ;;  %v511_v50 = vrot.slane %v441_v11, %v3550_v51 }
 0x1d7   :  { %v491_v52 = vrot.slane %v410_v42, %v3550_v51  ;;  %v545_v53 = vadd.f32 %v483_v43, %v3528_v32  ;;  %v3585_v54 = vadd.f32 %v3530_v33, %v503_v44  ;;  %v507_v55 = vrot.slane %v458_v45, %v3550_v51  ;;  %3074 = vmatpush3.bf16.msra.mxu1 %v3128_v5 }
 0x1d8   :  { %v549_v56 = vadd.f32 %v499_v48, %v3536_v36  ;;  %v3590_v57 = vadd.f32 %v3538_v37, %v519_v49  ;;  %v3593_v58 = vadd.f32 %v511_v50, %v3540_v38  ;;  %v455_v59 = vrot.slane %v427_v10, %v3546_v46  ;;  %3079 = vmatprep.subr.bf16.mxu1 %v4692_v0 }
 0x1d9   :  { %v547_v60 = vadd.f32 %v3526_v31, %v491_v52  ;;  %v3598_v61 = vadd.f32 %v3534_v35, %v507_v55 }
 0x1da   :  { %v459_v62 = vcombine.high %v455_v59, %v455_v59  ;;  %v515_v63 = vrot.slane %v455_v59, %v3550_v51 }
 0x1dc   :  { %v523_v1 = vrot.slane %v459_v62, %v3550_v51  ;;  %v3603_v2 = vadd.f32 %v515_v63, %v3544_v40 }
 0x1de   :  { %v3606_v3 = vadd.f32 %v3542_v39, %v523_v1 }
 0x23c   :  { %v557_v7 = vpop.permute.xlu0 %556 }
 0x23d   :  { %v562_v9 = vadd.f32 %v557_v7, %v540_v8  ;;  %v563_v10 = vadd.f32 %v557_v7, %v541_v13  ;;  %v564_v11 = vadd.f32 %v557_v7, %v542_v14  ;;  %v565_v12 = vadd.f32 %v557_v7, %v543_v22 }
 0x23e   :  { %v566_v15 = vadd.f32 %v557_v7, %v544_v16  ;;  %v567_v17 = vadd.f32 %v557_v7, %v545_v53  ;;  %v568_v18 = vadd.f32 %v557_v7, %v546_v26  ;;  %v569_v20 = vadd.f32 %v557_v7, %v547_v60 }
 0x23f   :  { %v585_v28 = vadd.f32 %v3619_v6, %v562_v9  ;;  %v586_v41 = vadd.f32 %v3619_v6, %v563_v10  ;;  %v587_v42 = vadd.f32 %v3619_v6, %v564_v11  ;;  %v588_v43 = vadd.f32 %v3619_v6, %v565_v12 }
 0x240   :  { %v589_v44 = vadd.f32 %v3619_v6, %v566_v15  ;;  %v590_v45 = vadd.f32 %v3619_v6, %v567_v17  ;;  %v591_v8 = vadd.f32 %v3619_v6, %v568_v18  ;;  %v592_v13 = vadd.f32 %v3619_v6, %v569_v20  ;;  %v3629_v14 = vpop.permute.xlu0 %558 }
 0x241   :  { %v601_v16 = vmul.f32 0.2, %v585_v28  ;;  %v602_v22 = vmul.f32 0.2, %v586_v41  ;;  %v603_v26 = vmul.f32 0.2, %v587_v42  ;;  %v3632_v48 = vadd.f32 %v3629_v14, %v548_v47 }
 0x242   :  { %v604_v49 = vmul.f32 0.2, %v588_v43  ;;  %v605_v50 = vmul.f32 0.2, %v589_v44  ;;  %v606_v52 = vmul.f32 0.2, %v590_v45  ;;  %v3635_v53 = vadd.f32 %v3629_v14, %v549_v56 }
 0x243   :  { %v607_v55 = vmul.f32 0.2, %v591_v8  ;;  %v608_v59 = vmul.f32 0.2, %v592_v13  ;;  %v3637_v60 = vmax.f32 %v585_v28, %v601_v16  ;;  %v3639_v62 = vmax.f32 %v586_v41, %v602_v22 }
 0x244   :  { %v3641_v63 = vmax.f32 %v587_v42, %v603_v26  ;;  %v3643_v1 = vmax.f32 %v588_v43, %v604_v49  ;;  %v3645_v4 = vmax.f32 %v589_v44, %v605_v50  ;;  %v3647_v47 = vmax.f32 %v590_v45, %v606_v52 }
 0x245   :  { %v3649_v5 = vmax.f32 %v591_v8, %v607_v55  ;;  %v3651_v7 = vmax.f32 %v592_v13, %v608_v59  ;;  %v633_v56 = vsel %vm254_vm2, %v3637_v60, -inf  ;;  %v640_v9 = vsel %vm254_vm2, %v3639_v62, -inf }
 0x246   :  { %v634_v10 = vrot.slane %v633_v56, 4  ;;  %v641_v11 = vrot.slane %v640_v9, 4  ;;  %v647_v12 = vsel %vm254_vm2, %v3641_v63, -inf  ;;  %v654_v15 = vsel %vm254_vm2, %v3643_v1, -inf }
 0x247   :  { %v648_v17 = vrot.slane %v647_v12, 4  ;;  %v655_v18 = vrot.slane %v654_v15, 4  ;;  %v661_v20 = vsel %vm254_vm2, %v3645_v4, -inf  ;;  %v668_v28 = vsel %vm254_vm2, %v3647_v47, -inf }
 0x248   :  { %v635_v41 = vmax.f32 %v633_v56, %v634_v10  ;;  %v642_v42 = vmax.f32 %v640_v9, %v641_v11  ;;  %v662_v43 = vrot.slane %v661_v20, 4  ;;  %v669_v44 = vrot.slane %v668_v28, 4 }
 0x249   :  { %v649_v45 = vmax.f32 %v647_v12, %v648_v17  ;;  %v656_v8 = vmax.f32 %v654_v15, %v655_v18  ;;  %v675_v13 = vsel %vm254_vm2, %v3649_v5, -inf  ;;  %v682_v16 = vsel %vm254_vm2, %v3651_v7, -inf }
 0x24a   :  { %v636_v22 = vrot.slane %v635_v41, 2  ;;  %v643_v26 = vrot.slane %v642_v42, 2  ;;  %v663_v49 = vmax.f32 %v661_v20, %v662_v43  ;;  %v670_v50 = vmax.f32 %v668_v28, %v669_v44 }
 0x24b   :  { %v650_v52 = vrot.slane %v649_v45, 2  ;;  %v657_v55 = vrot.slane %v656_v8, 2  ;;  %v676_v59 = vrot.slane %v675_v13, 4  ;;  %v683_v0 = vrot.slane %v682_v16, 4 }
 0x24c   :  { %v637_v56 = vmax.f32 %v635_v41, %v636_v22  ;;  %v644_v9 = vmax.f32 %v642_v42, %v643_v26  ;;  %v664_v10 = vrot.slane %v663_v49, 2  ;;  %v671_v11 = vrot.slane %v670_v50, 2 }
 0x24d   :  { %v651_v12 = vmax.f32 %v649_v45, %v650_v52  ;;  %v658_v15 = vmax.f32 %v656_v8, %v657_v55  ;;  %v677_v17 = vmax.f32 %v675_v13, %v676_v59  ;;  %v684_v18 = vmax.f32 %v682_v16, %v683_v0 }
 0x24e   :  { %v638_v31 = vrot.slane %v637_v56, 1  ;;  %v645_v40 = vrot.slane %v644_v9, 1  ;;  %v665_v39 = vmax.f32 %v663_v49, %v664_v10  ;;  %v672_v35 = vmax.f32 %v670_v50, %v671_v11 }
 0x24f   :  { %v652_v37 = vrot.slane %v651_v12, 1  ;;  %v659_v29 = vrot.slane %v658_v15, 1  ;;  %v678_v20 = vrot.slane %v677_v17, 2  ;;  %v685_v28 = vrot.slane %v684_v18, 2 }
 0x250   :  { %v639_v43 = vmax.f32 %v637_v56, %v638_v31  ;;  %v646_v44 = vmax.f32 %v644_v9, %v645_v40  ;;  %v666_v32 = vrot.slane %v665_v39, 1  ;;  %v673_v38 = vrot.slane %v672_v35, 1 }
 0x251   :  { %v653_v41 = vmax.f32 %v651_v12, %v652_v37  ;;  %v660_v42 = vmax.f32 %v658_v15, %v659_v29  ;;  %v679_v22 = vmax.f32 %v677_v17, %v678_v20  ;;  %v686_v26 = vmax.f32 %v684_v18, %v685_v28 }
 0x252   :  { %v667_v45 = vmax.f32 %v665_v39, %v666_v32  ;;  %v674_v8 = vmax.f32 %v672_v35, %v673_v38  ;;  %v745_v0 = vsub.f32 %v3637_v60, %v639_v43  ;;  %v746_v13 = vsub.f32 %v3639_v62, %v646_v44 }
 0x253   :  { %v680_v16 = vrot.slane %v679_v22, 1  ;;  %v687_v49 = vrot.slane %v686_v26, 1  ;;  %v747_v50 = vsub.f32 %v3641_v63, %v653_v41  ;;  %v748_v52 = vsub.f32 %v3643_v1, %v660_v42 }
 0x254   :  { %v749_v31 = vsub.f32 %v3645_v4, %v667_v45  ;;  %v750_v40 = vsub.f32 %v3647_v47, %v674_v8  ;;  %v761_v37 = vmul.f32 1.442695, %v745_v0  ;;  %v763_v29 = vmul.f32 1.442695, %v746_v13 }
 0x255   :  { %v681_v55 = vmax.f32 %v679_v22, %v680_v16  ;;  %v688_v59 = vmax.f32 %v686_v26, %v687_v49  ;;  %v765_v32 = vmul.f32 1.442695, %v747_v50  ;;  %v767_v35 = vmul.f32 1.442695, %v748_v52 }
 0x256   :  { %3135 = vpow2.f32 %v761_v37  ;;  %v769_v38 = vmul.f32 1.442695, %v749_v31  ;;  %v771_v39 = vmul.f32 1.442695, %v750_v40  ;;  %v572_v60 = vadd.f32 %v3629_v14, %v3585_v54 }
 0x257   :  { %v751_v62 = vsub.f32 %v3649_v5, %v681_v55  ;;  %v752_v63 = vsub.f32 %v3651_v7, %v688_v59  ;;  %3137 = vpow2.f32 %v763_v29  ;;  %v573_v1 = vadd.f32 %v3629_v14, %v3598_v61 }
 0x258   :  { %3139 = vpow2.f32 %v765_v32  ;;  %v574_v4 = vadd.f32 %v3629_v14, %v3593_v58  ;;  %v575_v47 = vadd.f32 %v3629_v14, %v3603_v2  ;;  %v576_v56 = vadd.f32 %v3629_v14, %v3590_v57 }
 0x259   :  { %3141 = vpow2.f32 %v767_v35  ;;  %v773_v54 = vmul.f32 1.442695, %v751_v62  ;;  %v775_v9 = vmul.f32 1.442695, %v752_v63  ;;  %v577_v5 = vadd.f32 %v3629_v14, %v3606_v3 }
 0x25a   :  { %3143 = vpow2.f32 %v769_v38  ;;  %v593_v61 = vadd.f32 %v3619_v6, %v3632_v48  ;;  %v594_v7 = vadd.f32 %v3619_v6, %v3635_v53  ;;  %v595_v58 = vadd.f32 %v3619_v6, %v572_v60 }
 0x25b   :  { %3145 = vpow2.f32 %v771_v39  ;;  %v596_v2 = vadd.f32 %v3619_v6, %v573_v1  ;;  %v597_v57 = vadd.f32 %v3619_v6, %v574_v4  ;;  %v598_v10 = vadd.f32 %v3619_v6, %v575_v47 }
 0x25c   :  { %3147 = vpow2.f32 %v773_v54  ;;  %v599_v11 = vadd.f32 %v3619_v6, %v576_v56  ;;  %v600_v3 = vadd.f32 %v3619_v6, %v577_v5  ;;  %v609_v14 = vmul.f32 0.2, %v593_v61 }
 0x25d   :  { %3149 = vpow2.f32 %v775_v9  ;;  %v610_v48 = vmul.f32 0.2, %v594_v7  ;;  %v611_v12 = vmul.f32 0.2, %v595_v58  ;;  %v612_v15 = vmul.f32 0.2, %v596_v2 }
 0x25e   :  { %v613_v53 = vmul.f32 0.2, %v597_v57  ;;  %v614_v17 = vmul.f32 0.2, %v598_v10  ;;  %v615_v18 = vmul.f32 0.2, %v599_v11  ;;  %v3699_v20 = vmax.f32 %v593_v61, %v609_v14 }
 0x25f   :  { %v616_v28 = vmul.f32 0.2, %v600_v3  ;;  %v3701_v43 = vmax.f32 %v594_v7, %v610_v48  ;;  %v3703_v44 = vmax.f32 %v595_v58, %v611_v12  ;;  %v3705_v41 = vmax.f32 %v596_v2, %v612_v15 }
 0x260   :  { %v3707_v42 = vpop.eup %3135  ;;  %v3709_v6 = vmax.f32 %v597_v57, %v613_v53  ;;  %v3711_v22 = vmax.f32 %v598_v10, %v614_v17  ;;  %v3713_v26 = vmax.f32 %v599_v11, %v615_v18  ;;  %v689_v45 = vsel %vm254_vm2, %v3699_v20, -inf }
 0x261   :  { %v3717_v8 = vpop.eup %3137  ;;  %v793_v0 = vsel %vm254_vm2, %v3707_v42, 0.0  ;;  %v3721_v13 = vmax.f32 %v600_v3, %v616_v28  ;;  %v690_v16 = vrot.slane %v689_v45, 4  ;;  %v696_v49 = vsel %vm254_vm2, %v3701_v43, -inf }
 0x262   :  { %v3725_v50 = vpop.eup %3139  ;;  %v794_v52 = vrot.slane %v793_v0, 4  ;;  %v800_v31 = vsel %vm254_vm2, %v3717_v8, 0.0  ;;  %v697_v40 = vrot.slane %v696_v49, 4  ;;  %v3731_v37 = vsel %vm254_vm2, %v3703_v44, -inf }
 0x263   :  { %v3733_v29 = vpop.eup %3141  ;;  %v801_v55 = vrot.slane %v800_v31, 4  ;;  %v807_v59 = vsel %vm254_vm2, %v3725_v50, 0.0  ;;  %v691_v32 = vmax.f32 %v689_v45, %v690_v16  ;;  %v704_v35 = vrot.slane %v3731_v37, 4 }
 0x264   :  { %v3738_v38 = vpop.eup %3143  ;;  %v795_v39 = vadd.f32 %v794_v52, %v793_v0  ;;  %v808_v60 = vrot.slane %v807_v59, 4  ;;  %v814_v62 = vsel %vm254_vm2, %v3733_v29, 0.0  ;;  %v698_v63 = vmax.f32 %v696_v49, %v697_v40 }
 0x265   :  { %v3742_v1 = vpop.eup %3145  ;;  %v802_v4 = vadd.f32 %v801_v55, %v800_v31  ;;  %v815_v47 = vrot.slane %v814_v62, 4  ;;  %v821_v56 = vsel %vm254_vm2, %v3738_v38, 0.0  ;;  %v692_v54 = vrot.slane %v691_v32, 2 }
 0x266   :  { %v3746_v9 = vpop.eup %3147  ;;  %v796_v5 = vrot.slane %v795_v39, 2  ;;  %v809_v61 = vadd.f32 %v808_v60, %v807_v59  ;;  %v822_v7 = vrot.slane %v821_v56, 4  ;;  %v828_v58 = vsel %vm254_vm2, %v3742_v1, 0.0 }
 0x267   :  { %v3750_v2 = vpop.eup %3149  ;;  %v803_v57 = vrot.slane %v802_v4, 2  ;;  %v816_v10 = vadd.f32 %v815_v47, %v814_v62  ;;  %v829_v11 = vrot.slane %v828_v58, 4  ;;  %v835_v3 = vsel %vm254_vm2, %v3746_v9, 0.0 }
 0x268   :  { %v797_v14 = vadd.f32 %v796_v5, %v795_v39  ;;  %v810_v48 = vrot.slane %v809_v61, 2  ;;  %v823_v12 = vadd.f32 %v822_v7, %v821_v56  ;;  %v836_v15 = vrot.slane %v835_v3, 4 }
 0x269   :  { %v804_v53 = vadd.f32 %v803_v57, %v802_v4  ;;  %v817_v17 = vrot.slane %v816_v10, 2  ;;  %v830_v18 = vadd.f32 %v829_v11, %v828_v58  ;;  %v842_v28 = vsel %vm254_vm2, %v3750_v2, 0.0 }
 0x26a   :  { %v798_v45 = vrot.slane %v797_v14, 1  ;;  %v811_v0 = vadd.f32 %v810_v48, %v809_v61  ;;  %v824_v16 = vrot.slane %v823_v12, 2  ;;  %v837_v49 = vadd.f32 %v836_v15, %v835_v3 }
 0x26b   :  { %v805_v52 = vrot.slane %v804_v53, 1  ;;  %v818_v31 = vadd.f32 %v817_v17, %v816_v10  ;;  %v831_v40 = vrot.slane %v830_v18, 2  ;;  %v843_v55 = vrot.slane %v842_v28, 4 }
 0x26c   :  { %v799_v59 = vadd.f32 %v798_v45, %v797_v14  ;;  %v812_v60 = vrot.slane %v811_v0, 1  ;;  %v825_v39 = vadd.f32 %v824_v16, %v823_v12  ;;  %v838_v62 = vrot.slane %v837_v49, 2 }
 0x26d   :  { %v806_v47 = vadd.f32 %v805_v52, %v804_v53  ;;  %v819_v56 = vrot.slane %v818_v31, 1  ;;  %v832_v4 = vadd.f32 %v831_v40, %v830_v18  ;;  %v844_v5 = vadd.f32 %v843_v55, %v842_v28 }
 0x26e   :  { %v813_v7 = vadd.f32 %v812_v60, %v811_v0  ;;  %v826_v58 = vrot.slane %v825_v39, 1  ;;  %v3756_v57 = vadd.f32 %v838_v62, %v837_v49  ;;  %3151 = vrcp.f32 %v799_v59 }
 0x26f   :  { %v820_v61 = vadd.f32 %v819_v56, %v818_v31  ;;  %v833_v11 = vrot.slane %v832_v4, 1  ;;  %v845_v3 = vrot.slane %v844_v5, 2  ;;  %3153 = vrcp.f32 %v806_v47 }
 0x270   :  { %v827_v10 = vadd.f32 %v826_v58, %v825_v39  ;;  %v840_v48 = vrot.slane %v3756_v57, 1  ;;  %3155 = vrcp.f32 %v813_v7  ;;  %v693_v14 = vmax.f32 %v691_v32, %v692_v54 }
 0x271   :  { %v834_v12 = vadd.f32 %v833_v11, %v832_v4  ;;  %v3759_v15 = vadd.f32 %v845_v3, %v844_v5  ;;  %3157 = vrcp.f32 %v820_v61  ;;  %v699_v53 = vrot.slane %v698_v63, 2 }
 0x272   :  { %3159 = vrcp.f32 %v827_v10  ;;  %v694_v17 = vrot.slane %v693_v14, 1  ;;  %v705_v18 = vmax.f32 %v3731_v37, %v704_v35  ;;  %v710_v28 = vsel %vm254_vm2, %v3705_v41, -inf }
 0x273   :  { %3161 = vrcp.f32 %v834_v12  ;;  %v700_v45 = vmax.f32 %v698_v63, %v699_v53  ;;  %v711_v0 = vrot.slane %v710_v28, 4  ;;  %v717_v32 = vsel %vm254_vm2, %v3709_v6, -inf }
 0x274   :  { %v695_v54 = vmax.f32 %v693_v14, %v694_v17  ;;  %v706_v16 = vrot.slane %v705_v18, 2  ;;  %v718_v49 = vrot.slane %v717_v32, 4  ;;  %v724_v52 = vsel %vm254_vm2, %v3711_v22, -inf }
 0x275   :  { %v701_v31 = vrot.slane %v700_v45, 1  ;;  %v712_v40 = vmax.f32 %v710_v28, %v711_v0  ;;  %v725_v55 = vrot.slane %v724_v52, 4  ;;  %v731_v37 = vsel %vm254_vm2, %v3713_v26, -inf }
 0x276   :  { %v707_v35 = vmax.f32 %v705_v18, %v706_v16  ;;  %v719_v59 = vmax.f32 %v717_v32, %v718_v49  ;;  %v732_v60 = vrot.slane %v731_v37, 4  ;;  %v738_v63 = vsel %vm254_vm2, %v3721_v13, -inf }
 0x277   :  { %v702_v39 = vmax.f32 %v700_v45, %v701_v31  ;;  %v713_v62 = vrot.slane %v712_v40, 2  ;;  %v726_v47 = vmax.f32 %v724_v52, %v725_v55  ;;  %v739_v56 = vrot.slane %v738_v63, 4 }
 0x278   :  { %v3152_v4 = vpop.eup %3151  ;;  %v708_v5 = vrot.slane %v707_v35, 1  ;;  %v720_v7 = vrot.slane %v719_v59, 2  ;;  %v733_v58 = vmax.f32 %v731_v37, %v732_v60  ;;  %v753_v61 = vsub.f32 %v3699_v20, %v695_v54 }
 0x279   :  { %v3154_v11 = vpop.eup %3153  ;;  %v921_v3 = vmul.f32 %v3152_v4, %v3707_v42  ;;  %v714_v10 = vmax.f32 %v712_v40, %v713_v62  ;;  %v727_v14 = vrot.slane %v726_v47, 2  ;;  %v740_v12 = vmax.f32 %v738_v63, %v739_v56 }
 0x27a   :  { %v3156_v53 = vpop.eup %3155  ;;  %v922_v17 = vmul.f32 %v3154_v11, %v3717_v8  ;;  %v709_v18 = vmax.f32 %v707_v35, %v708_v5  ;;  %v721_v28 = vmax.f32 %v719_v59, %v720_v7  ;;  %v734_v45 = vrot.slane %v733_v58, 2 }
 0x27b   :  { %v3158_v0 = vpop.eup %3157  ;;  %v923_v32 = vmul.f32 %v3156_v53, %v3725_v50  ;;  %v937_v16 = vmul.f32 %v921_v3, %v3511_v24  ;;  %v715_v49 = vrot.slane %v714_v10, 1  ;;  %v728_v52 = vmax.f32 %v726_v47, %v727_v14 }
 0x27c   :  { %v3160_v20 = vpop.eup %3159  ;;  %v938_v54 = vmul.f32 %v922_v17, %v3511_v24  ;;  %v722_v42 = vrot.slane %v721_v28, 1  ;;  %v735_v31 = vmax.f32 %v733_v58, %v734_v45  ;;  %v741_v40 = vrot.slane %v740_v12, 2 }
 0x27d   :  { %v3162_v55 = vpop.eup %3161  ;;  %v716_v37 = vmax.f32 %v714_v10, %v715_v49  ;;  %v729_v60 = vrot.slane %v728_v52, 1  ;;  %v754_v8 = vsub.f32 %v3701_v43, %v702_v39  ;;  %v755_v35 = vsub.f32 %v3703_v44, %v709_v18 }
 0x27e   :  { %v723_v59 = vmax.f32 %v721_v28, %v722_v42  ;;  %v736_v63 = vrot.slane %v735_v31, 1  ;;  %v742_v50 = vmax.f32 %v740_v12, %v741_v40  ;;  %v777_v62 = vmul.f32 1.442695, %v753_v61 }
 0x27f   :  { %v730_v56 = vmax.f32 %v728_v52, %v729_v60  ;;  %v756_v47 = vsub.f32 %v3705_v41, %v716_v37  ;;  %v779_v4 = vmul.f32 1.442695, %v754_v8  ;;  %v781_v5 = vmul.f32 1.442695, %v755_v35 }
 0x280   :  { %v737_v7 = vmax.f32 %v735_v31, %v736_v63  ;;  %v743_v11 = vrot.slane %v742_v50, 1  ;;  %v757_v58 = vsub.f32 %v3709_v6, %v723_v59  ;;  %3163 = vpow2.f32 %v777_v62 }
 0x281   :  { %v758_v3 = vsub.f32 %v3711_v22, %v730_v56  ;;  %3165 = vpow2.f32 %v779_v4  ;;  %v783_v43 = vmul.f32 1.442695, %v756_v47  ;;  %v841_v44 = vadd.f32 %v840_v48, %v3756_v57 }
 0x282   :  { %v744_v39 = vmax.f32 %v742_v50, %v743_v11  ;;  %v759_v61 = vsub.f32 %v3713_v26, %v737_v7  ;;  %3167 = vpow2.f32 %v781_v5  ;;  %v785_v41 = vmul.f32 1.442695, %v757_v58 }
 0x283   :  { %3169 = vpow2.f32 %v783_v43  ;;  %v787_v10 = vmul.f32 1.442695, %v758_v3  ;;  %v847_v14 = vrot.slane %v3759_v15, 1  ;;  %v924_v6 = vmul.f32 %v3158_v0, %v3733_v29 }
 0x284   :  { %v760_v12 = vsub.f32 %v3721_v13, %v744_v39  ;;  %3171 = vpow2.f32 %v785_v41  ;;  %v789_v22 = vmul.f32 1.442695, %v759_v61  ;;  %v925_v53 = vmul.f32 %v3160_v20, %v3738_v38 }
 0x285   :  { %3173 = vpow2.f32 %v787_v10  ;;  %v848_v57 = vadd.f32 %v847_v14, %v3759_v15  ;;  %v926_v48 = vmul.f32 %v3162_v55, %v3742_v1  ;;  %v939_v26 = vmul.f32 %v923_v32, %v3511_v24 }
 0x286   :  { %3175 = vpow2.f32 %v789_v22  ;;  %v791_v17 = vmul.f32 1.442695, %v760_v12  ;;  %v940_v18 = vmul.f32 %v924_v6, %v3511_v24  ;;  %v941_v28 = vmul.f32 %v925_v53, %v3511_v24 }
 0x287   :  { %v942_v29 = vmul.f32 %v926_v48, %v3511_v24  ;;  %v953_v13 = vsel %vm254_vm2, %v937_v16, 0.0  ;;  %v960_v45 = vsel %vm254_vm2, %v938_v54, 0.0  ;;  %v967_v15 = vsel %vm254_vm2, %v939_v26, 0.0 }
 0x288   :  { %3177 = vpow2.f32 %v791_v17  ;;  %v954_v38 = vrot.slane %v953_v13, 4  ;;  %v961_v0 = vrot.slane %v960_v45, 4  ;;  %v968_v1 = vrot.slane %v967_v15, 4 }
 0x289   :  { %3179 = vrcp.f32 %v841_v44  ;;  %v974_v32 = vsel %vm254_vm2, %v940_v18, 0.0  ;;  %v3804_v49 = vsel %vm254_vm2, %v941_v28, 0.0  ;;  %v3816_v37 = vsel %vm254_vm2, %v942_v29, 0.0 }
 0x28a   :  { %v3806_v52 = vpop.eup %3163  ;;  %3181 = vrcp.f32 %v848_v57  ;;  %v955_v20 = vadd.f32 %v954_v38, %v953_v13  ;;  %v962_v42 = vadd.f32 %v961_v0, %v960_v45  ;;  %v975_v16 = vrot.slane %v974_v32, 4 }
 0x28b   :  { %v3808_v31 = vpop.eup %3165  ;;  %v849_v54 = vsel %vm254_vm2, %v3806_v52, 0.0  ;;  %v3812_v40 = vadd.f32 %v968_v1, %v967_v15  ;;  %v982_v55 = vrot.slane %v3804_v49, 4 }
 0x28c   :  { %v3818_v60 = vpop.eup %3167  ;;  %v850_v8 = vrot.slane %v849_v54, 4  ;;  %v856_v35 = vsel %vm254_vm2, %v3808_v31, 0.0  ;;  %v956_v59 = vrot.slane %v955_v20, 2  ;;  %v963_v63 = vrot.slane %v962_v42, 2 }
 0x28d   :  { %v3822_v50 = vpop.eup %3169  ;;  %v857_v62 = vrot.slane %v856_v35, 4  ;;  %v863_v56 = vsel %vm254_vm2, %v3818_v60, 0.0  ;;  %v970_v47 = vrot.slane %v3812_v40, 2  ;;  %v3827_v4 = vadd.f32 %v975_v16, %v974_v32 }
 0x28e   :  { %v3829_v5 = vpop.eup %3171  ;;  %v851_v7 = vadd.f32 %v850_v8, %v849_v54  ;;  %v864_v11 = vrot.slane %v863_v56, 4  ;;  %v870_v58 = vsel %vm254_vm2, %v3822_v50, 0.0  ;;  %v3833_v3 = vadd.f32 %v956_v59, %v955_v20 }
 0x28f   :  { %v3835_v43 = vpop.eup %3173  ;;  %v858_v44 = vadd.f32 %v857_v62, %v856_v35  ;;  %v871_v39 = vrot.slane %v870_v58, 4  ;;  %v877_v61 = vsel %vm254_vm2, %v3829_v5, 0.0  ;;  %v3839_v41 = vadd.f32 %v963_v63, %v962_v42 }
 0x290   :  { %v3841_v10 = vpop.eup %3175  ;;  %v852_v14 = vrot.slane %v851_v7, 2  ;;  %v865_v6 = vadd.f32 %v864_v11, %v863_v56  ;;  %v878_v12 = vrot.slane %v877_v61, 4  ;;  %v884_v22 = vsel %vm254_vm2, %v3835_v43, 0.0 }
 0x291   :  { %v859_v53 = vrot.slane %v858_v44, 2  ;;  %v872_v57 = vadd.f32 %v871_v39, %v870_v58  ;;  %v885_v48 = vrot.slane %v884_v22, 4  ;;  %v891_v26 = vsel %vm254_vm2, %v3841_v10, 0.0 }
 0x292   :  { %v3847_v17 = vpop.eup %3177  ;;  %v853_v18 = vadd.f32 %v852_v14, %v851_v7  ;;  %v866_v28 = vrot.slane %v865_v6, 2  ;;  %v879_v29 = vadd.f32 %v878_v12, %v877_v61  ;;  %v892_v13 = vrot.slane %v891_v26, 4 }
 0x293   :  { %v3180_v45 = vpop.eup %3179  ;;  %v860_v38 = vadd.f32 %v859_v53, %v858_v44  ;;  %v873_v0 = vrot.slane %v872_v57, 2  ;;  %v886_v15 = vadd.f32 %v885_v48, %v884_v22  ;;  %v898_v1 = vsel %vm254_vm2, %v3847_v17, 0.0 }
 0x294   :  { %v3182_v32 = vpop.eup %3181  ;;  %v854_v20 = vrot.slane %v853_v18, 1  ;;  %v867_v42 = vadd.f32 %v866_v28, %v865_v6  ;;  %v880_v16 = vrot.slane %v879_v29, 2  ;;  %v893_v54 = vadd.f32 %v892_v13, %v891_v26 }
 0x295   :  { %v861_v8 = vrot.slane %v860_v38, 1  ;;  %v874_v35 = vadd.f32 %v873_v0, %v872_v57  ;;  %v887_v59 = vrot.slane %v886_v15, 2  ;;  %v899_v63 = vrot.slane %v898_v1, 4 }
 0x296   :  { %v855_v62 = vadd.f32 %v854_v20, %v853_v18  ;;  %v868_v56 = vrot.slane %v867_v42, 1  ;;  %v881_v7 = vadd.f32 %v880_v16, %v879_v29  ;;  %v894_v11 = vrot.slane %v893_v54, 2 }
 0x297   :  { %v862_v58 = vadd.f32 %v861_v8, %v860_v38  ;;  %v875_v44 = vrot.slane %v874_v35, 1  ;;  %v888_v39 = vadd.f32 %v887_v59, %v886_v15  ;;  %v900_v61 = vadd.f32 %v899_v63, %v898_v1 }
 0x298   :  { %v869_v14 = vadd.f32 %v868_v56, %v867_v42  ;;  %v882_v12 = vrot.slane %v881_v7, 1  ;;  %v895_v22 = vadd.f32 %v894_v11, %v893_v54  ;;  %3183 = vrcp.f32 %v855_v62 }
 0x299   :  { %v876_v6 = vadd.f32 %v875_v44, %v874_v35  ;;  %v889_v53 = vrot.slane %v888_v39, 1  ;;  %v901_v48 = vrot.slane %v900_v61, 2  ;;  %3185 = vrcp.f32 %v862_v58 }
 0x29a   :  { %v883_v57 = vadd.f32 %v882_v12, %v881_v7  ;;  %v896_v26 = vrot.slane %v895_v22, 1  ;;  %3187 = vrcp.f32 %v869_v14  ;;  %v927_v18 = vmul.f32 %v3180_v45, %v3746_v9 }
 0x29b   :  { %v890_v28 = vadd.f32 %v889_v53, %v888_v39  ;;  %v902_v29 = vadd.f32 %v901_v48, %v900_v61  ;;  %3189 = vrcp.f32 %v876_v6  ;;  %v928_v13 = vmul.f32 %v3182_v32, %v3750_v2 }
 0x29c   :  { %3191 = vrcp.f32 %v883_v57  ;;  %v897_v38 = vadd.f32 %v896_v26, %v895_v22  ;;  %v943_v0 = vmul.f32 %v927_v18, %v3511_v24  ;;  %v958_v15 = vrot.slane %v3833_v3, 1 }
 0x29d   :  { %3193 = vrcp.f32 %v890_v28  ;;  %v903_v1 = vrot.slane %v902_v29, 1  ;;  %v944_v20 = vmul.f32 %v928_v13, %v3511_v24  ;;  %v965_v42 = vrot.slane %v3839_v41, 1 }
 0x29e   :  { %3195 = vrcp.f32 %v897_v38  ;;  %v959_v9 = vadd.f32 %v958_v15, %v3833_v3  ;;  %v971_v45 = vadd.f32 %v970_v47, %v3812_v40  ;;  %v977_v2 = vrot.slane %v3827_v4, 2 }
 0x29f   :  { %v904_v32 = vadd.f32 %v903_v1, %v902_v29  ;;  %v966_v16 = vadd.f32 %v965_v42, %v3839_v41  ;;  %v983_v54 = vadd.f32 %v982_v55, %v3804_v49  ;;  %v989_v24 = vrot.slane %v3816_v37, 4 }
 0x2a0   :  { %v972_v8 = vrot.slane %v971_v45, 1  ;;  %v978_v35 = vadd.f32 %v977_v2, %v3827_v4  ;;  %v995_v3 = vsel %vm254_vm2, %v943_v0, 0.0  ;;  %v1002_v59 = vsel %vm254_vm2, %v944_v20, 0.0 }
 0x2a1   :  { %3197 = vrcp.f32 %v904_v32  ;;  %v984_v40 = vrot.slane %v983_v54, 2  ;;  %v990_v47 = vadd.f32 %v989_v24, %v3816_v37  ;;  %v996_v63 = vrot.slane %v995_v3, 4 }
 0x2a2   :  { %v3184_v62 = vpop.eup %3183  ;;  %v973_v41 = vadd.f32 %v972_v8, %v971_v45  ;;  %v1003_v56 = vrot.slane %v1002_v59, 4  ;;  %v1082_v7 = vsel %vm1081_vm3, %v966_v16, %v959_v9  ;;  %v979_v6 = vrot.slane %v978_v35, 1 }
 0x2a3   :  { %v3186_v49 = vpop.eup %3185  ;;  %v929_v55 = vmul.f32 %v3184_v62, %v3806_v52  ;;  %v985_v11 = vadd.f32 %v984_v40, %v983_v54  ;;  %v991_v58 = vrot.slane %v990_v47, 2  ;;  %v997_v4 = vadd.f32 %v996_v63, %v995_v3 }
 0x2a4   :  { %v3188_v44 = vpop.eup %3187  ;;  %v930_v39 = vmul.f32 %v3186_v49, %v3808_v31  ;;  %v1004_v61 = vadd.f32 %v1003_v56, %v1002_v59  ;;  %v3875_v14 = vsel %vm1083_vm4, %v973_v41, %v1082_v7  ;;  %v980_v9 = vadd.f32 %v979_v6, %v978_v35 }
 0x2a5   :  { %v3190_v37 = vpop.eup %3189  ;;  %v931_v12 = vmul.f32 %v3188_v44, %v3818_v60  ;;  %v945_v22 = vmul.f32 %v929_v55, %v3513_v25  ;;  %v992_v53 = vadd.f32 %v991_v58, %v990_v47  ;;  %v986_v57 = vrot.slane %v985_v11, 1 }
 0x2a6   :  { %v3192_v48 = vpop.eup %3191  ;;  %v932_v52 = vmul.f32 %v3190_v37, %v3822_v50  ;;  %v998_v26 = vrot.slane %v997_v4, 2  ;;  %v1005_v18 = vrot.slane %v1004_v61, 2  ;;  %v946_v31 = vmul.f32 %v930_v39, %v3513_v25 }
 0x2a7   :  { %v3194_v28 = vpop.eup %3193  ;;  %v933_v29 = vmul.f32 %v3192_v48, %v3829_v5  ;;  %v947_v13 = vmul.f32 %v931_v12, %v3513_v25  ;;  %v993_v38 = vrot.slane %v992_v53, 1  ;;  %v1009_v45 = vsel %vm254_vm2, %v945_v22, 0.0 }
 0x2a8   :  { %v3196_v0 = vpop.eup %3195  ;;  %v934_v60 = vmul.f32 %v3194_v28, %v3835_v43  ;;  %v948_v15 = vmul.f32 %v932_v52, %v3513_v25  ;;  %v3885_v1 = vadd.f32 %v998_v26, %v997_v4  ;;  %v3887_v20 = vadd.f32 %v1005_v18, %v1004_v61 }
 0x2a9   :  { %v935_v50 = vmul.f32 %v3196_v0, %v3841_v10  ;;  %v949_v42 = vmul.f32 %v933_v29, %v3513_v25  ;;  %v3893_v2 = vadd.f32 %v986_v57, %v985_v11  ;;  %v3895_v32 = vadd.f32 %v993_v38, %v992_v53 }
 0x2aa   :  { %v950_v5 = vmul.f32 %v934_v60, %v3513_v25  ;;  %v1010_v43 = vrot.slane %v1009_v45, 4  ;;  %v1000_v54 = vrot.slane %v3885_v1, 1  ;;  %v1016_v24 = vsel %vm254_vm2, %v946_v31, 0.0 }
 0x2ab   :  { %v3198_v16 = vpop.eup %3197  ;;  %v1023_v8 = vsel %vm254_vm2, %v947_v13, 0.0  ;;  %v1030_v10 = vsel %vm254_vm2, %v948_v15, 0.0  ;;  %v951_v3 = vmul.f32 %v935_v50, %v3513_v25  ;;  %v1007_v59 = vrot.slane %v3887_v20, 1 }
 0x2ac   :  { %v936_v35 = vmul.f32 %v3198_v16, %v3847_v17  ;;  %v1011_v40 = vadd.f32 %v1010_v43, %v1009_v45  ;;  %v1017_v47 = vrot.slane %v1016_v24, 4  ;;  %v1024_v63 = vrot.slane %v1023_v8, 4 }
 0x2ad   :  { %v1031_v62 = vrot.slane %v1030_v10, 4  ;;  %v1037_v41 = vsel %vm254_vm2, %v949_v42, 0.0  ;;  %v1044_v55 = vsel %vm254_vm2, %v950_v5, 0.0  ;;  %v1051_v61 = vsel %vm254_vm2, %v951_v3, 0.0 }
 0x2ae   :  { %v952_v56 = vmul.f32 %v936_v35, %v3513_v25  ;;  %v1012_v7 = vrot.slane %v1011_v40, 2  ;;  %v1038_v49 = vrot.slane %v1037_v41, 4  ;;  %v1018_v11 = vadd.f32 %v1017_v47, %v1016_v24 }
 0x2af   :  { %v1025_v17 = vadd.f32 %v1024_v63, %v1023_v8  ;;  %v1032_v58 = vadd.f32 %v1031_v62, %v1030_v10  ;;  %v1045_v4 = vrot.slane %v1044_v55, 4  ;;  %v1052_v52 = vrot.slane %v1051_v61, 4 }
 0x2b0   :  { %v1013_v44 = vadd.f32 %v1012_v7, %v1011_v40  ;;  %v1039_v39 = vadd.f32 %v1038_v49, %v1037_v41  ;;  %v1058_v37 = vsel %vm254_vm2, %v952_v56, 0.0  ;;  %v1019_v12 = vrot.slane %v1018_v11, 2 }
 0x2b1   :  { %v1026_v22 = vrot.slane %v1025_v17, 2  ;;  %v1033_v25 = vrot.slane %v1032_v58, 2  ;;  %v1046_v6 = vadd.f32 %v1045_v4, %v1044_v55  ;;  %v1059_v57 = vrot.slane %v1058_v37, 4  ;;  %v3327_v4 = vld [vmem:[%s4684_s0] sm:$0xff] }
 0x2b2   :  { %v1014_v53 = vrot.slane %v1013_v44, 1  ;;  %v1040_v48 = vrot.slane %v1039_v39, 2  ;;  %v1020_v26 = vadd.f32 %v1019_v12, %v1018_v11  ;;  %v1053_v38 = vadd.f32 %v1052_v52, %v1051_v61 }
 0x2b3   :  { %v1027_v18 = vadd.f32 %v1026_v22, %v1025_v17  ;;  %v1034_v28 = vadd.f32 %v1033_v25, %v1032_v58  ;;  %v1047_v31 = vrot.slane %v1046_v6, 2  ;;  %v1060_v0 = vadd.f32 %v1059_v57, %v1058_v37  ;;  %v3129_v37 = vld [vmem:[#allocation2 + $0x10] sm:$0xff]   ;;  %v3130_v25 = vld [vmem:[#allocation2 + $0x18] sm:$0xff]  }
 0x2b4   :  { %v1015_v29 = vadd.f32 %v1014_v53, %v1013_v44  ;;  %v1041_v13 = vadd.f32 %v1040_v48, %v1039_v39  ;;  %v1021_v60 = vrot.slane %v1020_v26, 1  ;;  %v1054_v5 = vrot.slane %v1053_v38, 2  ;;  %v3328_v39 = vld [vmem:[%s4684_s0 + $0x8] sm:$0xff] }
 0x2b5   :  { %v1028_v15 = vrot.slane %v1027_v18, 1  ;;  %v1035_v50 = vrot.slane %v1034_v28, 1  ;;  %v1048_v42 = vadd.f32 %v1047_v31, %v1046_v6  ;;  %v1061_v43 = vrot.slane %v1060_v0, 2  ;;  %v2987_v6 = vld [vmem:[%s4687_s3 + $0x1] ss:$0 sm:$0xff] }
 0x2b6   :  { %v1042_v45 = vrot.slane %v1041_v13, 1  ;;  %v1086_v16 = vsel %vm1085_vm5, %v980_v9, %v3875_v14  ;;  %v1001_v24 = vadd.f32 %v1000_v54, %v3885_v1  ;;  %v1022_v8 = vadd.f32 %v1021_v60, %v1020_v26  ;;  %v2995_v31 = vld [vmem:[%s4690_s6 + $0x1] ss:$0 sm:$0xff] }
 0x2b7   :  { %v1029_v10 = vadd.f32 %v1028_v15, %v1027_v18  ;;  %v1049_v35 = vrot.slane %v1048_v42, 1  ;;  %v1008_v3 = vadd.f32 %v1007_v59, %v3887_v20  ;;  %v1055_v40 = vadd.f32 %v1054_v5, %v1053_v38  ;;  %1489 = vrot.lane.b32.xlu0 %v2995_v31, %s3384_s30 }
 0x2b8   :  { %v1062_v47 = vadd.f32 %v1061_v43, %v1060_v0  ;;  %v1088_v63 = vsel %vm1087_vm6, %v3893_v2, %v1086_v16  ;;  %v1036_v62 = vadd.f32 %v1035_v50, %v1034_v28  ;;  %v1043_v41 = vadd.f32 %v1042_v45, %v1041_v13 }
 0x2b9   :  { %v1090_v56 = vsel %vm1089_vm7, %v3895_v32, %v1088_v63  ;;  %v1095_v7 = vsel %vm1081_vm3, %v1022_v8, %v1015_v29  ;;  %v1056_v14 = vrot.slane %v1055_v40, 1  ;;  %v1050_v49 = vadd.f32 %v1049_v35, %v1048_v42 }
 0x2ba   :  { %v1063_v9 = vrot.slane %v1062_v47, 1  ;;  %v1092_v1 = vsel %vm1091_vm8, %v1001_v24, %v1090_v56  ;;  %v1096_v54 = vsel %vm1083_vm4, %v1029_v10, %v1095_v7  ;;  %v4718_v22 = vmov 0.0  }
 0x2bb   :  { %v1094_v20 = vsel %vm1093_vm9, %v1008_v3, %v1092_v1  ;;  %v1097_v59 = vsel %vm1085_vm5, %v1036_v62, %v1096_v54  ;;  %v1057_v55 = vadd.f32 %v1056_v14, %v1055_v40 }
 0x2bc   :  { %v1098_v2 = vsel %vm1087_vm6, %v1043_v41, %v1097_v59  ;;  %v1064_v11 = vadd.f32 %v1063_v9, %v1062_v47  ;;  %v3929_v44 = vadd.f32 %v3327_v4, %v1094_v20 }
 0x2bd   :  { %v1099_v17 = vsel %vm1089_vm7, %v1050_v49, %v1098_v2 }
 0x2be   :  { %v1100_v32 = vsel %vm1091_vm8, %v1057_v55, %v1099_v17 }
 0x2bf   :  { %v1101_v58 = vsel %vm1093_vm9, %v1064_v11, %v1100_v32 }
 0x2c0   :  { %v3934_v61 = vadd.f32 %v3328_v39, %v1101_v58 }
 0x2c2   :  { %v1106_v12 = vpack.c.bf16 %v3934_v61, %v3929_v44 }
 0x2c4   :  { %3076 = vmatmul.mubr.msk.bf16.vlgmr.msra.gmra.mrb[8].mxu1 %vm254_vm2, %v1106_v12 }
 0x2c5   :  { %3080 = vmatpush3.bf16.msra.mxu1 %v3129_v37  ;;  %3083 = vmatprep.mubr.msk.bf16.mxu1 %vm3381_vm0, %v4718_v22 }
 0x2c6   :  { %3081 = vmatprep.subr.bf16.mxu1 %v4718_v22 }
 0x2c9   :  { %3082 = vmatpush3.bf16.msra.mxu1 %v3130_v25 }
 0x2ca   :  { %3095 = vmatprep.subr.bf16.mxu1 %v4718_v22 }
 0x397   :  { %v1169_v53 = vpop.f32.mrb[8].mxu1 }
 0x398   :  { %v3077_v48 = vpop.f32.mrb[9].mxu1  ;;  %v3946_v57 = vadd.f32 %v2987_v6, %v1169_v53 }
 0x399   :  { %v1172_v52 = vpop.f32.mrb[10].mxu1 }
 0x39a   :  { %v3948_v26 = vadd.f32 %v2987_v6, %v1172_v52  ;;  %v3078_v18 = vpop.f32.mrb[11].mxu1 }
 0x39b   :  { %v4017_v18 = vpop.permute.xlu0 %1489 }
 0x39c   :  { %v1176_v28 = vpack.c.bf16 %v3948_v26, %v3946_v57 }
 0x39e   :  { %3084 = vmatmul.mubr.msk.bf16.vlgmr.msra.gmra.mrb[12].mxu1 %vm254_vm2, %v1176_v28 }
 0x39f   :  { %3099 = vmatprep.mubr.msk.bf16.mxu1 %vm3381_vm0, %v4718_v22 }
 0x471   :  { %v3959_v29 = vpop.f32.mrb[12].mxu1 }
 0x472   :  { %v3085_v13 = vpop.f32.mrb[13].mxu1  ;;  %v1247_v38 = vrot.slane %v3959_v29, %v3546_v46  ;;  %v1240_v45 = vcombine.high %v3959_v29, %v3959_v29 }
 0x473   :  { %v3963_v0 = vpop.f32.mrb[14].mxu1 }
 0x474   :  { %v3086_v60 = vpop.f32.mrb[15].mxu1  ;;  %v1263_v15 = vrot.slane %v1247_v38, %v3546_v46  ;;  %v1255_v50 = vcombine.high %v1247_v38, %v1247_v38  ;;  %v1296_v42 = vrot.slane %v3963_v0, %v3546_v46  ;;  %v1254_v35 = vrot.slane %v1240_v45, %v3546_v46 }
 0x475   :  { %v1289_v47 = vcombine.high %v3963_v0, %v3963_v0 }
 0x476   :  { %v1341_v5 = vrot.slane %v1263_v15, %v3550_v51  ;;  %v1312_v43 = vrot.slane %v1296_v42, %v3546_v46  ;;  %v1277_v16 = vrot.slane %v1255_v50, %v3546_v46  ;;  %v1304_v24 = vcombine.high %v1296_v42, %v1296_v42 }
 0x477   :  { %v1285_v8 = vcombine.high %v1263_v15, %v1263_v15  ;;  %v1270_v62 = vrot.slane %v1254_v35, %v3546_v46  ;;  %v1303_v7 = vrot.slane %v1289_v47, %v3546_v46  ;;  %v1256_v1 = vcombine.high %v1254_v35, %v1254_v35 }
 0x478   :  { %1402 = vrot.lane.b32.xlu1 %v1341_v5, %s3384_s30  ;;  %v1373_v10 = vrot.slane %v1312_v43, %v3550_v51  ;;  %v1345_v3 = vrot.slane %v1277_v16, %v3550_v51  ;;  %v1326_v40 = vrot.slane %v1304_v24, %v3546_v46  ;;  %v1334_v56 = vcombine.high %v1312_v43, %v1312_v43 }
 0x479   :  { %v1349_v63 = vrot.slane %v1285_v8, %v3550_v51  ;;  %v1357_v14 = vrot.slane %v1270_v62, %v3550_v51  ;;  %v1287_v9 = vcombine.high %v1277_v16, %v1277_v16  ;;  %v1319_v49 = vrot.slane %v1303_v7, %v3546_v46 }
 0x47a   :  { %1418 = vrot.lane.b32.xlu0 %v1373_v10, %s3384_s30  ;;  %v1377_v41 = vrot.slane %v1326_v40, %v3550_v51  ;;  %v1381_v54 = vrot.slane %v1334_v56, %v3550_v51  ;;  %v1284_v59 = vrot.slane %v1256_v1, %v3546_v46  ;;  %v1305_v55 = vcombine.high %v1303_v7, %v1303_v7 }
 0x47b   :  { %v1353_v20 = vrot.slane %v1287_v9, %v3550_v51  ;;  %v1389_v2 = vrot.slane %v1319_v49, %v3550_v51  ;;  %v1286_v11 = vcombine.high %v1270_v62, %v1270_v62  ;;  %v1335_v32 = vcombine.high %v1319_v49, %v1319_v49 }
 0x47c   :  { %1404 = vrot.lane.b32.xlu1 %v1345_v3, %s3384_s30  ;;  %v1361_v17 = vrot.slane %v1284_v59, %v3550_v51  ;;  %v1333_v58 = vrot.slane %v1305_v55, %v3546_v46  ;;  %v1336_v39 = vcombine.high %v1326_v40, %v1326_v40  ;;  %v1288_v48 = vcombine.high %v1284_v59, %v1284_v59 }
 0x47d   :  { %v1365_v4 = vrot.slane %v1286_v11, %v3550_v51  ;;  %v1397_v37 = vrot.slane %v1335_v32, %v3550_v51 }
 0x47e   :  { %1406 = vrot.lane.b32.xlu0 %v1349_v63, %s3384_s30  ;;  %v1337_v12 = vcombine.high %v1333_v58, %v1333_v58  ;;  %v1385_v25 = vrot.slane %v1336_v39, %v3550_v51  ;;  %v1393_v53 = vrot.slane %v1333_v58, %v3550_v51  ;;  %v1369_v52 = vrot.slane %v1288_v48, %v3550_v51 }
 0x480   :  { %1420 = vrot.lane.b32.xlu1 %v1377_v41, %s3384_s30  ;;  %v1401_v6 = vrot.slane %v1337_v12, %v3550_v51 }
 0x482   :  { %1410 = vrot.lane.b32.xlu0 %v1357_v14, %s3384_s30 }
 0x484   :  { %1422 = vrot.lane.b32.xlu1 %v1381_v54, %s3384_s30 }
 0x486   :  { %1408 = vrot.lane.b32.xlu0 %v1353_v20, %s3384_s30 }
 0x488   :  { %1426 = vrot.lane.b32.xlu1 %v1389_v2, %s3384_s30 }
 0x48a   :  { %1412 = vrot.lane.b32.xlu0 %v1361_v17, %s3384_s30 }
 0x48c   :  { %1414 = vrot.lane.b32.xlu1 %v1365_v4, %s3384_s30 }
 0x48e   :  { %1430 = vrot.lane.b32.xlu0 %v1397_v37, %s3384_s30 }
 0x490   :  { %1424 = vrot.lane.b32.xlu1 %v1385_v25, %s3384_s30 }
 0x492   :  { %1432 = vrot.lane.b32.xlu0 %v1401_v6, %s3384_s30 }
 0x494   :  { %1428 = vrot.lane.b32.xlu1 %v1393_v53, %s3384_s30 }
 0x496   :  { %1849 = vrot.lane.b32.xlu0 %v3948_v26, %s3384_s30 }
 0x498   :  { %1416 = vrot.lane.b32.xlu1 %v1369_v52, %s3384_s30 }
 0x49c   :  { %1847 = vrot.lane.b32.xlu1 %v3946_v57, %s3384_s30 }
 0x4ea   :  { %v1403_v28 = vpop.permute.xlu1 %1402 }
 0x4eb   :  { %v1450_v31 = vadd.f32 %v1403_v28, %v3507_v21 }
 0x4ec   :  { %v1419_v13 = vpop.permute.xlu0 %1418 }
 0x4ed   :  { %v1466_v38 = vadd.f32 %v1450_v31, %v3959_v29  ;;  %v1458_v60 = vadd.f32 %v1419_v13, %v3532_v34 }
 0x4ee   :  { %v1405_v15 = vpop.permute.xlu1 %1404 }
 0x4ef   :  { %v1492_v26 = vadd.f32 %v4017_v18, %v1466_v38  ;;  %v1474_v50 = vadd.f32 %v1458_v60, %v3963_v0  ;;  %v1451_v42 = vadd.f32 %v1405_v15, %v3515_v27 }
 0x4f0   :  { %v1407_v45 = vpop.permute.xlu0 %1406 }
 0x4f1   :  { %v1508_v5 = vmul.f32 0.2, %v1492_v26  ;;  %v1500_v57 = vadd.f32 %v4017_v18, %v1474_v50  ;;  %v1467_v43 = vadd.f32 %v1451_v42, %v3959_v29  ;;  %v1452_v16 = vadd.f32 %v3505_v19, %v1407_v45 }
 0x4f2   :  { %v1421_v24 = vpop.permute.xlu1 %1420 }
 0x4f3   :  { %v4028_v8 = vmax.f32 %v1492_v26, %v1508_v5  ;;  %v1516_v10 = vmul.f32 0.2, %v1500_v57  ;;  %v1493_v35 = vadd.f32 %v4017_v18, %v1467_v43  ;;  %v1468_v3 = vadd.f32 %v1452_v16, %v3959_v29 }
 0x4f4   :  { %v1459_v40 = vadd.f32 %v1421_v24, %v3536_v36  ;;  %v1411_v47 = vpop.permute.xlu0 %1410 }
 0x4f5   :  { %v1541_v63 = vsel %vm1540_vm10, %v4028_v8, -inf  ;;  %v4035_v62 = vmax.f32 %v1500_v57, %v1516_v10  ;;  %v1509_v41 = vmul.f32 0.2, %v1493_v35  ;;  %v1494_v56 = vadd.f32 %v4017_v18, %v1468_v3 }
 0x4f6   :  { %v1542_v7 = vrot.slane %v1541_v63, 4  ;;  %v1475_v14 = vadd.f32 %v1459_v40, %v3963_v0  ;;  %v1454_v9 = vadd.f32 %v1411_v47, %v3524_v30  ;;  %v1423_v1 = vpop.permute.xlu1 %1422 }
 0x4f7   :  { %v1597_v54 = vsel %vm1540_vm10, %v4035_v62, -inf  ;;  %v4042_v49 = vmax.f32 %v1493_v35, %v1509_v41  ;;  %v1510_v20 = vmul.f32 0.2, %v1494_v56  ;;  %v1460_v59 = vadd.f32 %v3530_v33, %v1423_v1 }
 0x4f8   :  { %v1543_v55 = vmax.f32 %v1541_v63, %v1542_v7  ;;  %v1598_v2 = vrot.slane %v1597_v54, 4  ;;  %v1501_v11 = vadd.f32 %v4017_v18, %v1475_v14  ;;  %v1470_v17 = vadd.f32 %v1454_v9, %v3959_v29  ;;  %v1409_v32 = vpop.permute.xlu0 %1408 }
 0x4f9   :  { %v1548_v58 = vsel %vm1540_vm10, %v4042_v49, -inf  ;;  %v4049_v4 = vmax.f32 %v1494_v56, %v1510_v20  ;;  %v1476_v39 = vadd.f32 %v1460_v59, %v3963_v0  ;;  %v1453_v37 = vadd.f32 %v3509_v23, %v1409_v32 }
 0x4fa   :  { %v1544_v12 = vrot.slane %v1543_v55, 2  ;;  %v1599_v25 = vmax.f32 %v1597_v54, %v1598_v2  ;;  %v1549_v6 = vrot.slane %v1548_v58, 4  ;;  %v1517_v53 = vmul.f32 0.2, %v1501_v11  ;;  %v1427_v32 = vpop.permute.xlu1 %1426 }
 0x4fb   :  { %v1555_v48 = vsel %vm1540_vm10, %v4049_v4, -inf  ;;  %v1496_v52 = vadd.f32 %v4017_v18, %v1470_v17  ;;  %v1502_v28 = vadd.f32 %v4017_v18, %v1476_v39  ;;  %v1469_v31 = vadd.f32 %v1453_v37, %v3959_v29 }
 0x4fc   :  { %v1545_v13 = vmax.f32 %v1543_v55, %v1544_v12  ;;  %v1600_v38 = vrot.slane %v1599_v25, 2  ;;  %v1550_v60 = vmax.f32 %v1548_v58, %v1549_v6  ;;  %v1556_v15 = vrot.slane %v1555_v48, 4 }
 0x4fd   :  { %v4058_v26 = vmax.f32 %v1501_v11, %v1517_v53  ;;  %v1512_v50 = vmul.f32 0.2, %v1496_v52  ;;  %v1518_v42 = vmul.f32 0.2, %v1502_v28  ;;  %v1495_v45 = vadd.f32 %v4017_v18, %v1469_v31 }
 0x4fe   :  { %v1546_v5 = vrot.slane %v1545_v13, 1  ;;  %v1601_v57 = vmax.f32 %v1599_v25, %v1600_v38  ;;  %v1551_v43 = vrot.slane %v1550_v60, 2  ;;  %v1557_v16 = vmax.f32 %v1555_v48, %v1556_v15 }
 0x4ff   :  { %v1604_v24 = vsel %vm1540_vm10, %v4058_v26, -inf  ;;  %v4063_v10 = vmax.f32 %v1496_v52, %v1512_v50  ;;  %v4065_v35 = vmax.f32 %v1502_v28, %v1518_v42  ;;  %v1511_v3 = vmul.f32 0.2, %v1495_v45  ;;  %v4719_v42 = vld [vmem:[#allocation13_spill] sm:$0xff] }
 0x500   :  { %v1547_v40 = vmax.f32 %v1545_v13, %v1546_v5  ;;  %v1602_v47 = vrot.slane %v1601_v57, 1  ;;  %v1552_v63 = vmax.f32 %v1550_v60, %v1551_v43  ;;  %v1558_v41 = vrot.slane %v1557_v16, 2  ;;  %v3131_v5 = vld [vmem:[%s4686_s2 + $0x20] sm:$0xff]  }
 0x501   :  { %v1605_v56 = vrot.slane %v1604_v24, 4  ;;  %v1569_v7 = vsel %vm1540_vm10, %v4063_v10, -inf  ;;  %v1611_v14 = vsel %vm1540_vm10, %v4065_v35, -inf  ;;  %v4071_v9 = vmax.f32 %v1495_v45, %v1511_v3  ;;  %3088 = vmatpush3.bf16.msra.mxu0 %v3131_v5 }
 0x502   :  { %v1653_v1 = vsub.f32 %v4028_v8, %v1547_v40  ;;  %v1603_v54 = vmax.f32 %v1601_v57, %v1602_v47  ;;  %v1553_v20 = vrot.slane %v1552_v63, 1  ;;  %v1559_v59 = vmax.f32 %v1557_v16, %v1558_v41  ;;  %v1413_v8 = vpop.permute.xlu0 %1412  ;;  %v4720_v47 = vld [vmem:[#allocation10_spill] sm:$0xff]  ;;  %3089 = vmatprep.subr.bf16.mxu0 %v4718_v22 }
 0x503   :  { %v1606_v55 = vmax.f32 %v1604_v24, %v1605_v56  ;;  %v1570_v2 = vrot.slane %v1569_v7, 4  ;;  %v1612_v11 = vrot.slane %v1611_v14, 4  ;;  %v1562_v17 = vsel %vm1540_vm10, %v4071_v9, -inf }
 0x504   :  { %v1669_v58 = vmul.f32 1.442695, %v1653_v1  ;;  %v1661_v39 = vsub.f32 %v4035_v62, %v1603_v54  ;;  %v1554_v37 = vmax.f32 %v1552_v63, %v1553_v20  ;;  %v1560_v12 = vrot.slane %v1559_v59, 1 }
 0x505   :  { %v1607_v25 = vrot.slane %v1606_v55, 2  ;;  %v1571_v6 = vmax.f32 %v1569_v7, %v1570_v2  ;;  %v1613_v53 = vmax.f32 %v1611_v14, %v1612_v11  ;;  %v1563_v48 = vrot.slane %v1562_v17, 4 }
 0x506   :  { %3199 = vpow2.f32 %v1669_v58  ;;  %v1685_v52 = vmul.f32 1.442695, %v1661_v39  ;;  %v1654_v28 = vsub.f32 %v4042_v49, %v1554_v37  ;;  %v1561_v31 = vmax.f32 %v1559_v59, %v1560_v12  ;;  %v1415_v49 = vpop.permute.xlu1 %1414  ;;  %v1431_v1 = vpop.permute.xlu0 %1430  ;;  %v4721_v59 = vld [vmem:[#allocation8_spill] sm:$0xff] }
 0x507   :  { %v1608_v13 = vmax.f32 %v1606_v55, %v1607_v25  ;;  %v1572_v38 = vrot.slane %v1571_v6, 2  ;;  %v1614_v60 = vrot.slane %v1613_v53, 2  ;;  %v1564_v15 = vmax.f32 %v1562_v17, %v1563_v48  ;;  %v4722_v12 = vld [vmem:[#allocation12_spill] sm:$0xff] }
 0x508   :  { %3201 = vpow2.f32 %v1685_v52  ;;  %v1671_v50 = vmul.f32 1.442695, %v1654_v28  ;;  %v1655_v62 = vsub.f32 %v4049_v4, %v1561_v31  ;;  %v1462_v45 = vadd.f32 %v1427_v32, %v4719_v42  ;;  %v3132_v4 = vld [vmem:[%s4686_s2 + $0x28] sm:$0xff]  }
 0x509   :  { %v1609_v57 = vrot.slane %v1608_v13, 1  ;;  %v1573_v43 = vmax.f32 %v1571_v6, %v1572_v38  ;;  %v1615_v16 = vmax.f32 %v1613_v53, %v1614_v60  ;;  %v1565_v24 = vrot.slane %v1564_v15, 2  ;;  %3090 = vmatpush3.bf16.msra.mxu0 %v3132_v4 }
 0x50a   :  { %3203 = vpow2.f32 %v1671_v50  ;;  %v1673_v3 = vmul.f32 1.442695, %v1655_v62  ;;  %v1478_v40 = vadd.f32 %v1462_v45, %v3963_v0  ;;  %v1455_v63 = vadd.f32 %v1413_v8, %v4720_v47 }
 0x50b   :  { %v1610_v41 = vmax.f32 %v1608_v13, %v1609_v57  ;;  %v1574_v56 = vrot.slane %v1573_v43, 1  ;;  %v1616_v7 = vrot.slane %v1615_v16, 1  ;;  %v1566_v14 = vmax.f32 %v1564_v15, %v1565_v24 }
 0x50c   :  { %3205 = vpow2.f32 %v1673_v3  ;;  %v1504_v54 = vadd.f32 %v4017_v18, %v1478_v40  ;;  %v1471_v20 = vadd.f32 %v1455_v63, %v3959_v29  ;;  %v1456_v55 = vadd.f32 %v4721_v59, %v1415_v49 }
 0x50d   :  { %v1662_v2 = vsub.f32 %v4058_v26, %v1610_v41  ;;  %v1575_v11 = vmax.f32 %v1573_v43, %v1574_v56  ;;  %v1617_v17 = vmax.f32 %v1615_v16, %v1616_v7  ;;  %v1567_v32 = vrot.slane %v1566_v14, 1 }
 0x50e   :  { %v1520_v58 = vmul.f32 0.2, %v1504_v54  ;;  %v1497_v39 = vadd.f32 %v4017_v18, %v1471_v20  ;;  %v1472_v37 = vadd.f32 %v1456_v55, %v3959_v29  ;;  %v1464_v25 = vadd.f32 %v4722_v12, %v1431_v1 }
 0x50f   :  { %v1687_v6 = vmul.f32 1.442695, %v1662_v2  ;;  %v1657_v53 = vsub.f32 %v4063_v10, %v1575_v11  ;;  %v1663_v48 = vsub.f32 %v4065_v35, %v1617_v17  ;;  %v1568_v8 = vmax.f32 %v1566_v14, %v1567_v32 }
 0x510   :  { %v4098_v52 = vpop.eup %3199  ;;  %v4100_v26 = vmax.f32 %v1504_v54, %v1520_v58  ;;  %v1513_v28 = vmul.f32 0.2, %v1497_v39  ;;  %v1498_v31 = vadd.f32 %v4017_v18, %v1472_v37  ;;  %v1480_v13 = vadd.f32 %v1464_v25, %v3963_v0 }
 0x511   :  { %v1701_v38 = vsel %vm1540_vm10, %v4098_v52, 0.0  ;;  %3207 = vpow2.f32 %v1687_v6  ;;  %v1677_v60 = vmul.f32 1.442695, %v1657_v53  ;;  %v1689_v15 = vmul.f32 1.442695, %v1663_v48 }
 0x512   :  { %v4106_v50 = vpop.eup %3201  ;;  %v1702_v10 = vrot.slane %v1701_v38, 4  ;;  %v1656_v35 = vsub.f32 %v4071_v9, %v1568_v8  ;;  %v1625_v62 = vsel %vm1540_vm10, %v4100_v26, -inf  ;;  %v4111_v45 = vmax.f32 %v1497_v39, %v1513_v28 }
 0x513   :  { %v1757_v5 = vsel %vm1540_vm10, %v4106_v50, 0.0  ;;  %3209 = vpow2.f32 %v1677_v60  ;;  %v1626_v57 = vrot.slane %v1625_v62, 4  ;;  %v1514_v43 = vmul.f32 0.2, %v1498_v31 }
 0x514   :  { %v4115_v16 = vpop.eup %3203  ;;  %v1703_v24 = vadd.f32 %v1702_v10, %v1701_v38  ;;  %v1758_v49 = vrot.slane %v1757_v5, 4  ;;  %3211 = vpow2.f32 %v1689_v15  ;;  %v1675_v3 = vmul.f32 1.442695, %v1656_v35 }
 0x515   :  { %v1708_v9 = vsel %vm1540_vm10, %v4115_v16, 0.0  ;;  %v1627_v40 = vmax.f32 %v1625_v62, %v1626_v57  ;;  %v1576_v63 = vsel %vm1540_vm10, %v4111_v45, -inf  ;;  %v4121_v4 = vmax.f32 %v1498_v31, %v1514_v43 }
 0x516   :  { %v4123_v41 = vpop.eup %3205  ;;  %v1704_v56 = vrot.slane %v1703_v24, 2  ;;  %v1759_v7 = vadd.f32 %v1758_v49, %v1757_v5  ;;  %v1709_v14 = vrot.slane %v1708_v9, 4  ;;  %3213 = vpow2.f32 %v1675_v3 }
 0x517   :  { %v1715_v1 = vsel %vm1540_vm10, %v4123_v41, 0.0  ;;  %v1628_v54 = vrot.slane %v1627_v40, 2  ;;  %v1577_v20 = vrot.slane %v1576_v63, 4  ;;  %v1583_v55 = vsel %vm1540_vm10, %v4121_v4, -inf }
 0x518   :  { %v1705_v2 = vadd.f32 %v1704_v56, %v1703_v24  ;;  %v1760_v11 = vrot.slane %v1759_v7, 2  ;;  %v1710_v17 = vadd.f32 %v1709_v14, %v1708_v9  ;;  %v1716_v32 = vrot.slane %v1715_v1, 4 }
 0x519   :  { %v1629_v58 = vmax.f32 %v1627_v40, %v1628_v54  ;;  %v1578_v39 = vmax.f32 %v1576_v63, %v1577_v20  ;;  %v1584_v37 = vrot.slane %v1583_v55, 4  ;;  %v1506_v25 = vadd.f32 %v4017_v18, %v1480_v13 }
 0x51a   :  { %v1706_v6 = vrot.slane %v1705_v2, 1  ;;  %v1761_v53 = vadd.f32 %v1760_v11, %v1759_v7  ;;  %v1711_v48 = vrot.slane %v1710_v17, 2  ;;  %v1717_v8 = vadd.f32 %v1716_v32, %v1715_v1 }
 0x51b   :  { %v4130_v28 = vpop.eup %3207  ;;  %v1630_v31 = vrot.slane %v1629_v58, 1  ;;  %v1579_v38 = vrot.slane %v1578_v39, 2  ;;  %v1585_v35 = vmax.f32 %v1583_v55, %v1584_v37  ;;  %v1522_v13 = vmul.f32 0.2, %v1506_v25 }
 0x51c   :  { %v1762_v60 = vrot.slane %v1761_v53, 1  ;;  %v1712_v15 = vadd.f32 %v1711_v48, %v1710_v17  ;;  %v1718_v10 = vrot.slane %v1717_v8, 2  ;;  %v1707_v5 = vadd.f32 %v1706_v6, %v1705_v2  ;;  %v1425_v6 = vpop.permute.xlu1 %1424 }
 0x51d   :  { %v4132_v62 = vpop.eup %3209  ;;  %v1764_v57 = vsel %vm1540_vm10, %v4130_v28, 0.0  ;;  %v1631_v43 = vmax.f32 %v1629_v58, %v1630_v31  ;;  %v1580_v40 = vmax.f32 %v1578_v39, %v1579_v38  ;;  %v1586_v55 = vrot.slane %v1585_v35, 2 }
 0x51e   :  { %v4136_v24 = vpop.eup %3211  ;;  %v1763_v49 = vadd.f32 %v1762_v60, %v1761_v53  ;;  %v1713_v3 = vrot.slane %v1712_v15, 1  ;;  %v1719_v9 = vadd.f32 %v1718_v10, %v1717_v8  ;;  %v1765_v63 = vrot.slane %v1764_v57, 4 }
 0x51f   :  { %v1729_v56 = vsel %vm1540_vm10, %v4132_v62, 0.0  ;;  %v1771_v7 = vsel %vm1540_vm10, %v4136_v24, 0.0  ;;  %v1665_v14 = vsub.f32 %v4100_v26, %v1631_v43  ;;  %v1581_v26 = vrot.slane %v1580_v40, 1 }
 0x520   :  { %v4143_v1 = vpop.eup %3213  ;;  %3215 = vrcp.f32 %v1763_v49  ;;  %v1720_v54 = vrot.slane %v1719_v9, 1  ;;  %v1730_v20 = vrot.slane %v1729_v56, 4  ;;  %v1766_v2 = vadd.f32 %v1765_v63, %v1764_v57 }
 0x521   :  { %v1772_v11 = vrot.slane %v1771_v7, 4  ;;  %v1722_v17 = vsel %vm1540_vm10, %v4143_v1, 0.0  ;;  %v1693_v32 = vmul.f32 1.442695, %v1665_v14  ;;  %3217 = vrcp.f32 %v1707_v5 }
 0x522   :  { %v1714_v58 = vadd.f32 %v1713_v3, %v1712_v15  ;;  %v1731_v39 = vadd.f32 %v1730_v20, %v1729_v56  ;;  %v1723_v37 = vrot.slane %v1722_v17, 4  ;;  %v1767_v53 = vrot.slane %v1766_v2, 2  ;;  %v4723_v15 = vld [vmem:[#allocation11_spill] sm:$0xff] }
 0x523   :  { %v1773_v48 = vadd.f32 %v1772_v11, %v1771_v7  ;;  %3219 = vpow2.f32 %v1693_v32  ;;  %v1721_v8 = vadd.f32 %v1720_v54, %v1719_v9  ;;  %v1587_v60 = vmax.f32 %v1585_v35, %v1586_v55  ;;  %v1429_v55 = vpop.permute.xlu1 %1428 }
 0x524   :  { %v1732_v31 = vrot.slane %v1731_v39, 2  ;;  %v1724_v38 = vadd.f32 %v1723_v37, %v1722_v17  ;;  %v1768_v10 = vadd.f32 %v1767_v53, %v1766_v2  ;;  %v1582_v43 = vmax.f32 %v1580_v40, %v1581_v26 }
 0x525   :  { %v1774_v57 = vrot.slane %v1773_v48, 2  ;;  %v4147_v49 = vmax.f32 %v1506_v25, %v1522_v13  ;;  %v1588_v5 = vrot.slane %v1587_v60, 1  ;;  %v1461_v3 = vadd.f32 %v4723_v15, %v1425_v6 }
 0x526   :  { %v1733_v63 = vadd.f32 %v1732_v31, %v1731_v39  ;;  %v1725_v14 = vrot.slane %v1724_v38, 2  ;;  %v1769_v56 = vrot.slane %v1768_v10, 1  ;;  %v1658_v7 = vsub.f32 %v4111_v45, %v1582_v43  ;;  %v1433_v39 = vpop.permute.xlu0 %1432  ;;  %v4725_v43 = vld [vmem:[#allocation15_spill] sm:$0xff] }
 0x527   :  { %v1775_v20 = vadd.f32 %v1774_v57, %v1773_v48  ;;  %v1639_v9 = vsel %vm1540_vm10, %v4147_v49, -inf  ;;  %3221 = vrcp.f32 %v1714_v58  ;;  %v1589_v54 = vmax.f32 %v1587_v60, %v1588_v5  ;;  %v1417_v5 = vpop.permute.xlu1 %1416 }
 0x528   :  { %v1640_v35 = vrot.slane %v1639_v9, 4  ;;  %v1770_v2 = vadd.f32 %v1769_v56, %v1768_v10  ;;  %v1734_v40 = vrot.slane %v1733_v63, 1  ;;  %3223 = vrcp.f32 %v1721_v8 }
 0x529   :  { %v1776_v25 = vrot.slane %v1775_v20, 1  ;;  %v1726_v11 = vadd.f32 %v1725_v14, %v1724_v38  ;;  %v1659_v17 = vsub.f32 %v4121_v4, %v1589_v54  ;;  %v1679_v45 = vmul.f32 1.442695, %v1658_v7  ;;  %v4724_v38 = vld [vmem:[#allocation14_spill] sm:$0xff] }
 0x52a   :  { %v3216_v13 = vpop.eup %3215  ;;  %v1641_v32 = vmax.f32 %v1639_v9, %v1640_v35  ;;  %3225 = vrcp.f32 %v1770_v2  ;;  %v1477_v6 = vadd.f32 %v1461_v3, %v3963_v0  ;;  %v1735_v60 = vadd.f32 %v1734_v40, %v1733_v63  ;;  %v4165_v9 = vpop.permute.xlu0 %1849  ;;  %v4726_v40 = vld [vmem:[#allocation9_spill] sm:$0xff] }
 0x52b   :  { %v1777_v37 = vadd.f32 %v1776_v25, %v1775_v20  ;;  %v3218_v53 = vpop.eup %3217  ;;  %v1681_v58 = vmul.f32 1.442695, %v1659_v17  ;;  %v1837_v31 = vmul.f32 %v3216_v13, %v4106_v50  ;;  %v1465_v10 = vadd.f32 %v4724_v38, %v1433_v39 }
 0x52c   :  { %v1642_v48 = vrot.slane %v1641_v32, 2  ;;  %v1503_v8 = vadd.f32 %v4017_v18, %v1477_v6  ;;  %v1463_v14 = vadd.f32 %v1429_v55, %v4725_v43  ;;  %v1727_v3 = vrot.slane %v1726_v11, 1 }
 0x52d   :  { %v4155_v26 = vpop.eup %3219  ;;  %3227 = vrcp.f32 %v1777_v37  ;;  %v1481_v50 = vadd.f32 %v1465_v10, %v3963_v0  ;;  %v1861_v2 = vmul.f32 %v4165_v9, %v1837_v31  ;;  %v1457_v55 = vadd.f32 %v4726_v40, %v1417_v5 }
 0x52e   :  { %v1785_v4 = vsel %vm1540_vm10, %v4155_v26, 0.0  ;;  %v1643_v57 = vmax.f32 %v1641_v32, %v1642_v48  ;;  %3229 = vpow2.f32 %v1679_v45  ;;  %v1519_v20 = vmul.f32 0.2, %v1503_v8 }
 0x52f   :  { %v1786_v56 = vrot.slane %v1785_v4, 4  ;;  %3231 = vpow2.f32 %v1681_v58  ;;  %v1479_v63 = vadd.f32 %v1463_v14, %v3963_v0  ;;  %v1829_v13 = vmul.f32 %v3218_v53, %v4098_v52 }
 0x530   :  { %v1644_v7 = vrot.slane %v1643_v57, 1  ;;  %v4167_v35 = vmax.f32 %v1503_v8, %v1519_v20  ;;  %v1507_v32 = vadd.f32 %v4017_v18, %v1481_v50  ;;  %v1728_v37 = vadd.f32 %v1727_v3, %v1726_v11 }
 0x531   :  { %v1787_v54 = vadd.f32 %v1786_v56, %v1785_v4  ;;  %v3222_v25 = vpop.eup %3221  ;;  %v1505_v39 = vadd.f32 %v4017_v18, %v1479_v63  ;;  %v1473_v6 = vadd.f32 %v1457_v55, %v3959_v29  ;;  %3233 = vrcp.f32 %v1735_v60  ;;  %v4185_v29 = vpop.permute.xlu1 %1847 }
 0x532   :  { %v1645_v17 = vmax.f32 %v1643_v57, %v1644_v7  ;;  %v1618_v0 = vsel %vm1540_vm10, %v4167_v35, -inf  ;;  %v3224_v58 = vpop.eup %3223  ;;  %v1523_v8 = vmul.f32 0.2, %v1507_v32  ;;  %v1830_v52 = vmul.f32 %v3222_v25, %v4115_v16 }
 0x533   :  { %v1788_v45 = vrot.slane %v1787_v54, 2  ;;  %v1619_v31 = vrot.slane %v1618_v0, 4  ;;  %v1521_v10 = vmul.f32 0.2, %v1505_v39  ;;  %v4180_v57 = vsel %vm1540_vm10, %v1861_v2, 0.0 }
 0x534   :  { %v1667_v48 = vsub.f32 %v4147_v49, %v1645_v17  ;;  %v3226_v4 = vpop.eup %3225  ;;  %v4183_v3 = vmax.f32 %v1507_v32, %v1523_v8  ;;  %v4188_v49 = vmul.f32 %v3224_v58, %v4123_v41  ;;  %3235 = vrcp.f32 %v1728_v37 }
 0x535   :  { %v1789_v53 = vadd.f32 %v1788_v45, %v1787_v54  ;;  %v1838_v11 = vmul.f32 %v3226_v4, %v4130_v28  ;;  %v1620_v5 = vmax.f32 %v1618_v0, %v1619_v31  ;;  %v4190_v56 = vmax.f32 %v1505_v39, %v1521_v10 }
 0x536   :  { %v1697_v14 = vmul.f32 1.442695, %v1667_v48  ;;  %v4193_v16 = vmul.f32 %v4185_v29, %v1829_v13  ;;  %v1646_v28 = vsel %vm1540_vm10, %v4183_v3, -inf  ;;  %v1926_v54 = vrot.slane %v4180_v57, 4 }
 0x537   :  { %v3228_v60 = vpop.eup %3227  ;;  %v1790_v20 = vrot.slane %v1789_v53, 1  ;;  %v1621_v7 = vrot.slane %v1620_v5, 2  ;;  %v1647_v63 = vrot.slane %v1646_v28, 4  ;;  %v1632_v41 = vsel %vm1540_vm10, %v4190_v56, -inf }
 0x538   :  { %3237 = vpow2.f32 %v1697_v14  ;;  %v4197_v50 = vpop.eup %3229  ;;  %v1499_v2 = vadd.f32 %v4017_v18, %v1473_v6  ;;  %v1633_v17 = vrot.slane %v1632_v41, 4  ;;  %v1862_v32 = vmul.f32 %v4165_v9, %v1838_v11 }
 0x539   :  { %v4203_v55 = vpop.eup %3231  ;;  %v1736_v25 = vsel %vm1540_vm10, %v4197_v50, 0.0  ;;  %v1622_v13 = vmax.f32 %v1620_v5, %v1621_v7  ;;  %v1839_v39 = vmul.f32 %v3228_v60, %v4136_v24  ;;  %v1648_v0 = vmax.f32 %v1646_v28, %v1647_v63 }
 0x53a   :  { %v1737_v37 = vrot.slane %v1736_v25, 4  ;;  %v1743_v45 = vsel %vm1540_vm10, %v4203_v55, 0.0  ;;  %v1791_v58 = vadd.f32 %v1790_v20, %v1789_v53  ;;  %v1634_v18 = vmax.f32 %v1632_v41, %v1633_v17 }
 0x53b   :  { %v1744_v48 = vrot.slane %v1743_v45, 4  ;;  %v1623_v31 = vrot.slane %v1622_v13, 1  ;;  %v1649_v8 = vrot.slane %v1648_v0, 2  ;;  %v1515_v10 = vmul.f32 0.2, %v1499_v2  ;;  %v4213_v24 = vpop.eup %3233 }
 0x53c   :  { %v1738_v6 = vadd.f32 %v1737_v37, %v1736_v25  ;;  %v1854_v4 = vmul.f32 %v4185_v29, %v1830_v52  ;;  %v1635_v7 = vrot.slane %v1634_v18, 2  ;;  %v1932_v11 = vsel %vm1540_vm10, %v1862_v32, 0.0 }
 0x53d   :  { %v1745_v14 = vadd.f32 %v1744_v48, %v1743_v45  ;;  %v1624_v5 = vmax.f32 %v1622_v13, %v1623_v31  ;;  %v1650_v40 = vmax.f32 %v1648_v0, %v1649_v8  ;;  %v1863_v28 = vmul.f32 %v4165_v9, %v1839_v39 }
 0x53e   :  { %v1739_v60 = vrot.slane %v1738_v6, 2  ;;  %v4216_v53 = vmax.f32 %v1499_v2, %v1515_v10  ;;  %3239 = vrcp.f32 %v1791_v58  ;;  %v1636_v41 = vmax.f32 %v1634_v18, %v1635_v7  ;;  %v3236_v25 = vpop.eup %3235 }
 0x53f   :  { %v1746_v20 = vrot.slane %v1745_v14, 2  ;;  %v1664_v63 = vsub.f32 %v4167_v35, %v1624_v5  ;;  %v1651_v17 = vrot.slane %v1650_v40, 1  ;;  %v1933_v13 = vrot.slane %v1932_v11, 4 }
 0x540   :  { %v1740_v52 = vadd.f32 %v1739_v60, %v1738_v6  ;;  %v1590_v32 = vsel %vm1540_vm10, %v4216_v53, -inf  ;;  %v1637_v48 = vrot.slane %v1636_v41, 1  ;;  %v1939_v35 = vsel %vm1540_vm10, %v1863_v28, 0.0 }
 0x541   :  { %v1747_v45 = vadd.f32 %v1746_v20, %v1745_v14  ;;  %v1691_v0 = vmul.f32 1.442695, %v1664_v63  ;;  %v1591_v39 = vrot.slane %v1590_v32, 4  ;;  %v1652_v31 = vmax.f32 %v1650_v40, %v1651_v17 }
 0x542   :  { %v4221_v37 = vpop.eup %3237  ;;  %v1741_v2 = vrot.slane %v1740_v52, 1  ;;  %v1638_v8 = vmax.f32 %v1636_v41, %v1637_v48  ;;  %v1927_v7 = vadd.f32 %v1926_v54, %v4180_v57  ;;  %v1934_v38 = vadd.f32 %v1933_v13, %v1932_v11 }
 0x543   :  { %v1799_v58 = vsel %vm1540_vm10, %v4221_v37, 0.0  ;;  %v1748_v18 = vrot.slane %v1747_v45, 1  ;;  %3241 = vpow2.f32 %v1691_v0  ;;  %v1668_v5 = vsub.f32 %v4183_v3, %v1652_v31 }
 0x544   :  { %v1800_v6 = vrot.slane %v1799_v58, 4  ;;  %v1742_v10 = vadd.f32 %v1741_v2, %v1740_v52  ;;  %v1592_v14 = vmax.f32 %v1590_v32, %v1591_v39  ;;  %v1666_v63 = vsub.f32 %v4190_v56, %v1638_v8 }
 0x545   :  { %v1749_v60 = vadd.f32 %v1748_v18, %v1747_v45  ;;  %v1699_v43 = vmul.f32 1.442695, %v1668_v5  ;;  %v1940_v40 = vrot.slane %v1939_v35, 4  ;;  %v1855_v41 = vmul.f32 %v4185_v29, %v4188_v49 }
 0x546   :  { %v1801_v20 = vadd.f32 %v1800_v6, %v1799_v58  ;;  %3243 = vrcp.f32 %v1742_v10  ;;  %v1593_v17 = vrot.slane %v1592_v14, 2  ;;  %v1695_v12 = vmul.f32 1.442695, %v1666_v63 }
 0x547   :  { %3245 = vrcp.f32 %v1749_v60  ;;  %v1869_v57 = vsel %vm1540_vm10, %v4193_v16, 0.0  ;;  %v1876_v54 = vsel %vm1540_vm10, %v1854_v4, 0.0  ;;  %v1928_v45 = vrot.slane %v1927_v7, 2 }
 0x548   :  { %v1802_v28 = vrot.slane %v1801_v20, 2  ;;  %3247 = vpow2.f32 %v1699_v43  ;;  %v1594_v3 = vmax.f32 %v1592_v14, %v1593_v17  ;;  %v3240_v52 = vpop.eup %3239  ;;  %v1870_v11 = vrot.slane %v1869_v57, 4 }
 0x549   :  { %3249 = vpow2.f32 %v1695_v12  ;;  %v1877_v13 = vrot.slane %v1876_v54, 4  ;;  %v1935_v0 = vrot.slane %v1934_v38, 2  ;;  %v1832_v48 = vmul.f32 %v3236_v25, %v4143_v1 }
 0x54a   :  { %v1803_v56 = vadd.f32 %v1802_v28, %v1801_v20  ;;  %v1595_v32 = vrot.slane %v1594_v3, 1  ;;  %v1871_v2 = vadd.f32 %v1870_v11, %v1869_v57  ;;  %v1929_v43 = vadd.f32 %v1928_v45, %v1927_v7 }
 0x54b   :  { %v1936_v58 = vadd.f32 %v1935_v0, %v1934_v38  ;;  %v1941_v31 = vadd.f32 %v1940_v40, %v1939_v35  ;;  %v1841_v16 = vmul.f32 %v3240_v52, %v4155_v26  ;;  %v1878_v6 = vadd.f32 %v1877_v13, %v1876_v54 }
 0x54c   :  { %v1804_v39 = vrot.slane %v1803_v56, 1  ;;  %v1596_v49 = vmax.f32 %v1594_v3, %v1595_v32  ;;  %v1883_v12 = vsel %vm1540_vm10, %v1855_v41, 0.0  ;;  %v1930_v1 = vrot.slane %v1929_v43, 1 }
 0x54d   :  { %v4235_v18 = vpop.eup %3241  ;;  %v1937_v25 = vrot.slane %v1936_v58, 1  ;;  %v1942_v7 = vrot.slane %v1941_v31, 2  ;;  %v1872_v38 = vrot.slane %v1871_v2, 2  ;;  %v1833_v14 = vmul.f32 %v4213_v24, %v4132_v62 }
 0x54e   :  { %v1805_v4 = vadd.f32 %v1804_v39, %v1803_v56  ;;  %v1778_v8 = vsel %vm1540_vm10, %v4235_v18, 0.0  ;;  %v1660_v10 = vsub.f32 %v4216_v53, %v1596_v49  ;;  %v1931_v60 = vadd.f32 %v1930_v1, %v1929_v43 }
 0x54f   :  { %v1779_v5 = vrot.slane %v1778_v8, 4  ;;  %v1938_v20 = vadd.f32 %v1937_v25, %v1936_v58  ;;  %v1865_v17 = vmul.f32 %v4165_v9, %v1841_v16  ;;  %v1856_v28 = vmul.f32 %v4185_v29, %v1832_v48 }
 0x550   :  { %3251 = vrcp.f32 %v1805_v4  ;;  %v3244_v35 = vpop.eup %3243  ;;  %v1683_v26 = vmul.f32 1.442695, %v1660_v10  ;;  %v1943_v53 = vadd.f32 %v1942_v7, %v1941_v31  ;;  %v1884_v3 = vrot.slane %v1883_v12, 4 }
 0x551   :  { %v3246_v63 = vpop.eup %3245  ;;  %v1780_v40 = vadd.f32 %v1779_v5, %v1778_v8  ;;  %v2004_v57 = vsel %vm1081_vm3, %v1938_v20, %v1931_v60  ;;  %v1879_v54 = vrot.slane %v1878_v6, 2  ;;  %v1873_v11 = vadd.f32 %v1872_v38, %v1871_v2 }
 0x552   :  { %v4246_v41 = vpop.eup %3247  ;;  %3253 = vpow2.f32 %v1683_v26  ;;  %v1944_v56 = vrot.slane %v1943_v53, 1  ;;  %v1857_v45 = vmul.f32 %v4185_v29, %v1833_v14  ;;  %v1834_v0 = vmul.f32 %v3244_v35, %v4197_v50 }
 0x553   :  { %v4249_v52 = vpop.eup %3249  ;;  %v1781_v62 = vrot.slane %v1780_v40, 2  ;;  %v1806_v24 = vsel %vm1540_vm10, %v4246_v41, 0.0  ;;  %v1835_v43 = vmul.f32 %v3246_v63, %v4203_v55  ;;  %v1953_v31 = vsel %vm1540_vm10, %v1865_v17, 0.0 }
 0x554   :  { %v1807_v13 = vrot.slane %v1806_v24, 4  ;;  %v1792_v32 = vsel %vm1540_vm10, %v4249_v52, 0.0  ;;  %v1945_v49 = vadd.f32 %v1944_v56, %v1943_v53  ;;  %v1880_v16 = vadd.f32 %v1879_v54, %v1878_v6 }
 0x555   :  { %v1782_v48 = vadd.f32 %v1781_v62, %v1780_v40  ;;  %v1793_v39 = vrot.slane %v1792_v32, 4  ;;  %v1885_v4 = vadd.f32 %v1884_v3, %v1883_v12  ;;  %v1874_v1 = vrot.slane %v1873_v11, 1 }
 0x556   :  { %v1808_v58 = vadd.f32 %v1807_v13, %v1806_v24  ;;  %v4260_v10 = vsel %vm1083_vm4, %v1945_v49, %v2004_v57  ;;  %v1858_v5 = vmul.f32 %v4185_v29, %v1834_v0  ;;  %v1890_v7 = vsel %vm1540_vm10, %v1856_v28, 0.0 }
 0x557   :  { %v1783_v8 = vrot.slane %v1782_v48, 1  ;;  %v1794_v2 = vadd.f32 %v1793_v39, %v1792_v32  ;;  %v1886_v50 = vrot.slane %v1885_v4, 2  ;;  %v1859_v14 = vmul.f32 %v4185_v29, %v1835_v43 }
 0x558   :  { %v1809_v25 = vrot.slane %v1808_v58, 2  ;;  %v1891_v26 = vrot.slane %v1890_v7, 4  ;;  %v1881_v60 = vrot.slane %v1880_v16, 1  ;;  %v1897_v17 = vsel %vm1540_vm10, %v1857_v45, 0.0 }
 0x559   :  { %v1784_v35 = vadd.f32 %v1783_v8, %v1782_v48  ;;  %v1795_v55 = vrot.slane %v1794_v2, 2  ;;  %v1887_v20 = vadd.f32 %v1886_v50, %v1885_v4  ;;  %v1875_v28 = vadd.f32 %v1874_v1, %v1873_v11 }
 0x55a   :  { %v3252_v38 = vpop.eup %3251  ;;  %v1810_v6 = vadd.f32 %v1809_v25, %v1808_v58  ;;  %v1892_v40 = vadd.f32 %v1891_v26, %v1890_v7  ;;  %v1898_v54 = vrot.slane %v1897_v17, 4  ;;  %v1882_v48 = vadd.f32 %v1881_v60, %v1880_v16 }
 0x55b   :  { %v1843_v12 = vmul.f32 %v3252_v38, %v4221_v37  ;;  %3255 = vrcp.f32 %v1784_v35  ;;  %v1796_v63 = vadd.f32 %v1795_v55, %v1794_v2  ;;  %v1888_v57 = vrot.slane %v1887_v20, 1 }
 0x55c   :  { %v4267_v53 = vpop.eup %3253  ;;  %v1811_v3 = vrot.slane %v1810_v6, 1  ;;  %v1893_v56 = vrot.slane %v1892_v40, 2  ;;  %v1904_v37 = vsel %vm1540_vm10, %v1858_v5, 0.0  ;;  %v1899_v43 = vadd.f32 %v1898_v54, %v1897_v17 }
 0x55d   :  { %v1797_v62 = vrot.slane %v1796_v63, 1  ;;  %v1750_v24 = vsel %vm1540_vm10, %v4267_v53, 0.0  ;;  %v1867_v0 = vmul.f32 %v4165_v9, %v1843_v12  ;;  %v1889_v45 = vadd.f32 %v1888_v57, %v1887_v20 }
 0x55e   :  { %v1812_v13 = vadd.f32 %v1811_v3, %v1810_v6  ;;  %v1751_v32 = vrot.slane %v1750_v24, 4  ;;  %v1894_v49 = vadd.f32 %v1893_v56, %v1892_v40  ;;  %v1905_v58 = vrot.slane %v1904_v37, 4 }
 0x55f   :  { %v1798_v39 = vadd.f32 %v1797_v62, %v1796_v63  ;;  %v1911_v4 = vsel %vm1540_vm10, %v1859_v14, 0.0  ;;  %v1954_v8 = vrot.slane %v1953_v31, 4  ;;  %v1900_v1 = vrot.slane %v1899_v43, 2 }
 0x560   :  { %3257 = vrcp.f32 %v1812_v13  ;;  %v1752_v11 = vadd.f32 %v1751_v32, %v1750_v24  ;;  %v1895_v2 = vrot.slane %v1894_v49, 1  ;;  %v1906_v5 = vadd.f32 %v1905_v58, %v1904_v37 }
 0x561   :  { %3259 = vrcp.f32 %v1798_v39  ;;  %v1912_v50 = vrot.slane %v1911_v4, 4  ;;  %v1997_v7 = vsel %vm1081_vm3, %v1882_v48, %v1875_v28  ;;  %v1901_v16 = vadd.f32 %v1900_v1, %v1899_v43 }
 0x562   :  { %v1753_v25 = vrot.slane %v1752_v11, 2  ;;  %v1896_v38 = vadd.f32 %v1895_v2, %v1894_v49  ;;  %v1998_v35 = vsel %vm1083_vm4, %v1889_v45, %v1997_v7  ;;  %v1967_v26 = vsel %vm1540_vm10, %v1867_v0, 0.0 }
 0x563   :  { %v1907_v6 = vrot.slane %v1906_v5, 2  ;;  %v1913_v12 = vadd.f32 %v1912_v50, %v1911_v4  ;;  %v1955_v14 = vadd.f32 %v1954_v8, %v1953_v31  ;;  %v1902_v20 = vrot.slane %v1901_v16, 1 }
 0x564   :  { %v1754_v55 = vadd.f32 %v1753_v25, %v1752_v11  ;;  %v1999_v63 = vsel %vm1085_vm5, %v1896_v38, %v1998_v35  ;;  %v1968_v28 = vrot.slane %v1967_v26, 4 }
 0x565   :  { %v3256_v60 = vpop.eup %3255  ;;  %v1908_v3 = vadd.f32 %v1907_v6, %v1906_v5  ;;  %v1914_v57 = vrot.slane %v1913_v12, 2  ;;  %v1903_v54 = vadd.f32 %v1902_v20, %v1901_v16  ;;  %v1956_v13 = vrot.slane %v1955_v14, 2 }
 0x566   :  { %v1840_v40 = vmul.f32 %v3256_v60, %v4235_v18  ;;  %v1755_v17 = vrot.slane %v1754_v55, 1  ;;  %v1969_v11 = vadd.f32 %v1968_v28, %v1967_v26 }
 0x567   :  { %v1909_v56 = vrot.slane %v1908_v3, 1  ;;  %v1915_v37 = vadd.f32 %v1914_v57, %v1913_v12  ;;  %v2000_v32 = vsel %vm1087_vm6, %v1903_v54, %v1999_v63  ;;  %v1957_v25 = vadd.f32 %v1956_v13, %v1955_v14 }
 0x568   :  { %v1864_v62 = vmul.f32 %v4165_v9, %v1840_v40  ;;  %v1756_v24 = vadd.f32 %v1755_v17, %v1754_v55  ;;  %v1970_v38 = vrot.slane %v1969_v11, 2 }
 0x569   :  { %v1910_v48 = vadd.f32 %v1909_v56, %v1908_v3  ;;  %v1916_v39 = vrot.slane %v1915_v37, 1  ;;  %v1958_v55 = vrot.slane %v1957_v25, 1 }
 0x56a   :  { %v3258_v0 = vpop.eup %3257  ;;  %3261 = vrcp.f32 %v1756_v24  ;;  %v1946_v31 = vsel %vm1540_vm10, %v1864_v62, 0.0  ;;  %v1971_v20 = vadd.f32 %v1970_v38, %v1969_v11 }
 0x56b   :  { %v3260_v18 = vpop.eup %3259  ;;  %v1844_v45 = vmul.f32 %v3258_v0, %v4246_v41  ;;  %v1947_v49 = vrot.slane %v1946_v31, 4  ;;  %v1917_v58 = vadd.f32 %v1916_v39, %v1915_v37  ;;  %v2001_v4 = vsel %vm1089_vm7, %v1910_v48, %v2000_v32 }
 0x56c   :  { %v1842_v43 = vmul.f32 %v3260_v18, %v4249_v52  ;;  %v1959_v17 = vadd.f32 %v1958_v55, %v1957_v25  ;;  %v1972_v62 = vrot.slane %v1971_v20, 1 }
 0x56d   :  { %v1868_v8 = vmul.f32 %v4165_v9, %v1844_v45  ;;  %v1948_v2 = vadd.f32 %v1947_v49, %v1946_v31  ;;  %v2002_v5 = vsel %vm1091_vm8, %v1917_v58, %v2001_v4 }
 0x56e   :  { %v1866_v1 = vmul.f32 %v4165_v9, %v1842_v43  ;;  %v1973_v31 = vadd.f32 %v1972_v62, %v1971_v20 }
 0x56f   :  { %v1949_v50 = vrot.slane %v1948_v2, 2  ;;  %v1974_v7 = vsel %vm1540_vm10, %v1868_v8, 0.0 }
 0x570   :  { %v1960_v41 = vsel %vm1540_vm10, %v1866_v1, 0.0  ;;  %v1975_v16 = vrot.slane %v1974_v7, 4 }
 0x571   :  { %v1950_v52 = vadd.f32 %v1949_v50, %v1948_v2  ;;  %v1961_v35 = vrot.slane %v1960_v41, 4 }
 0x572   :  { %v1976_v26 = vadd.f32 %v1975_v16, %v1974_v7 }
 0x573   :  { %v1951_v6 = vrot.slane %v1950_v52, 1  ;;  %v1962_v12 = vadd.f32 %v1961_v35, %v1960_v41 }
 0x574   :  { %v3262_v60 = vpop.eup %3261  ;;  %v1977_v63 = vrot.slane %v1976_v26, 2 }
 0x575   :  { %v1952_v9 = vadd.f32 %v1951_v6, %v1950_v52  ;;  %v1963_v14 = vrot.slane %v1962_v12, 2  ;;  %v1836_v40 = vmul.f32 %v3262_v60, %v4267_v53 }
 0x576   :  { %v1978_v3 = vadd.f32 %v1977_v63, %v1976_v26 }
 0x577   :  { %v1964_v57 = vadd.f32 %v1963_v14, %v1962_v12  ;;  %v2006_v28 = vsel %vm1085_vm5, %v1952_v9, %v4260_v10  ;;  %v1860_v54 = vmul.f32 %v4185_v29, %v1836_v40  ;;  %v3133_v10 = vld [vmem:[#allocation2 + $0x20] sm:$0xff]  }
 0x578   :  { %v2007_v24 = vsel %vm1087_vm6, %v1959_v17, %v2006_v28  ;;  %v1979_v37 = vrot.slane %v1978_v3, 1  ;;  %3096 = vmatpush3.bf16.msra.mxu1 %v3133_v10 }
 0x579   :  { %v1965_v56 = vrot.slane %v1964_v57, 1  ;;  %v1918_v13 = vsel %vm1540_vm10, %v1860_v54, 0.0  ;;  %3097 = vmatprep.subr.bf16.mxu1 %v4718_v22  ;;  %v3134_v22 = vld [vmem:[#allocation2 + $0x28] sm:$0xff]  }
 0x57a   :  { %v1919_v32 = vrot.slane %v1918_v13, 4  ;;  %v1980_v53 = vadd.f32 %v1979_v37, %v1978_v3 }
 0x57b   :  { %v1966_v0 = vadd.f32 %v1965_v56, %v1964_v57 }
 0x57c   :  { %v1920_v48 = vadd.f32 %v1919_v32, %v1918_v13  ;;  %3098 = vmatpush3.bf16.msra.mxu1 %v3134_v22 }
 0x57d   :  { %v2008_v39 = vsel %vm1089_vm7, %v1966_v0, %v2007_v24 }
 0x57e   :  { %v2009_v18 = vsel %vm1091_vm8, %v1973_v31, %v2008_v39  ;;  %v1921_v45 = vrot.slane %v1920_v48, 2 }
 0x57f   :  { %v2010_v29 = vsel %vm1093_vm9, %v1980_v53, %v2009_v18 }
 0x580   :  { %2013 = vrot.lane.b32.xlu0 %v2010_v29, %s3383_s1  ;;  %v1922_v49 = vadd.f32 %v1921_v45, %v1920_v48 }
 0x582   :  { %v1923_v43 = vrot.slane %v1922_v49, 1 }
 0x584   :  { %v1924_v11 = vadd.f32 %v1923_v43, %v1922_v49 }
 0x586   :  { %v2003_v58 = vsel %vm1093_vm9, %v1924_v11, %v2002_v5  ;;  %v3009_v5 = vld [vmem:[%s4690_s6 + $0x2] ss:$0 sm:$0xff] }
 0x587   :  { %2011 = vrot.lane.b32.xlu1 %v2003_v58, %s3383_s1 }
 0x58b   :  { %2408 = vrot.lane.b32.xlu1 %v3009_v5, %s3378_s11 }
 0x5f2   :  { %v2014_v4 = vpop.permute.xlu0 %2013 }
 0x5f3   :  { %v4304_v2 = vadd.f32 %v2014_v4, %v3934_v61  ;;  %v3001_v61 = vld [vmem:[%s4687_s3 + $0x2] ss:$0 sm:$0xff]  ;;  %s3385_s3 = smov [#allocation5]  }
 0x5f4   :  { %s2945_s6 = sshll.u32 %s3385_s3, 4  ;;  %s2946_s6 = int_to_ptr.vmem [resolvable:$true] %s2945_s6 }
 0x5f5   :  { %s3351_s16 = scalar_lea.vmem %s2946_s6, 256  ;;  %p3356_p9 = scmp.lt.s32.totalorder %s2946_s6, %s2946_s6 }
 0x5f6   :  { %p3352_p8 = scmp.ne.s32.totalorder %s2946_s6, %s3351_s16  ;;  %p3357_p10 = scmp.lt.s32.totalorder %s3351_s16, %s3351_s16 }
 0x5f8   :  { %p3358_p11 = por %p3357_p10, %p3356_p9 }
 0x5f9   :  { %v2012_v8 = vpop.permute.xlu1 %2011 }
 0x5fa   :  { %v4307_v1 = vadd.f32 %v2012_v8, %v3929_v44  ;;  %p3359_p12 = pnand %p3358_p11, %p3352_p8 }
 0x5fc   :  { %v2019_v25 = vpack.c.bf16 %v4304_v2, %v4307_v1 }
 0x5fe   :  { %3092 = vmatmul.mubr.msk.bf16.vlgmr.msra.gmra.mrb[16].mxu0 %vm254_vm2, %v2019_v25 }
 0x6d1   :  { %v2082_v50 = vpop.f32.mrb[16].mxu0 }
 0x6d2   :  { %v3093_v44 = vpop.f32.mrb[17].mxu0  ;;  %v4319_v41 = vadd.f32 %v3001_v61, %v2082_v50 }
 0x6d3   :  { %v2085_v7 = vpop.f32.mrb[18].mxu0 }
 0x6d4   :  { %v4321_v38 = vadd.f32 %v3001_v61, %v2085_v7  ;;  %v3094_v16 = vpop.f32.mrb[19].mxu0 }
 0x6d6   :  { %v2089_v52 = vpack.c.bf16 %v4321_v38, %v4319_v41 }
 0x6d8   :  { %3100 = vmatmul.mubr.msk.bf16.vlgmr.msra.gmra.mrb[16].mxu1 %vm254_vm2, %v2089_v52  ;;  %v4376_v52 = vpop.permute.xlu1 %2408 }
 0x7ab   :  { %v2144_v35 = vpop.f32.mrb[16].mxu1 }
 0x7ac   :  { %v2160_v55 = vrot.slane %v2144_v35, %v3546_v46  ;;  %2379 = vrot.lane.b32.xlu1 %v2144_v35, %s3384_s30  ;;  %v3101_v26 = vpop.f32.mrb[17].mxu1  ;;  %v2153_v9 = vcombine.high %v2144_v35, %v2144_v35 }
 0x7ad   :  { %v2147_v6 = vpop.f32.mrb[18].mxu1 }
 0x7ae   :  { %v2209_v12 = vrot.slane %v2147_v6, %v3546_v46  ;;  %2381 = vrot.lane.b32.xlu0 %v2147_v6, %s3384_s30  ;;  %v3102_v60 = vpop.f32.mrb[19].mxu1  ;;  %v2176_v20 = vrot.slane %v2160_v55, %v3546_v46  ;;  %v2168_v63 = vcombine.high %v2160_v55, %v2160_v55  ;;  %v2202_v57 = vcombine.high %v2147_v6, %v2147_v6 }
 0x7af   :  { %v2167_v56 = vrot.slane %v2153_v9, %v3546_v46 }
 0x7b0   :  { %v2254_v14 = vrot.slane %v2176_v20, %v3550_v51  ;;  %v2190_v40 = vrot.slane %v2168_v63, %v3546_v46  ;;  %v2225_v17 = vrot.slane %v2209_v12, %v3546_v46  ;;  %v2217_v3 = vcombine.high %v2209_v12, %v2209_v12 }
 0x7b1   :  { %v2198_v24 = vcombine.high %v2176_v20, %v2176_v20  ;;  %v2216_v32 = vrot.slane %v2202_v57, %v3546_v46  ;;  %v2183_v31 = vrot.slane %v2167_v56, %v3546_v46  ;;  %v2169_v45 = vcombine.high %v2167_v56, %v2167_v56 }
 0x7b2   :  { %2315 = vrot.lane.b32.xlu1 %v2254_v14, %s3378_s11  ;;  %v2258_v28 = vrot.slane %v2190_v40, %v3550_v51  ;;  %v2239_v54 = vrot.slane %v2217_v3, %v3546_v46  ;;  %v2286_v62 = vrot.slane %v2225_v17, %v3550_v51  ;;  %v2247_v13 = vcombine.high %v2225_v17, %v2225_v17 }
 0x7b3   :  { %v2262_v0 = vrot.slane %v2198_v24, %v3550_v51  ;;  %v2232_v53 = vrot.slane %v2216_v32, %v3546_v46  ;;  %v2270_v39 = vrot.slane %v2183_v31, %v3550_v51  ;;  %v2200_v18 = vcombine.high %v2190_v40, %v2190_v40 }
 0x7b4   :  { %2317 = vrot.lane.b32.xlu0 %v2258_v28, %s3378_s11  ;;  %v2290_v37 = vrot.slane %v2239_v54, %v3550_v51  ;;  %v2294_v48 = vrot.slane %v2247_v13, %v3550_v51  ;;  %v2199_v29 = vcombine.high %v2183_v31, %v2183_v31  ;;  %v2197_v43 = vrot.slane %v2169_v45, %v3546_v46 }
 0x7b5   :  { %v2302_v10 = vrot.slane %v2232_v53, %v3550_v51  ;;  %v2266_v49 = vrot.slane %v2200_v18, %v3550_v51  ;;  %v2218_v11 = vcombine.high %v2216_v32, %v2216_v32  ;;  %v2249_v4 = vcombine.high %v2239_v54, %v2239_v54 }
 0x7b6   :  { %2331 = vrot.lane.b32.xlu1 %v2286_v62, %s3378_s11  ;;  %v2278_v58 = vrot.slane %v2199_v29, %v3550_v51  ;;  %v2274_v8 = vrot.slane %v2197_v43, %v3550_v51  ;;  %v2248_v25 = vcombine.high %v2232_v53, %v2232_v53  ;;  %v2201_v7 = vcombine.high %v2197_v43, %v2197_v43 }
 0x7b7   :  { %v2246_v22 = vrot.slane %v2218_v11, %v3546_v46  ;;  %v2298_v5 = vrot.slane %v2249_v4, %v3550_v51 }
 0x7b8   :  { %2333 = vrot.lane.b32.xlu0 %v2290_v37, %s3378_s11  ;;  %v2310_v61 = vrot.slane %v2248_v25, %v3550_v51  ;;  %v2282_v46 = vrot.slane %v2201_v7, %v3550_v51 }
 0x7b9   :  { %v2250_v50 = vcombine.high %v2246_v22, %v2246_v22  ;;  %v2306_v44 = vrot.slane %v2246_v22, %v3550_v51 }
 0x7ba   :  { %2319 = vrot.lane.b32.xlu1 %v2262_v0, %s3378_s11 }
 0x7bb   :  { %v2314_v16 = vrot.slane %v2250_v50, %v3550_v51 }
 0x7bc   :  { %2335 = vrot.lane.b32.xlu0 %v2294_v48, %s3378_s11 }
 0x7be   :  { %2323 = vrot.lane.b32.xlu1 %v2270_v39, %s3378_s11 }
 0x7c0   :  { %2339 = vrot.lane.b32.xlu0 %v2302_v10, %s3378_s11 }
 0x7c2   :  { %2321 = vrot.lane.b32.xlu1 %v2266_v49, %s3378_s11 }
 0x7c4   :  { %2327 = vrot.lane.b32.xlu0 %v2278_v58, %s3378_s11 }
 0x7c6   :  { %2325 = vrot.lane.b32.xlu1 %v2274_v8, %s3378_s11 }
 0x7c8   :  { %2337 = vrot.lane.b32.xlu0 %v2298_v5, %s3378_s11 }
 0x7ca   :  { %2343 = vrot.lane.b32.xlu1 %v2310_v61, %s3378_s11 }
 0x7cc   :  { %2341 = vrot.lane.b32.xlu0 %v2306_v44, %s3378_s11 }
 0x7ce   :  { %2345 = vrot.lane.b32.xlu1 %v2314_v16, %s3378_s11 }
 0x7d0   :  { %2329 = vrot.lane.b32.xlu0 %v2282_v46, %s3378_s11 }
 0x7d2   :  { %2768 = vrot.lane.b32.xlu1 %v4321_v38, %s3378_s11 }
 0x7d4   :  { %2766 = vrot.lane.b32.xlu0 %v4319_v41, %s3378_s11 }
 0x81e   :  { %v4378_v35 = vpop.permute.xlu1 %2379 }
 0x820   :  { %v4380_v55 = vpop.permute.xlu0 %2381 }
 0x824   :  { %v2316_v26 = vpop.permute.xlu1 %2315 }
 0x825   :  { %v2363_v6 = vadd.f32 %v2316_v26, %v3507_v21 }
 0x826   :  { %v2318_v12 = vpop.permute.xlu0 %2317 }
 0x827   :  { %v2385_v51 = vadd.f32 %v4378_v35, %v2363_v6  ;;  %v2364_v60 = vadd.f32 %v2318_v12, %v3515_v27 }
 0x828   :  { %v2332_v20 = vpop.permute.xlu1 %2331 }
 0x829   :  { %v2411_v38 = vadd.f32 %v4376_v52, %v2385_v51  ;;  %v2386_v63 = vadd.f32 %v4378_v35, %v2364_v60  ;;  %v2371_v41 = vadd.f32 %v2332_v20, %v3532_v34 }
 0x82a   :  { %v2334_v9 = vpop.permute.xlu0 %2333 }
 0x82b   :  { %v2427_v14 = vmul.f32 0.2, %v2411_v38  ;;  %v2412_v40 = vadd.f32 %v4376_v52, %v2386_v63  ;;  %v2393_v17 = vadd.f32 %v4380_v55, %v2371_v41  ;;  %v2372_v21 = vadd.f32 %v2334_v9, %v3536_v36 }
 0x82c   :  { %v2320_v3 = vpop.permute.xlu1 %2319 }
 0x82d   :  { %v4391_v57 = vmax.f32 %v2411_v38, %v2427_v14  ;;  %v2428_v27 = vmul.f32 0.2, %v2412_v40  ;;  %v2419_v28 = vadd.f32 %v4376_v52, %v2393_v17  ;;  %v2394_v54 = vadd.f32 %v4380_v55, %v2372_v21 }
 0x82e   :  { %v2365_v62 = vadd.f32 %v3505_v19, %v2320_v3  ;;  %v2336_v34 = vpop.permute.xlu0 %2335 }
 0x82f   :  { %v2460_v24 = vsel %vm2459_vm11, %v4391_v57, -inf  ;;  %v4398_v56 = vmax.f32 %v2412_v40, %v2428_v27  ;;  %v2435_v37 = vmul.f32 0.2, %v2419_v28  ;;  %v2420_v36 = vadd.f32 %v4376_v52, %v2394_v54 }
 0x830   :  { %v2461_v13 = vrot.slane %v2460_v24, 4  ;;  %v2387_v32 = vadd.f32 %v4378_v35, %v2365_v62  ;;  %v2373_v0 = vadd.f32 %v3530_v33, %v2336_v34  ;;  %v2324_v31 = vpop.permute.xlu1 %2323 }
 0x831   :  { %v2467_v48 = vsel %vm2459_vm11, %v4398_v56, -inf  ;;  %v4405_v53 = vmax.f32 %v2419_v28, %v2435_v37  ;;  %v2436_v19 = vmul.f32 0.2, %v2420_v36  ;;  %v2367_v39 = vadd.f32 %v2324_v31, %v3524_v30 }
 0x832   :  { %v2462_v18 = vmax.f32 %v2460_v24, %v2461_v13  ;;  %v2468_v45 = vrot.slane %v2467_v48, 4  ;;  %v2413_v10 = vadd.f32 %v4376_v52, %v2387_v32  ;;  %v2395_v29 = vadd.f32 %v4380_v55, %v2373_v0  ;;  %v2340_v49 = vpop.permute.xlu0 %2339 }
 0x833   :  { %v2516_v43 = vsel %vm2459_vm11, %v4405_v53, -inf  ;;  %v4412_v33 = vmax.f32 %v2420_v36, %v2436_v19  ;;  %v2389_v11 = vadd.f32 %v4378_v35, %v2367_v39  ;;  %v2375_v58 = vadd.f32 %v2340_v49, %v4719_v42 }
 0x834   :  { %v2463_v4 = vrot.slane %v2462_v18, 2  ;;  %v2469_v8 = vmax.f32 %v2467_v48, %v2468_v45  ;;  %v2517_v25 = vrot.slane %v2516_v43, 4  ;;  %v2429_v30 = vmul.f32 0.2, %v2413_v10  ;;  %v2322_v48 = vpop.permute.xlu1 %2321 }
 0x835   :  { %v2523_v22 = vsel %vm2459_vm11, %v4412_v33, -inf  ;;  %v2421_v5 = vadd.f32 %v4376_v52, %v2395_v29  ;;  %v2415_v61 = vadd.f32 %v4376_v52, %v2389_v11  ;;  %v2397_v50 = vadd.f32 %v4380_v55, %v2375_v58 }
 0x836   :  { %v2464_v44 = vmax.f32 %v2462_v18, %v2463_v4  ;;  %v2470_v7 = vrot.slane %v2469_v8, 2  ;;  %v2518_v16 = vmax.f32 %v2516_v43, %v2517_v25  ;;  %v2524_v46 = vrot.slane %v2523_v22, 4 }
 0x837   :  { %v4421_v26 = vmax.f32 %v2413_v10, %v2429_v30  ;;  %v2437_v42 = vmul.f32 0.2, %v2421_v5  ;;  %v2431_v6 = vmul.f32 0.2, %v2415_v61  ;;  %v2423_v12 = vadd.f32 %v4376_v52, %v2397_v50 }
 0x838   :  { %v2465_v51 = vrot.slane %v2464_v44, 1  ;;  %v2471_v60 = vmax.f32 %v2469_v8, %v2470_v7  ;;  %v2519_v20 = vrot.slane %v2518_v16, 2  ;;  %v2525_v38 = vmax.f32 %v2523_v22, %v2524_v46  ;;  %v2326_v46 = vpop.permute.xlu1 %2325 }
 0x839   :  { %v2474_v63 = vsel %vm2459_vm11, %v4421_v26, -inf  ;;  %v4426_v41 = vmax.f32 %v2421_v5, %v2437_v42  ;;  %v4428_v9 = vmax.f32 %v2415_v61, %v2431_v6  ;;  %v2439_v14 = vmul.f32 0.2, %v2423_v12 }
 0x83a   :  { %v2466_v40 = vmax.f32 %v2464_v44, %v2465_v51  ;;  %v2472_v17 = vrot.slane %v2471_v60, 1  ;;  %v2520_v21 = vmax.f32 %v2518_v16, %v2519_v20  ;;  %v2526_v3 = vrot.slane %v2525_v38, 2 }
 0x83b   :  { %v2475_v27 = vrot.slane %v2474_v63, 4  ;;  %v2530_v28 = vsel %vm2459_vm11, %v4426_v41, -inf  ;;  %v2488_v54 = vsel %vm2459_vm11, %v4428_v9, -inf  ;;  %v4434_v62 = vmax.f32 %v2423_v12, %v2439_v14 }
 0x83c   :  { %v2572_v34 = vsub.f32 %v4391_v57, %v2466_v40  ;;  %v2473_v24 = vmax.f32 %v2471_v60, %v2472_v17  ;;  %v2521_v37 = vrot.slane %v2520_v21, 1  ;;  %v2527_v36 = vmax.f32 %v2525_v38, %v2526_v3  ;;  %v2328_v57 = vpop.permute.xlu0 %2327 }
 0x83d   :  { %v2476_v13 = vmax.f32 %v2474_v63, %v2475_v27  ;;  %v2531_v32 = vrot.slane %v2530_v28, 4  ;;  %v2489_v0 = vrot.slane %v2488_v54, 4  ;;  %v2544_v31 = vsel %vm2459_vm11, %v4434_v62, -inf }
 0x83e   :  { %v2588_v19 = vmul.f32 1.442695, %v2572_v34  ;;  %v2573_v39 = vsub.f32 %v4398_v56, %v2473_v24  ;;  %v2522_v18 = vmax.f32 %v2520_v21, %v2521_v37  ;;  %v2528_v45 = vrot.slane %v2527_v36, 1 }
 0x83f   :  { %v2477_v10 = vrot.slane %v2476_v13, 2  ;;  %v2532_v29 = vmax.f32 %v2530_v28, %v2531_v32  ;;  %v2490_v49 = vmax.f32 %v2488_v54, %v2489_v0  ;;  %v2545_v43 = vrot.slane %v2544_v31, 4 }
 0x840   :  { %3263 = vpow2.f32 %v2588_v19  ;;  %v2590_v11 = vmul.f32 1.442695, %v2573_v39  ;;  %v2580_v58 = vsub.f32 %v4405_v53, %v2522_v18  ;;  %v2529_v4 = vmax.f32 %v2527_v36, %v2528_v45  ;;  %v2338_v38 = vpop.permute.xlu0 %2337 }
 0x841   :  { %v2478_v8 = vmax.f32 %v2476_v13, %v2477_v10  ;;  %v2533_v25 = vrot.slane %v2532_v29, 2  ;;  %v2491_v30 = vrot.slane %v2490_v49, 2  ;;  %v2546_v22 = vmax.f32 %v2544_v31, %v2545_v43 }
 0x842   :  { %3265 = vpow2.f32 %v2590_v11  ;;  %v2604_v5 = vmul.f32 1.442695, %v2580_v58  ;;  %v2581_v56 = vsub.f32 %v4412_v33, %v2529_v4  ;;  %v2366_v61 = vadd.f32 %v3509_v23, %v2322_v48 }
 0x843   :  { %v2479_v50 = vrot.slane %v2478_v8, 1  ;;  %v2534_v44 = vmax.f32 %v2532_v29, %v2533_v25  ;;  %v2492_v7 = vmax.f32 %v2490_v49, %v2491_v30  ;;  %v2547_v16 = vrot.slane %v2546_v22, 2 }
 0x844   :  { %3267 = vpow2.f32 %v2604_v5  ;;  %v2606_v42 = vmul.f32 1.442695, %v2581_v56  ;;  %v2388_v53 = vadd.f32 %v4378_v35, %v2366_v61  ;;  %v2369_v6 = vadd.f32 %v4721_v59, %v2328_v57 }
 0x845   :  { %v2480_v12 = vmax.f32 %v2478_v8, %v2479_v50  ;;  %v2535_v51 = vrot.slane %v2534_v44, 1  ;;  %v2493_v60 = vrot.slane %v2492_v7, 1  ;;  %v2548_v20 = vmax.f32 %v2546_v22, %v2547_v16 }
 0x846   :  { %3269 = vpow2.f32 %v2606_v42  ;;  %v2414_v33 = vadd.f32 %v4376_v52, %v2388_v53  ;;  %v2391_v23 = vadd.f32 %v4378_v35, %v2369_v6  ;;  %v2368_v63 = vadd.f32 %v2326_v46, %v4720_v47 }
 0x847   :  { %v2574_v14 = vsub.f32 %v4421_v26, %v2480_v12  ;;  %v2536_v40 = vmax.f32 %v2534_v44, %v2535_v51  ;;  %v2494_v17 = vmax.f32 %v2492_v7, %v2493_v60  ;;  %v2549_v21 = vrot.slane %v2548_v20, 1 }
 0x848   :  { %v2430_v3 = vmul.f32 0.2, %v2414_v33  ;;  %v2417_v59 = vadd.f32 %v4376_v52, %v2391_v23  ;;  %v2390_v27 = vadd.f32 %v4378_v35, %v2368_v63  ;;  %v2374_v28 = vadd.f32 %v4723_v15, %v2338_v38 }
 0x849   :  { %v2592_v54 = vmul.f32 1.442695, %v2574_v14  ;;  %v2582_v34 = vsub.f32 %v4426_v41, %v2536_v40  ;;  %v2576_v24 = vsub.f32 %v4428_v9, %v2494_v17  ;;  %v2550_v37 = vmax.f32 %v2548_v20, %v2549_v21 }
 0x84a   :  { %v4454_v36 = vpop.eup %3263  ;;  %v4456_v47 = vmax.f32 %v2414_v33, %v2430_v3  ;;  %v2433_v26 = vmul.f32 0.2, %v2417_v59  ;;  %v2416_v13 = vadd.f32 %v4376_v52, %v2390_v27  ;;  %v2396_v32 = vadd.f32 %v4380_v55, %v2374_v28 }
 0x84b   :  { %v2620_v0 = vsel %vm2459_vm11, %v4454_v36, 0.0  ;;  %3271 = vpow2.f32 %v2592_v54  ;;  %v2608_v15 = vmul.f32 1.442695, %v2582_v34  ;;  %v2596_v31 = vmul.f32 1.442695, %v2576_v24 }
 0x84c   :  { %v4462_v48 = vpop.eup %3265  ;;  %v2621_v41 = vrot.slane %v2620_v0, 4  ;;  %v2584_v9 = vsub.f32 %v4434_v62, %v2550_v37  ;;  %v2481_v19 = vsel %vm2459_vm11, %v4456_v47, -inf  ;;  %v4467_v39 = vmax.f32 %v2417_v59, %v2433_v26 }
 0x84d   :  { %v2627_v18 = vsel %vm2459_vm11, %v4462_v48, 0.0  ;;  %3273 = vpow2.f32 %v2608_v15  ;;  %v2482_v45 = vrot.slane %v2481_v19, 4  ;;  %v2432_v10 = vmul.f32 0.2, %v2416_v13 }
 0x84e   :  { %v4471_v29 = vpop.eup %3267  ;;  %v2622_v49 = vadd.f32 %v2621_v41, %v2620_v0  ;;  %v2628_v43 = vrot.slane %v2627_v18, 4  ;;  %3275 = vpow2.f32 %v2596_v31  ;;  %v2612_v57 = vmul.f32 1.442695, %v2584_v9 }
 0x84f   :  { %v2676_v62 = vsel %vm2459_vm11, %v4471_v29, 0.0  ;;  %v2483_v11 = vmax.f32 %v2481_v19, %v2482_v45  ;;  %v2502_v58 = vsel %vm2459_vm11, %v4467_v39, -inf  ;;  %v4477_v4 = vmax.f32 %v2416_v13, %v2432_v10 }
 0x850   :  { %v4479_v8 = vpop.eup %3269  ;;  %v2623_v25 = vrot.slane %v2622_v49, 2  ;;  %v2629_v30 = vadd.f32 %v2628_v43, %v2627_v18  ;;  %v2677_v22 = vrot.slane %v2676_v62, 4  ;;  %3277 = vpow2.f32 %v2612_v57 }
 0x851   :  { %v2683_v5 = vsel %vm2459_vm11, %v4479_v8, 0.0  ;;  %v2484_v56 = vrot.slane %v2483_v11, 2  ;;  %v2503_v61 = vrot.slane %v2502_v58, 4  ;;  %v2495_v50 = vsel %vm2459_vm11, %v4477_v4, -inf }
 0x852   :  { %v2624_v44 = vadd.f32 %v2623_v25, %v2622_v49  ;;  %v2630_v7 = vrot.slane %v2629_v30, 2  ;;  %v2678_v16 = vadd.f32 %v2677_v22, %v2676_v62  ;;  %v2684_v46 = vrot.slane %v2683_v5, 4  ;;  %v2344_v22 = vpop.permute.xlu1 %2343 }
 0x853   :  { %v2485_v42 = vmax.f32 %v2483_v11, %v2484_v56  ;;  %v2504_v53 = vmax.f32 %v2502_v58, %v2503_v61  ;;  %v2496_v6 = vrot.slane %v2495_v50, 4  ;;  %v2422_v12 = vadd.f32 %v4376_v52, %v2396_v32 }
 0x854   :  { %v2625_v51 = vrot.slane %v2624_v44, 1  ;;  %v2631_v60 = vadd.f32 %v2630_v7, %v2629_v30  ;;  %v2679_v20 = vrot.slane %v2678_v16, 2  ;;  %v2685_v38 = vadd.f32 %v2684_v46, %v2683_v5 }
 0x855   :  { %v4486_v33 = vpop.eup %3271  ;;  %v2486_v23 = vrot.slane %v2485_v42, 1  ;;  %v2505_v63 = vrot.slane %v2504_v53, 2  ;;  %v2497_v14 = vmax.f32 %v2495_v50, %v2496_v6  ;;  %v2438_v40 = vmul.f32 0.2, %v2422_v12  ;;  %v4727_v6 = vld [vmem:[#allocation12_spill] sm:$0xff] }
 0x856   :  { %v2626_v17 = vadd.f32 %v2625_v51, %v2624_v44  ;;  %v2632_v21 = vrot.slane %v2631_v60, 1  ;;  %v2680_v3 = vadd.f32 %v2679_v20, %v2678_v16  ;;  %v2686_v59 = vrot.slane %v2685_v38, 2 }
 0x857   :  { %v4488_v27 = vpop.eup %3273  ;;  %v2634_v28 = vsel %vm2459_vm11, %v4486_v33, 0.0  ;;  %v2487_v54 = vmax.f32 %v2485_v42, %v2486_v23  ;;  %v2506_v34 = vmax.f32 %v2504_v53, %v2505_v63  ;;  %v2498_v24 = vrot.slane %v2497_v14, 2 }
 0x858   :  { %v4492_v37 = vpop.eup %3275  ;;  %3279 = vrcp.f32 %v2626_v17  ;;  %v2633_v26 = vadd.f32 %v2632_v21, %v2631_v60  ;;  %v2681_v13 = vrot.slane %v2680_v3, 1  ;;  %v2687_v32 = vadd.f32 %v2686_v59, %v2685_v38  ;;  %v2342_v59 = vpop.permute.xlu0 %2341 }
 0x859   :  { %v2635_v0 = vrot.slane %v2634_v28, 4  ;;  %v2690_v15 = vsel %vm2459_vm11, %v4488_v27, 0.0  ;;  %v2648_v31 = vsel %vm2459_vm11, %v4492_v37, 0.0  ;;  %v2575_v41 = vsub.f32 %v4456_v47, %v2487_v54 }
 0x85a   :  { %v4499_v9 = vpop.eup %3277  ;;  %3281 = vrcp.f32 %v2633_v26  ;;  %v2682_v19 = vadd.f32 %v2681_v13, %v2680_v3  ;;  %v2688_v18 = vrot.slane %v2687_v32, 1  ;;  %v2691_v45 = vrot.slane %v2690_v15, 4  ;;  %v2346_v13 = vpop.permute.xlu1 %2345 }
 0x85b   :  { %v2636_v10 = vadd.f32 %v2635_v0, %v2634_v28  ;;  %v2649_v49 = vrot.slane %v2648_v31, 4  ;;  %v2704_v43 = vsel %vm2459_vm11, %v4499_v9, 0.0  ;;  %v2594_v57 = vmul.f32 1.442695, %v2575_v41 }
 0x85c   :  { %3283 = vrcp.f32 %v2682_v19  ;;  %v2689_v62 = vadd.f32 %v2688_v18, %v2687_v32  ;;  %v2692_v11 = vadd.f32 %v2691_v45, %v2690_v15  ;;  %v2705_v58 = vrot.slane %v2704_v43, 4 }
 0x85d   :  { %v2637_v25 = vrot.slane %v2636_v10, 2  ;;  %v2650_v30 = vadd.f32 %v2649_v49, %v2648_v31  ;;  %3285 = vpow2.f32 %v2594_v57  ;;  %v2507_v47 = vrot.slane %v2506_v34, 1 }
 0x85e   :  { %3287 = vrcp.f32 %v2689_v62  ;;  %v2693_v5 = vrot.slane %v2692_v11, 2  ;;  %v2706_v56 = vadd.f32 %v2705_v58, %v2704_v43  ;;  %v2499_v61 = vmax.f32 %v2497_v14, %v2498_v24 }
 0x85f   :  { %v2638_v50 = vadd.f32 %v2637_v25, %v2636_v10  ;;  %v2651_v44 = vrot.slane %v2650_v30, 2  ;;  %v2508_v7 = vmax.f32 %v2506_v34, %v2507_v47  ;;  %v4503_v16 = vmax.f32 %v2422_v12, %v2438_v40  ;;  %v2330_v25 = vpop.permute.xlu0 %2329 }
 0x860   :  { %v2694_v46 = vadd.f32 %v2693_v5, %v2692_v11  ;;  %v2707_v42 = vrot.slane %v2706_v56, 2  ;;  %v2500_v53 = vrot.slane %v2499_v61, 1  ;;  %v2377_v51 = vadd.f32 %v4727_v6, %v2344_v22  ;;  %v4729_v11 = vld [vmem:[#allocation14_spill] sm:$0xff] }
 0x861   :  { %v2639_v60 = vrot.slane %v2638_v50, 1  ;;  %v2652_v20 = vadd.f32 %v2651_v44, %v2650_v30  ;;  %v2578_v38 = vsub.f32 %v4467_v39, %v2508_v7  ;;  %v2537_v23 = vsel %vm2459_vm11, %v4503_v16, -inf  ;;  %v4730_v7 = vld [vmem:[#allocation9_spill] sm:$0xff] }
 0x862   :  { %v3280_v63 = vpop.eup %3279  ;;  %v2695_v17 = vrot.slane %v2694_v46, 1  ;;  %v2708_v14 = vadd.f32 %v2707_v42, %v2706_v56  ;;  %v2501_v21 = vmax.f32 %v2499_v61, %v2500_v53  ;;  %v2538_v3 = vrot.slane %v2537_v23, 4  ;;  %v4522_v61 = vpop.permute.xlu1 %2768 }
 0x863   :  { %v2640_v12 = vadd.f32 %v2639_v60, %v2638_v50  ;;  %v2653_v40 = vrot.slane %v2652_v20, 1  ;;  %v2600_v32 = vmul.f32 1.442695, %v2578_v38  ;;  %v2399_v0 = vadd.f32 %v4380_v55, %v2377_v51 }
 0x864   :  { %v3282_v28 = vpop.eup %3281  ;;  %v2696_v54 = vadd.f32 %v2695_v17, %v2694_v46  ;;  %v2709_v34 = vrot.slane %v2708_v14, 1  ;;  %v2577_v24 = vsub.f32 %v4477_v4, %v2501_v21  ;;  %v2539_v26 = vmax.f32 %v2537_v23, %v2538_v3  ;;  %v4728_v4 = vld [vmem:[#allocation15_spill] sm:$0xff] }
 0x865   :  { %3289 = vrcp.f32 %v2640_v12  ;;  %v2654_v39 = vadd.f32 %v2653_v40, %v2652_v20  ;;  %v2425_v10 = vadd.f32 %v4376_v52, %v2399_v0  ;;  %v2376_v49 = vadd.f32 %v2342_v59, %v4728_v4 }
 0x866   :  { %v3284_v15 = vpop.eup %3283  ;;  %3291 = vrcp.f32 %v2696_v54  ;;  %v2710_v31 = vadd.f32 %v2709_v34, %v2708_v14  ;;  %v2598_v41 = vmul.f32 1.442695, %v2577_v24  ;;  %v2540_v19 = vrot.slane %v2539_v26, 2 }
 0x867   :  { %v4511_v18 = vpop.eup %3285  ;;  %v2756_v45 = vmul.f32 %v3284_v15, %v4471_v29  ;;  %3293 = vrcp.f32 %v2654_v39  ;;  %v2378_v58 = vadd.f32 %v4729_v11, %v2346_v13  ;;  %v2441_v22 = vmul.f32 0.2, %v2425_v10 }
 0x868   :  { %v3288_v43 = vpop.eup %3287  ;;  %3295 = vrcp.f32 %v2710_v31  ;;  %v2641_v57 = vsel %vm2459_vm11, %v4511_v18, 0.0  ;;  %v2541_v62 = vmax.f32 %v2539_v26, %v2540_v19  ;;  %v2398_v5 = vadd.f32 %v4380_v55, %v2376_v49 }
 0x869   :  { %v2757_v30 = vmul.f32 %v3288_v43, %v4479_v8  ;;  %v2642_v47 = vrot.slane %v2641_v57, 4  ;;  %3297 = vpow2.f32 %v2600_v32  ;;  %v2400_v56 = vadd.f32 %v4380_v55, %v2378_v58 }
 0x86a   :  { %3299 = vpow2.f32 %v2598_v41  ;;  %v2542_v29 = vrot.slane %v2541_v62, 1  ;;  %v4524_v44 = vmax.f32 %v2425_v10, %v2441_v22  ;;  %v2370_v46 = vadd.f32 %v4730_v7, %v2330_v25 }
 0x86b   :  { %v2643_v50 = vadd.f32 %v2642_v47, %v2641_v57  ;;  %v2780_v42 = vmul.f32 %v4522_v61, %v2756_v45  ;;  %v2424_v8 = vadd.f32 %v4376_v52, %v2398_v5  ;;  %v2426_v6 = vadd.f32 %v4376_v52, %v2400_v56 }
 0x86c   :  { %v2543_v53 = vmax.f32 %v2541_v62, %v2542_v29  ;;  %v2781_v51 = vmul.f32 %v4522_v61, %v2757_v30  ;;  %v2558_v55 = vsel %vm2459_vm11, %v4524_v44, -inf  ;;  %v2392_v20 = vadd.f32 %v4378_v35, %v2370_v46 }
 0x86d   :  { %v2644_v60 = vrot.slane %v2643_v50, 2  ;;  %v4535_v38 = vsel %vm2459_vm11, %v2780_v42, 0.0  ;;  %v2559_v17 = vrot.slane %v2558_v55, 4  ;;  %v2440_v14 = vmul.f32 0.2, %v2424_v8 }
 0x86e   :  { %v2583_v23 = vsub.f32 %v4503_v16, %v2543_v53  ;;  %v2442_v21 = vmul.f32 0.2, %v2426_v6  ;;  %v2748_v59 = vmul.f32 %v3280_v63, %v4454_v36  ;;  %v2749_v12 = vmul.f32 %v3282_v28, %v4462_v48 }
 0x86f   :  { %v3290_v3 = vpop.eup %3289  ;;  %v2645_v40 = vadd.f32 %v2644_v60, %v2643_v50  ;;  %v2418_v54 = vadd.f32 %v4376_v52, %v2392_v20  ;;  %v2560_v26 = vmax.f32 %v2558_v55, %v2559_v17  ;;  %v4541_v35 = vmax.f32 %v2424_v8, %v2440_v14  ;;  %v4576_v20 = vpop.permute.xlu0 %2766 }
 0x870   :  { %v3292_v34 = vpop.eup %3291  ;;  %v2610_v24 = vmul.f32 1.442695, %v2583_v23  ;;  %v2845_v13 = vrot.slane %v4535_v38, 4  ;;  %v4544_v32 = vmax.f32 %v2426_v6, %v2442_v21  ;;  %v4547_v15 = vsel %vm2459_vm11, %v2781_v51, 0.0 }
 0x871   :  { %v3294_v39 = vpop.eup %3293  ;;  %v2646_v16 = vrot.slane %v2645_v40, 1  ;;  %v2434_v0 = vmul.f32 0.2, %v2418_v54  ;;  %v4550_v48 = vmul.f32 %v3290_v3, %v4486_v33  ;;  %v2561_v52 = vrot.slane %v2560_v26, 2 }
 0x872   :  { %v3296_v36 = vpop.eup %3295  ;;  %3301 = vpow2.f32 %v2610_v24  ;;  %v2551_v63 = vsel %vm2459_vm11, %v4541_v35, -inf  ;;  %v2758_v31 = vmul.f32 %v3292_v34, %v4488_v27  ;;  %v2565_v45 = vsel %vm2459_vm11, %v4544_v32, -inf }
 0x873   :  { %v4554_v28 = vpop.eup %3297  ;;  %v2647_v41 = vadd.f32 %v2646_v16, %v2645_v40  ;;  %v2552_v19 = vrot.slane %v2551_v63, 4  ;;  %v2562_v4 = vmax.f32 %v2560_v26, %v2561_v52  ;;  %v2566_v49 = vrot.slane %v2565_v45, 4 }
 0x874   :  { %v4559_v10 = vpop.eup %3299  ;;  %v2662_v33 = vsel %vm2459_vm11, %v4554_v28, 0.0  ;;  %v4563_v43 = vmax.f32 %v2418_v54, %v2434_v0  ;;  %v4566_v57 = vmul.f32 %v3294_v39, %v4492_v37  ;;  %v2760_v22 = vmul.f32 %v3296_v36, %v4499_v9 }
 0x875   :  { %v2663_v62 = vrot.slane %v2662_v33, 4  ;;  %v2655_v27 = vsel %vm2459_vm11, %v4559_v10, 0.0  ;;  %v2553_v11 = vmax.f32 %v2551_v63, %v2552_v19  ;;  %v2563_v25 = vrot.slane %v2562_v4, 1 }
 0x876   :  { %v2656_v58 = vrot.slane %v2655_v27, 4  ;;  %v2567_v30 = vmax.f32 %v2565_v45, %v2566_v49  ;;  %v2509_v47 = vsel %vm2459_vm11, %v4563_v43, -inf  ;;  %3303 = vrcp.f32 %v2647_v41 }
 0x877   :  { %v2664_v29 = vadd.f32 %v2663_v62, %v2662_v33  ;;  %v2554_v5 = vrot.slane %v2553_v11, 2  ;;  %v2510_v56 = vrot.slane %v2509_v47, 4  ;;  %v2564_v37 = vmax.f32 %v2562_v4, %v2563_v25 }
 0x878   :  { %v2657_v50 = vadd.f32 %v2656_v58, %v2655_v27  ;;  %v2568_v7 = vrot.slane %v2567_v30, 2  ;;  %v2782_v8 = vmul.f32 %v4522_v61, %v2758_v31  ;;  %v2852_v55 = vrot.slane %v4547_v15, 4 }
 0x879   :  { %v2665_v46 = vrot.slane %v2664_v29, 2  ;;  %v2555_v42 = vmax.f32 %v2553_v11, %v2554_v5  ;;  %v2511_v53 = vmax.f32 %v2509_v47, %v2510_v56  ;;  %v2586_v51 = vsub.f32 %v4524_v44, %v2564_v37 }
 0x87a   :  { %v2658_v6 = vrot.slane %v2657_v50, 2  ;;  %v2569_v60 = vmax.f32 %v2567_v30, %v2568_v7  ;;  %v2772_v14 = vmul.f32 %v4576_v20, %v2748_v59  ;;  %v2773_v34 = vmul.f32 %v4576_v20, %v2749_v12 }
 0x87b   :  { %v2666_v9 = vadd.f32 %v2665_v46, %v2664_v29  ;;  %v2556_v23 = vrot.slane %v2555_v42, 1  ;;  %v2512_v17 = vrot.slane %v2511_v53, 2  ;;  %v2616_v40 = vmul.f32 1.442695, %v2586_v51 }
 0x87c   :  { %v4579_v21 = vpop.eup %3301  ;;  %v2659_v3 = vadd.f32 %v2658_v6, %v2657_v50  ;;  %v2570_v54 = vrot.slane %v2569_v60, 1  ;;  %v2788_v31 = vsel %vm2459_vm11, %v2772_v14, 0.0  ;;  %v4589_v45 = vmul.f32 %v4576_v20, %v4550_v48 }
 0x87d   :  { %v2667_v24 = vrot.slane %v2666_v9, 1  ;;  %v2697_v44 = vsel %vm2459_vm11, %v4579_v21, 0.0  ;;  %v2557_v26 = vmax.f32 %v2555_v42, %v2556_v23  ;;  %v2513_v39 = vmax.f32 %v2511_v53, %v2512_v17 }
 0x87e   :  { %v2660_v16 = vrot.slane %v2659_v3, 1  ;;  %v2698_v0 = vrot.slane %v2697_v44, 4  ;;  %3305 = vpow2.f32 %v2616_v40  ;;  %v2571_v36 = vmax.f32 %v2569_v60, %v2570_v54 }
 0x87f   :  { %v2668_v52 = vadd.f32 %v2667_v24, %v2666_v9  ;;  %v2585_v59 = vsub.f32 %v4541_v35, %v2557_v26  ;;  %v2514_v63 = vrot.slane %v2513_v39, 1  ;;  %v2795_v49 = vsel %vm2459_vm11, %v2773_v34, 0.0 }
 0x880   :  { %v2661_v41 = vadd.f32 %v2660_v16, %v2659_v3  ;;  %v2699_v19 = vadd.f32 %v2698_v0, %v2697_v44  ;;  %v2587_v12 = vsub.f32 %v4544_v32, %v2571_v36  ;;  %v3304_v62 = vpop.eup %3303  ;;  %v2789_v11 = vrot.slane %v2788_v31, 4 }
 0x881   :  { %3307 = vrcp.f32 %v2668_v52  ;;  %v2614_v33 = vmul.f32 1.442695, %v2585_v59  ;;  %v2515_v4 = vmax.f32 %v2513_v39, %v2514_v63  ;;  %v2796_v25 = vrot.slane %v2795_v49, 4 }
 0x882   :  { %3309 = vrcp.f32 %v2661_v41  ;;  %v2700_v27 = vrot.slane %v2699_v19, 2  ;;  %v2618_v35 = vmul.f32 1.442695, %v2587_v12  ;;  %v2784_v32 = vmul.f32 %v4522_v61, %v2760_v22 }
 0x883   :  { %3311 = vpow2.f32 %v2614_v33  ;;  %v2579_v58 = vsub.f32 %v4563_v43, %v2515_v4  ;;  %v2846_v48 = vadd.f32 %v2845_v13, %v4535_v38  ;;  %v2853_v47 = vadd.f32 %v2852_v55, %v4547_v15 }
 0x884   :  { %v2701_v30 = vadd.f32 %v2700_v27, %v2699_v19  ;;  %3313 = vpow2.f32 %v2618_v35  ;;  %v2751_v29 = vmul.f32 %v3304_v62, %v4511_v18  ;;  %v2858_v56 = vsel %vm2459_vm11, %v2782_v8, 0.0 }
 0x885   :  { %v2602_v5 = vmul.f32 1.442695, %v2579_v58  ;;  %v2872_v50 = vsel %vm2459_vm11, %v2784_v32, 0.0  ;;  %v2847_v43 = vrot.slane %v2846_v48, 2  ;;  %v2854_v7 = vrot.slane %v2853_v47, 2 }
 0x886   :  { %v2702_v37 = vrot.slane %v2701_v30, 1  ;;  %v2859_v46 = vrot.slane %v2858_v56, 4  ;;  %v2873_v22 = vrot.slane %v2872_v50, 4  ;;  %v2790_v42 = vadd.f32 %v2789_v11, %v2788_v31 }
 0x887   :  { %3315 = vpow2.f32 %v2602_v5  ;;  %v2797_v53 = vadd.f32 %v2796_v25, %v2795_v49  ;;  %v2848_v13 = vadd.f32 %v2847_v43, %v2846_v48  ;;  %v2855_v15 = vadd.f32 %v2854_v7, %v2853_v47 }
 0x888   :  { %v4601_v6 = vpop.eup %3305  ;;  %v2703_v38 = vadd.f32 %v2702_v37, %v2701_v30  ;;  %v2860_v51 = vadd.f32 %v2859_v46, %v2858_v56  ;;  %v2874_v8 = vadd.f32 %v2873_v22, %v2872_v50  ;;  %v2791_v60 = vrot.slane %v2790_v42, 2 }
 0x889   :  { %v2718_v18 = vsel %vm2459_vm11, %v4601_v6, 0.0  ;;  %v2798_v55 = vrot.slane %v2797_v53, 2  ;;  %v2849_v23 = vrot.slane %v2848_v13, 1  ;;  %v2856_v17 = vrot.slane %v2855_v15, 1 }
 0x88a   :  { %3317 = vrcp.f32 %v2703_v38  ;;  %v2719_v9 = vrot.slane %v2718_v18, 4  ;;  %v2775_v3 = vmul.f32 %v4576_v20, %v2751_v29  ;;  %v2861_v40 = vrot.slane %v2860_v51, 2 }
 0x88b   :  { %v3308_v14 = vpop.eup %3307  ;;  %v2875_v54 = vrot.slane %v2874_v8, 2  ;;  %v2792_v34 = vadd.f32 %v2791_v60, %v2790_v42  ;;  %v2850_v26 = vadd.f32 %v2849_v23, %v2848_v13  ;;  %v2857_v39 = vadd.f32 %v2856_v17, %v2855_v15 }
 0x88c   :  { %v3310_v24 = vpop.eup %3309  ;;  %v2720_v44 = vadd.f32 %v2719_v9, %v2718_v18  ;;  %v2754_v16 = vmul.f32 %v3308_v14, %v4554_v28  ;;  %v2862_v36 = vadd.f32 %v2861_v40, %v2860_v51  ;;  %v2799_v63 = vadd.f32 %v2798_v55, %v2797_v53 }
 0x88d   :  { %v4607_v0 = vpop.eup %3311  ;;  %v2753_v52 = vmul.f32 %v3310_v24, %v4559_v10  ;;  %v2793_v59 = vrot.slane %v2792_v34, 1  ;;  %v2923_v12 = vsel %vm1081_vm3, %v2857_v39, %v2850_v26  ;;  %v2776_v33 = vmul.f32 %v4576_v20, %v4566_v57 }
 0x88e   :  { %v4610_v31 = vpop.eup %3313  ;;  %v2721_v41 = vrot.slane %v2720_v44, 2  ;;  %v2711_v19 = vsel %vm2459_vm11, %v4607_v0, 0.0  ;;  %v2863_v49 = vrot.slane %v2862_v36, 1  ;;  %v4619_v62 = vadd.f32 %v2875_v54, %v2874_v8 }
 0x88f   :  { %v2712_v4 = vrot.slane %v2711_v19, 4  ;;  %v2725_v28 = vsel %vm2459_vm11, %v4610_v31, 0.0  ;;  %v2777_v35 = vmul.f32 %v4576_v20, %v2753_v52  ;;  %v2778_v11 = vmul.f32 %v4576_v20, %v2754_v16 }
 0x890   :  { %v2722_v10 = vadd.f32 %v2721_v41, %v2720_v44  ;;  %v2726_v27 = vrot.slane %v2725_v28, 4  ;;  %v2864_v32 = vadd.f32 %v2863_v49, %v2862_v36  ;;  %v2794_v30 = vadd.f32 %v2793_v59, %v2792_v34 }
 0x891   :  { %v4623_v58 = vpop.eup %3315  ;;  %v2713_v25 = vadd.f32 %v2712_v4, %v2711_v19  ;;  %v2800_v48 = vrot.slane %v2799_v63, 1  ;;  %v2802_v5 = vsel %vm2459_vm11, %v4589_v45, 0.0  ;;  %v2809_v53 = vsel %vm2459_vm11, %v2775_v3, 0.0 }
 0x892   :  { %v2723_v57 = vrot.slane %v2722_v10, 1  ;;  %v2727_v47 = vadd.f32 %v2726_v27, %v2725_v28  ;;  %v2669_v29 = vsel %vm2459_vm11, %v4623_v58, 0.0  ;;  %v4630_v37 = vsel %vm1083_vm4, %v2864_v32, %v2923_v12 }
 0x893   :  { %v2714_v56 = vrot.slane %v2713_v25, 2  ;;  %v2670_v50 = vrot.slane %v2669_v29, 4  ;;  %v2801_v43 = vadd.f32 %v2800_v48, %v2799_v63  ;;  %v2803_v42 = vrot.slane %v2802_v5, 4 }
 0x894   :  { %v3318_v7 = vpop.eup %3317  ;;  %v2724_v46 = vadd.f32 %v2723_v57, %v2722_v10  ;;  %v2728_v22 = vrot.slane %v2727_v47, 2  ;;  %v2810_v51 = vrot.slane %v2809_v53, 4  ;;  %v2816_v8 = vsel %vm2459_vm11, %v2776_v33, 0.0 }
 0x895   :  { %v2759_v38 = vmul.f32 %v3318_v7, %v4579_v21  ;;  %v2715_v13 = vadd.f32 %v2714_v56, %v2713_v25  ;;  %v2671_v15 = vadd.f32 %v2670_v50, %v2669_v29  ;;  %v2804_v45 = vadd.f32 %v2803_v42, %v2802_v5 }
 0x896   :  { %3319 = vrcp.f32 %v2724_v46  ;;  %v2729_v18 = vadd.f32 %v2728_v22, %v2727_v47  ;;  %v2811_v23 = vadd.f32 %v2810_v51, %v2809_v53  ;;  %v2817_v40 = vrot.slane %v2816_v8, 4 }
 0x897   :  { %v2716_v60 = vrot.slane %v2715_v13, 1  ;;  %v2672_v55 = vrot.slane %v2671_v15, 2  ;;  %v2783_v9 = vmul.f32 %v4522_v61, %v2759_v38  ;;  %v2805_v14 = vrot.slane %v2804_v45, 2 }
 0x898   :  { %v2730_v17 = vrot.slane %v2729_v18, 1  ;;  %v2823_v3 = vsel %vm2459_vm11, %v2777_v35, 0.0  ;;  %v2812_v24 = vrot.slane %v2811_v23, 2  ;;  %v2818_v16 = vadd.f32 %v2817_v40, %v2816_v8 }
 0x899   :  { %v2717_v54 = vadd.f32 %v2716_v60, %v2715_v13  ;;  %v2673_v21 = vadd.f32 %v2672_v55, %v2671_v15  ;;  %v2865_v34 = vsel %vm2459_vm11, %v2783_v9, 0.0  ;;  %v2806_v39 = vadd.f32 %v2805_v14, %v2804_v45 }
 0x89a   :  { %v2731_v44 = vadd.f32 %v2730_v17, %v2729_v18  ;;  %v2866_v26 = vrot.slane %v2865_v34, 4  ;;  %v2813_v52 = vadd.f32 %v2812_v24, %v2811_v23  ;;  %v2824_v59 = vrot.slane %v2823_v3, 4 }
 0x89b   :  { %3321 = vrcp.f32 %v2717_v54  ;;  %v2674_v36 = vrot.slane %v2673_v21, 1  ;;  %v2807_v41 = vrot.slane %v2806_v39, 1  ;;  %v2819_v19 = vrot.slane %v2818_v16, 2 }
 0x89c   :  { %3323 = vrcp.f32 %v2731_v44  ;;  %v2867_v63 = vadd.f32 %v2866_v26, %v2865_v34  ;;  %v2814_v33 = vrot.slane %v2813_v52, 1  ;;  %v2825_v4 = vadd.f32 %v2824_v59, %v2823_v3 }
 0x89d   :  { %v2675_v12 = vadd.f32 %v2674_v36, %v2673_v21  ;;  %v2830_v28 = vsel %vm2459_vm11, %v2778_v11, 0.0  ;;  %v2808_v10 = vadd.f32 %v2807_v41, %v2806_v39  ;;  %v2820_v27 = vadd.f32 %v2819_v19, %v2818_v16 }
 0x89e   :  { %v2868_v49 = vrot.slane %v2867_v63, 2  ;;  %v2831_v35 = vrot.slane %v2830_v28, 4  ;;  %v2815_v25 = vadd.f32 %v2814_v33, %v2813_v52  ;;  %v2826_v32 = vrot.slane %v2825_v4, 2 }
 0x89f   :  { %3325 = vrcp.f32 %v2675_v12  ;;  %v2916_v48 = vsel %vm1081_vm3, %v2801_v43, %v2794_v30  ;;  %v2821_v29 = vrot.slane %v2820_v27, 1  ;;  %v2877_v7 = vrot.slane %v4619_v62, 1 }
 0x8a0   :  { %v3320_v57 = vpop.eup %3319  ;;  %v2869_v47 = vadd.f32 %v2868_v49, %v2867_v63  ;;  %v2832_v5 = vadd.f32 %v2831_v35, %v2830_v28  ;;  %v2917_v56 = vsel %vm1083_vm4, %v2808_v10, %v2916_v48  ;;  %v2827_v11 = vadd.f32 %v2826_v32, %v2825_v4 }
 0x8a1   :  { %v2762_v50 = vmul.f32 %v3320_v57, %v4601_v6  ;;  %v2918_v46 = vsel %vm1085_vm5, %v2815_v25, %v2917_v56  ;;  %v2822_v42 = vadd.f32 %v2821_v29, %v2820_v27  ;;  %v2878_v18 = vadd.f32 %v2877_v7, %v4619_v62 }
 0x8a2   :  { %v2870_v22 = vrot.slane %v2869_v47, 1  ;;  %v2833_v53 = vrot.slane %v2832_v5, 2  ;;  %v2828_v13 = vrot.slane %v2827_v11, 1 }
 0x8a3   :  { %v2786_v38 = vmul.f32 %v4522_v61, %v2762_v50  ;;  %v2919_v15 = vsel %vm1087_vm6, %v2822_v42, %v2918_v46 }
 0x8a4   :  { %v2871_v30 = vadd.f32 %v2870_v22, %v2869_v47  ;;  %v2834_v43 = vadd.f32 %v2833_v53, %v2832_v5  ;;  %v2829_v45 = vadd.f32 %v2828_v13, %v2827_v11 }
 0x8a5   :  { %v3322_v51 = vpop.eup %3321  ;;  %v2886_v6 = vsel %vm2459_vm11, %v2786_v38, 0.0 }
 0x8a6   :  { %v3324_v8 = vpop.eup %3323  ;;  %v2761_v60 = vmul.f32 %v3322_v51, %v4607_v0  ;;  %v2887_v55 = vrot.slane %v2886_v6, 4  ;;  %v2925_v9 = vsel %vm1085_vm5, %v2871_v30, %v4630_v37  ;;  %v2835_v23 = vrot.slane %v2834_v43, 1 }
 0x8a7   :  { %v2763_v17 = vmul.f32 %v3324_v8, %v4610_v31  ;;  %v2926_v14 = vsel %vm1087_vm6, %v2878_v18, %v2925_v9  ;;  %v2920_v40 = vsel %vm1089_vm7, %v2829_v45, %v2919_v15 }
 0x8a8   :  { %v2785_v3 = vmul.f32 %v4522_v61, %v2761_v60  ;;  %v2888_v62 = vadd.f32 %v2887_v55, %v2886_v6  ;;  %v2836_v54 = vadd.f32 %v2835_v23, %v2834_v43 }
 0x8a9   :  { %v3326_v21 = vpop.eup %3325  ;;  %v2787_v34 = vmul.f32 %v4522_v61, %v2763_v17 }
 0x8aa   :  { %v2879_v0 = vsel %vm2459_vm11, %v2785_v3, 0.0  ;;  %v2889_v24 = vrot.slane %v2888_v62, 2  ;;  %v2755_v44 = vmul.f32 %v3326_v21, %v4623_v58  ;;  %v2921_v37 = vsel %vm1091_vm8, %v2836_v54, %v2920_v40 }
 0x8ab   :  { %v2880_v26 = vrot.slane %v2879_v0, 4  ;;  %v2893_v31 = vsel %vm2459_vm11, %v2787_v34, 0.0 }
 0x8ac   :  { %v2894_v39 = vrot.slane %v2893_v31, 4  ;;  %v2779_v16 = vmul.f32 %v4576_v20, %v2755_v44  ;;  %v2890_v52 = vadd.f32 %v2889_v24, %v2888_v62 }
 0x8ad   :  { %v2881_v36 = vadd.f32 %v2880_v26, %v2879_v0 }
 0x8ae   :  { %v2895_v59 = vadd.f32 %v2894_v39, %v2893_v31  ;;  %v2837_v63 = vsel %vm2459_vm11, %v2779_v16, 0.0  ;;  %v2891_v4 = vrot.slane %v2890_v52, 1 }
 0x8af   :  { %v2882_v41 = vrot.slane %v2881_v36, 2  ;;  %v2838_v61 = vrot.slane %v2837_v63, 4 }
 0x8b0   :  { %v2896_v19 = vrot.slane %v2895_v59, 2  ;;  %v2892_v25 = vadd.f32 %v2891_v4, %v2890_v52 }
 0x8b1   :  { %v2883_v12 = vadd.f32 %v2882_v41, %v2881_v36  ;;  %v2839_v33 = vadd.f32 %v2838_v61, %v2837_v63 }
 0x8b2   :  { %v2897_v58 = vadd.f32 %v2896_v19, %v2895_v59 }
 0x8b3   :  { %v2884_v28 = vrot.slane %v2883_v12, 1  ;;  %v2840_v49 = vrot.slane %v2839_v33, 2 }
 0x8b4   :  { %v2898_v10 = vrot.slane %v2897_v58, 1 }
 0x8b5   :  { %v2885_v27 = vadd.f32 %v2884_v28, %v2883_v12  ;;  %v2841_v35 = vadd.f32 %v2840_v49, %v2839_v33 }
 0x8b6   :  { %v2899_v32 = vadd.f32 %v2898_v10, %v2897_v58 }
 0x8b7   :  { %v2927_v20 = vsel %vm1089_vm7, %v2885_v27, %v2926_v14  ;;  %v2842_v48 = vrot.slane %v2841_v35, 1 }
 0x8b8   :  { %v2928_v57 = vsel %vm1091_vm8, %v2892_v25, %v2927_v20 }
 0x8b9   :  { %v2929_v47 = vsel %vm1093_vm9, %v2899_v32, %v2928_v57  ;;  %v2843_v29 = vadd.f32 %v2842_v48, %v2841_v35 }
 0x8ba   :  { %2932 = vrot.lane.b32.xlu1 %v2929_v47, %s3378_s11 }
 0x8bb   :  { %v2922_v5 = vsel %vm1093_vm9, %v2843_v29, %v2921_v37 }
 0x8bc   :  { %2930 = vrot.lane.b32.xlu0 %v2922_v5, %s3378_s11 }
 0x92c   :  { %v2933_v56 = vpop.permute.xlu1 %2932 }
 0x92d   :  { %v2937_v50 = vadd.f32 %v2933_v56, %v4304_v2 }
 0x92e   :  { %v2931_v7 = vpop.permute.xlu0 %2930 }
 0x92f   :  { %2939 = vst.msk [vmem:[#allocation5 + $0x8] sm:$0xff] %vm254_vm2, %v2937_v50  ;;  %v2936_v11 = vadd.f32 %v2931_v7, %v4307_v1 }
 0x931   :  { %2938 = vst.msk [vmem:[#allocation5] sm:$0xff] %vm254_vm2, %v2936_v11 }
 0x932   :  { %3362 = shalt.err (!%p3359_p12)
}
 0x933   :  { %s3363_s18 = scalar_lea.hbm %s4691_s7, 256 }
 0x934   :  { %p3364_p13 = scmp.ne.s32.totalorder %s4691_s7, %s3363_s18  ;;  %p3367_p0 = scmp.lt.u32.totalorder %s3363_s18, %s4691_s7 }
 0x936   :  { %p3369_p1 = pnand %p3367_p0, %p3364_p13 }
 0x938   :  { %3372 = shalt.err (!%p3369_p1)
}
 0x939   :  { %s3386_s21 = smov 128   ;;  %s3387_s22 = smov 8  }
 0x93a   :  { %2951 = dma.vmem_to_hbm [thread:$0]  %s2946_s6, 256, %s4691_s7, [#allocation4], %s3386_s21, %s3386_s21, %s3387_s22  }
 0x93b   :  { %3375 = dma.done.wait [#allocation4], 256  }
 0x93c   :  { %3376 = vsyncadd [#allocation4], 4294967040 }
 0x93d   :  { %2955 = vsyncpa [#allocation3], 1 }
 0x93e   :  { %2956 = vsyncpa [#allocation4], 1 }

</bundles_post_ra>
